<compile_context>
chip_gen: v6e
topology: v6e:2x2x1
jax: 0.10.0
libtpu: 0.0.40
codegen_flags: <defaults>
</compile_context>

<pallas_src>
import functools
import numpy as np
import jax
import jax.numpy as jnp
from jax.experimental import pallas as pl
from jax.experimental.pallas import tpu as pltpu

LANE = 128  # TPU lane width; all channel dims are padded to this for dense stores.


def _round_up(x, m):
    return (x + m - 1) // m * m


# ------------------- tiled matmul + affine(+ReLU) kernel ---------------------
# out = relu((A @ B) * scale + shift); used for the backbone convs (im2col GEMM).

def _matmul_affine_kernel(a_ref, b_ref, s_ref, t_ref, o_ref, *, relu):
    acc = jnp.dot(a_ref[...], b_ref[...], preferred_element_type=jnp.float32)
    acc = acc * s_ref[...] + t_ref[...]
    if relu:
        acc = jnp.maximum(acc, 0.0)
    o_ref[...] = acc.astype(o_ref.dtype)


def matmul_affine(A, B, scale, shift, *, relu=False, out_dtype=jnp.float32):
    """A:(M,K), B:(K,Npad) with Npad % 128 == 0.  bf16 MXU inputs, f32 epilogue."""
    M, K = A.shape
    K2, N = B.shape
    assert K == K2 and N % LANE == 0
    TM = 256 if M >= 256 else _round_up(max(M, 8), 8)
    TN = LANE
    Mpad = _round_up(M, TM)
    if Mpad != M:
        A = jnp.pad(A, ((0, Mpad - M), (0, 0)))
    grid = (Mpad // TM, N // TN)
    flops = 2 * Mpad * N * K
    bytes_accessed = (Mpad * K + K * N) * 2 + Mpad * N * jnp.dtype(out_dtype).itemsize

    out = pl.pallas_call(
        functools.partial(_matmul_affine_kernel, relu=relu),
        out_shape=jax.ShapeDtypeStruct((Mpad, N), out_dtype),
        grid=grid,
        in_specs=[
            pl.BlockSpec((TM, K), lambda i, j: (i, 0)),
            pl.BlockSpec((K, TN), lambda i, j: (0, j)),
            pl.BlockSpec((1, TN), lambda i, j: (0, j)),
            pl.BlockSpec((1, TN), lambda i, j: (0, j)),
        ],
        out_specs=pl.BlockSpec((TM, TN), lambda i, j: (i, j)),
        compiler_params=pltpu.CompilerParams(
            dimension_semantics=("parallel", "parallel"),
            vmem_limit_bytes=32 * 1024 * 1024),
        cost_estimate=pl.CostEstimate(flops=int(flops), transcendentals=0,
                                      bytes_accessed=int(bytes_accessed)),
    )(A.astype(jnp.bfloat16), B.astype(jnp.bfloat16),
      scale.reshape(1, N).astype(jnp.float32),
      shift.reshape(1, N).astype(jnp.float32))
    return out[:M]


# ----------------------------- backbone conv ---------------------------------

def conv2d(x_nhwc, wm_packed, scale_p, shift_p, *, kh, kw, stride, padding,
           relu, out_dtype):
    """PyTorch-semantics conv: patch extraction (wrapper) + tiled Pallas GEMM.
    Returns channel-padded (lane-dense, Cout padded to 128) NHWC activations."""
    N, H, W, Cin = x_nhwc.shape
    Kpad, Npad = wm_packed.shape
    K = kh * kw * Cin
    Ho = (H + 2 * padding - kh) // stride + 1
    Wo = (W + 2 * padding - kw) // stride + 1
    xp = jnp.pad(x_nhwc, ((0, 0), (padding, padding), (padding, padding), (0, 0)))
    cols = []
    for dh in range(kh):
        for dw in range(kw):
            cols.append(xp[:, dh:dh + (Ho - 1) * stride + 1:stride,
                           dw:dw + (Wo - 1) * stride + 1:stride, :])
    patches = jnp.stack(cols, axis=3)                  # (N, Ho, Wo, kh*kw, Cin)
    A = patches.reshape(N * Ho * Wo, K)
    if Kpad != K:
        A = jnp.pad(A, ((0, 0), (0, Kpad - K)))
    y = matmul_affine(A, wm_packed, scale_p, shift_p, relu=relu, out_dtype=out_dtype)
    return y.reshape(N, Ho, Wo, Npad)


# ------------- fused FCNHead (3x3 conv + BN + ReLU + 1x1 conv) + upsample -----

@functools.lru_cache(maxsize=None)
def _source_taps(in_size, out_size):
    """Static 2-tap (i0, i1, frac) per output index; PyTorch bilinear,
    align_corners=False (src = ratio*(dst+0.5)-0.5, clamped at 0)."""
    ratio = in_size / out_size
    taps = []
    for i in range(out_size):
        src = max(ratio * (i + 0.5) - 0.5, 0.0)
        i0 = min(int(np.floor(src)), in_size - 1)
        i1 = min(i0 + 1, in_size - 1)
        taps.append((i0, i1, float(src - i0)))
    return tuple(taps)


@functools.lru_cache(maxsize=None)
def _bilinear_matrix_np(in_size, out_size):
    """Row-stochastic (out_size, in_size) interpolation matrix (same taps)."""
    M = np.zeros((out_size, in_size), dtype=np.float32)
    for i, (i0, i1, f) in enumerate(_source_taps(in_size, out_size)):
        M[i, i0] += 1.0 - f
        M[i, i1] += f
    return M


def _head_kernel(x_ref, w1_ref, s_ref, t_ref, w2_ref, b2_ref, mw_ref, o_ref, *,
                 hf, wf, taps_h):
    # x_ref block: (1, hf+2, Wpad, 128) spatially pre-padded feature map (bf16).
    x = x_ref[0]
    wrows = []
    for h in range(hf):                                  # static unroll (small hf)
        acc = jnp.zeros((wf, LANE), jnp.float32)
        for dh in range(3):                              # 3x3 conv, stride 1, pad 1
            for dw in range(3):
                xs = x[h + dh, dw:dw + wf, :]            # (wf, 128) static window
                acc = acc + jnp.dot(xs, w1_ref[dh * 3 + dw],
                                    preferred_element_type=jnp.float32)
        # folded BatchNorm affine + ReLU  (Dropout is identity in eval mode)
        hrow = jnp.maximum(acc * s_ref[...] + t_ref[...], 0.0)
        # fused 1x1 classifier conv (K=8 padded to 128) + bias
        lrow = jnp.dot(hrow.astype(jnp.bfloat16), w2_ref[...],
                       preferred_element_type=jnp.float32) + b2_ref[...]
        # fused bilinear W-interpolation: (out_w, wf) @ (wf, 128)
        wrows.append(jnp.dot(mw_ref[...], lrow, preferred_element_type=jnp.float32))
    # bilinear H-interpolation: 2-tap VPU lerp with trace-time-constant taps
    orows = [(1.0 - f) * wrows[i0] + f * wrows[i1] for (i0, i1, f) in taps_h]
    o_ref[0] = jnp.stack(orows, axis=0).astype(o_ref.dtype)   # (out_h, out_w, 128)


def fcn_head_upsample(feat, w1, s, t, w2, b2, out_h, out_w):
    """feat: (N, hf, wf, 128) lane-padded features.  Returns (N, out_h, out_w, 128)."""
    N, hf, wf, CP = feat.shape
    assert CP == LANE
    wp = _round_up(wf + 2, 8)                            # sublane-aligned padded width
    xpad = jnp.pad(feat, ((0, 0), (1, 1), (1, wp - wf - 1), (0, 0)))
    taps_h = _source_taps(hf, out_h)
    mw = jnp.asarray(_bilinear_matrix_np(wf, out_w))     # (out_w, wf) f32
    kernel = functools.partial(_head_kernel, hf=hf, wf=wf, taps_h=taps_h)
    flops = N * (hf * wf * 10 * 2 * CP * CP + hf * 2 * out_w * wf * CP)
    bytes_accessed = xpad.size * 2 + (w1.size + w2.size) * 2 + N * out_h * out_w * CP * 4

    return pl.pallas_call(
        kernel,
        out_shape=jax.ShapeDtypeStruct((N, out_h, out_w, CP), jnp.float32),
        grid=(N,),
        in_specs=[
            pl.BlockSpec((1, hf + 2, wp, CP), lambda n: (n, 0, 0, 0)),
            pl.BlockSpec((9, CP, CP), lambda n: (0, 0, 0)),
            pl.BlockSpec((1, CP), lambda n: (0, 0)),
            pl.BlockSpec((1, CP), lambda n: (0, 0)),
            pl.BlockSpec((CP, CP), lambda n: (0, 0)),
            pl.BlockSpec((1, CP), lambda n: (0, 0)),
            pl.BlockSpec((out_w, wf), lambda n: (0, 0)),
        ],
        out_specs=pl.BlockSpec((1, out_h, out_w, CP), lambda n: (n, 0, 0, 0)),
        compiler_params=pltpu.CompilerParams(
            dimension_semantics=("parallel",),
            vmem_limit_bytes=32 * 1024 * 1024),
        cost_estimate=pl.CostEstimate(flops=int(flops), transcendentals=0,
                                      bytes_accessed=int(bytes_accessed)),
    )(xpad.astype(jnp.bfloat16), w1, s, t, w2, b2, mw)


# --------------------------- params / packing --------------------------------

def init_params(key, cin=4, num_classes=6):
    """Mirrors the concrete PyTorch module's parameters."""
    ks = jax.random.split(key, 10)
    p = {}
    # backbone: conv3x3 s2 (cin->16)+ReLU, conv3x3 s2 (16->32)+ReLU -> features['out']
    p['b1_w'] = 0.1 * jax.random.normal(ks[0], (16, cin, 3, 3), jnp.float32)
    p['b1_b'] = 0.1 * jax.random.normal(ks[1], (16,), jnp.float32)
    p['b2_w'] = 0.1 * jax.random.normal(ks[2], (32, 16, 3, 3), jnp.float32)
    p['b2_b'] = 0.1 * jax.random.normal(ks[3], (32,), jnp.float32)
    # classifier = FCNHead(32, num_classes): conv3x3(32->8, no bias), BN(8), ReLU,
    # Dropout(0.1), conv1x1(8->num_classes)
    p['c1_w'] = 0.1 * jax.random.normal(ks[4], (8, 32, 3, 3), jnp.float32)
    p['bn_gamma'] = 1.0 + 0.1 * jax.random.normal(ks[5], (8,), jnp.float32)
    p['bn_beta'] = 0.1 * jax.random.normal(ks[6], (8,), jnp.float32)
    p['bn_mean'] = 0.1 * jax.random.normal(ks[7], (8,), jnp.float32)
    p['bn_var'] = jnp.abs(jax.random.normal(ks[8], (8,), jnp.float32)) + 0.5
    p['c2_w'] = 0.1 * jax.random.normal(ks[9], (num_classes, 8, 1, 1), jnp.float32)
    p['c2_b'] = jnp.zeros((num_classes,), jnp.float32)
    return p


def pack_params(p):
    """One-time weight packing: transpose to GEMM layout, pad channels to 128
    lanes (zeros), fold BatchNorm into an affine, cast MXU operands to bf16."""
    def pack_conv(w_oihw, scale, shift):
        cout, cin, kh, kw = w_oihw.shape
        k = kh * kw * cin
        kpad, npad = _round_up(k, LANE), _round_up(cout, LANE)
        wm = jnp.transpose(w_oihw, (2, 3, 1, 0)).reshape(k, cout)
        wm = jnp.pad(wm, ((0, kpad - k), (0, npad - cout))).astype(jnp.bfloat16)
        s = jnp.pad(scale.astype(jnp.float32), (0, npad - cout), constant_values=1.0)
        t = jnp.pad(shift.astype(jnp.float32), (0, npad - cout))
        return wm, s, t

    eps = 1e-5
    bn_s = p['bn_gamma'] / jnp.sqrt(p['bn_var'] + eps)
    bn_t = p['bn_beta'] - p['bn_mean'] * bn_s

    packed = {}
    packed['b1_wm'], packed['b1_s'], packed['b1_t'] = pack_conv(
        p['b1_w'], jnp.ones((p['b1_w'].shape[0],), jnp.float32), p['b1_b'])
    packed['b2_wm'], packed['b2_s'], packed['b2_t'] = pack_conv(
        p['b2_w'], jnp.ones((p['b2_w'].shape[0],), jnp.float32), p['b2_b'])

    # head: per-tap (Cin_pad, Cout_pad) matrices for the 3x3 conv, BN affine,
    # and the 1x1 classifier conv.
    c1 = p['c1_w']                                  # (8, 32, 3, 3) OIHW
    co1, ci1 = c1.shape[0], c1.shape[1]
    w1 = jnp.transpose(c1, (2, 3, 1, 0)).reshape(9, ci1, co1)
    packed['head_w1'] = jnp.pad(
        w1, ((0, 0), (0, LANE - ci1), (0, LANE - co1))).astype(jnp.bfloat16)
    packed['head_s'] = jnp.pad(bn_s.astype(jnp.float32), (0, LANE - co1),
                               constant_values=1.0).reshape(1, LANE)
    packed['head_t'] = jnp.pad(bn_t.astype(jnp.float32),
                               (0, LANE - co1)).reshape(1, LANE)
    c2 = p['c2_w'][:, :, 0, 0]                      # (num_classes, 8)
    nc = c2.shape[0]
    packed['head_w2'] = jnp.pad(jnp.transpose(c2, (1, 0)),
                                ((0, LANE - co1), (0, LANE - nc))).astype(jnp.bfloat16)
    packed['head_b2'] = jnp.pad(p['c2_b'].astype(jnp.float32),
                                (0, LANE - nc)).reshape(1, LANE)
    return packed


# ------------------------------- FCN forward ---------------------------------

def build_fcn_forward(params):
    packed = pack_params(params)                    # done once, closed over as constants
    c1out = int(params['b1_w'].shape[0])
    num_classes = int(params['c2_w'].shape[0])

    def forward(x_nchw):
        in_h, in_w = x_nchw.shape[-2], x_nchw.shape[-1]
        x = jnp.transpose(x_nchw, (0, 2, 3, 1))     # NCHW -> NHWC

        # backbone (features['out']); bf16 lane-dense activations
        h1 = conv2d(x, packed['b1_wm'], packed['b1_s'], packed['b1_t'],
                    kh=3, kw=3, stride=2, padding=1, relu=True,
                    out_dtype=jnp.bfloat16)
        h1 = h1[..., :c1out]                        # drop channel padding before im2col
        feat = conv2d(h1, packed['b2_wm'], packed['b2_s'], packed['b2_t'],
                      kh=3, kw=3, stride=2, padding=1, relu=True,
                      out_dtype=jnp.bfloat16)       # (N, Hf, Wf, 128), pad lanes are 0

        # classifier (FCNHead, eval) + F.interpolate(bilinear, align_corners=False),
        # fused into one Pallas kernel.
        up = fcn_head_upsample(feat, packed['head_w1'], packed['head_s'],
                               packed['head_t'], packed['head_w2'],
                               packed['head_b2'], in_h, in_w)
        out = jnp.transpose(up, (0, 3, 1, 2))[:, :num_classes]   # NHWC -> NCHW, unpad
        # aux_classifier is None -> no 'aux' entry (matches FCN.forward)
        return {'out': out}

    return forward


if __name__ == "__main__":
    key = jax.random.PRNGKey(0)
    kx, kp = jax.random.split(key)
    x = jax.random.normal(kx, (2, 4, 16, 16), jnp.float32)      # NCHW, like PyTorch
    params = init_params(kp, cin=4, num_classes=6)

    forward = jax.jit(build_fcn_forward(params))
    result = forward(x)
    out = result['out']
    jax.block_until_ready(out)
    assert out.shape == (2, 6, 16, 16), out.shape
    assert bool(jnp.all(jnp.isfinite(out)))
    print("KERNEL_OK")
</pallas_src>

<mosaic_0001>
module attributes {stable_mosaic.version = 11 : i64} {
  func.func @_matmul_affine_kernel(%arg0: i32, %arg1: i32, %arg2: memref<128x128xbf16, #tpu.memory_space<vmem>>, %arg3: memref<128x128xbf16, #tpu.memory_space<vmem>>, %arg4: memref<1x128xf32, #tpu.memory_space<vmem>>, %arg5: memref<1x128xf32, #tpu.memory_space<vmem>>, %arg6: memref<128x128xbf16, #tpu.memory_space<vmem>>) attributes {dimension_semantics = [#tpu.dimension_semantics<parallel>, #tpu.dimension_semantics<parallel>], iteration_bounds = array<i64: 1, 1>, scalar_prefetch = 0 : i64, scratch_operands = 0 : i64, tpu.core_type = #tpu.core_type<tc>, window_params = [{transform_indices = @transform_0, window_bounds = array<i64: 128, 128>}, {transform_indices = @transform_1, window_bounds = array<i64: 128, 128>}, {transform_indices = @transform_2, window_bounds = array<i64: 1, 128>}, {transform_indices = @transform_3, window_bounds = array<i64: 1, 128>}, {transform_indices = @transform_4, window_bounds = array<i64: 128, 128>}]} {
    %c0 = arith.constant 0 : index
    %c0_0 = arith.constant 0 : index
    %0 = vector.load %arg2[%c0, %c0_0] : memref<128x128xbf16, #tpu.memory_space<vmem>>, vector<128x128xbf16>
    %c0_1 = arith.constant 0 : index
    %c0_2 = arith.constant 0 : index
    %1 = vector.load %arg3[%c0_1, %c0_2] : memref<128x128xbf16, #tpu.memory_space<vmem>>, vector<128x128xbf16>
    %cst = arith.constant dense<0.000000e+00> : vector<128x128xf32>
    %2 = tpu.matmul %0, %1, %cst {dimension_numbers = #tpu.dot_dimension_numbers<[1], [0], [0], [1], [0, 0, 1, 1], [], []>} : vector<128x128xbf16>, vector<128x128xbf16>, vector<128x128xf32> -> vector<128x128xf32>
    %c0_3 = arith.constant 0 : index
    %c0_4 = arith.constant 0 : index
    %3 = vector.load %arg4[%c0_3, %c0_4] : memref<1x128xf32, #tpu.memory_space<vmem>>, vector<1x128xf32>
    %4 = vector.broadcast %3 : vector<1x128xf32> to vector<128x128xf32>
    %5 = arith.mulf %2, %4 : vector<128x128xf32>
    %c0_5 = arith.constant 0 : index
    %c0_6 = arith.constant 0 : index
    %6 = vector.load %arg5[%c0_5, %c0_6] : memref<1x128xf32, #tpu.memory_space<vmem>>, vector<1x128xf32>
    %7 = vector.broadcast %6 : vector<1x128xf32> to vector<128x128xf32>
    %8 = arith.addf %5, %7 : vector<128x128xf32>
    %cst_7 = arith.constant 0.000000e+00 : f32
    %9 = vector.broadcast %cst_7 : f32 to vector<128x128xf32>
    %10 = arith.maximumf %8, %9 : vector<128x128xf32>
    %11 = arith.truncf %10 : vector<128x128xf32> to vector<128x128xbf16>
    %c0_8 = arith.constant 0 : index
    %c0_9 = arith.constant 0 : index
    %12 = vector.load %arg6[%c0_8, %c0_9] : memref<128x128xbf16, #tpu.memory_space<vmem>>, vector<128x128xbf16>
    tpu.vector_store %arg6[%c0_8, %c0_9], %11 {strides = array<i32>} : memref<128x128xbf16, #tpu.memory_space<vmem>>, vector<128x128xbf16>,
    return
  }
  func.func @transform_0(%arg0: i32, %arg1: i32) -> (i32, i32) {
    %c0_i32 = arith.constant 0 : i32
    %c0_i32_0 = arith.constant 0 : i32
    return %arg0, %c0_i32 : i32, i32
  }
  func.func @transform_1(%arg0: i32, %arg1: i32) -> (i32, i32) {
    %c0_i32 = arith.constant 0 : i32
    %c0_i32_0 = arith.constant 0 : i32
    return %c0_i32, %arg1 : i32, i32
  }
  func.func @transform_2(%arg0: i32, %arg1: i32) -> (i32, i32) {
    %c0_i32 = arith.constant 0 : i32
    %c0_i32_0 = arith.constant 0 : i32
    return %c0_i32, %arg1 : i32, i32
  }
  func.func @transform_3(%arg0: i32, %arg1: i32) -> (i32, i32) {
    %c0_i32 = arith.constant 0 : i32
    %c0_i32_0 = arith.constant 0 : i32
    return %c0_i32, %arg1 : i32, i32
  }
  func.func @transform_4(%arg0: i32, %arg1: i32) -> (i32, i32) {
    %c0_i32 = arith.constant 0 : i32
    return %arg0, %arg1 : i32, i32
  }
}

module attributes {stable_mosaic.version = 11 : i64} {
  func.func @_matmul_affine_kernel(%arg0: i32, %arg1: i32, %arg2: memref<32x256xbf16, #tpu.memory_space<vmem>>, %arg3: memref<256x128xbf16, #tpu.memory_space<vmem>>, %arg4: memref<1x128xf32, #tpu.memory_space<vmem>>, %arg5: memref<1x128xf32, #tpu.memory_space<vmem>>, %arg6: memref<32x128xbf16, #tpu.memory_space<vmem>>) attributes {dimension_semantics = [#tpu.dimension_semantics<parallel>, #tpu.dimension_semantics<parallel>], iteration_bounds = array<i64: 1, 1>, scalar_prefetch = 0 : i64, scratch_operands = 0 : i64, tpu.core_type = #tpu.core_type<tc>, window_params = [{transform_indices = @transform_0, window_bounds = array<i64: 32, 256>}, {transform_indices = @transform_1, window_bounds = array<i64: 256, 128>}, {transform_indices = @transform_2, window_bounds = array<i64: 1, 128>}, {transform_indices = @transform_3, window_bounds = array<i64: 1, 128>}, {transform_indices = @transform_4, window_bounds = array<i64: 32, 128>}]} {
    %c0 = arith.constant 0 : index
    %c0_0 = arith.constant 0 : index
    %0 = vector.load %arg2[%c0, %c0_0] : memref<32x256xbf16, #tpu.memory_space<vmem>>, vector<32x256xbf16>
    %c0_1 = arith.constant 0 : index
    %c0_2 = arith.constant 0 : index
    %1 = vector.load %arg3[%c0_1, %c0_2] : memref<256x128xbf16, #tpu.memory_space<vmem>>, vector<256x128xbf16>
    %cst = arith.constant dense<0.000000e+00> : vector<32x128xf32>
    %2 = tpu.matmul %0, %1, %cst {dimension_numbers = #tpu.dot_dimension_numbers<[1], [0], [0], [1], [0, 0, 1, 1], [], []>} : vector<32x256xbf16>, vector<256x128xbf16>, vector<32x128xf32> -> vector<32x128xf32>
    %c0_3 = arith.constant 0 : index
    %c0_4 = arith.constant 0 : index
    %3 = vector.load %arg4[%c0_3, %c0_4] : memref<1x128xf32, #tpu.memory_space<vmem>>, vector<1x128xf32>
    %4 = vector.broadcast %3 : vector<1x128xf32> to vector<32x128xf32>
    %5 = arith.mulf %2, %4 : vector<32x128xf32>
    %c0_5 = arith.constant 0 : index
    %c0_6 = arith.constant 0 : index
    %6 = vector.load %arg5[%c0_5, %c0_6] : memref<1x128xf32, #tpu.memory_space<vmem>>, vector<1x128xf32>
    %7 = vector.broadcast %6 : vector<1x128xf32> to vector<32x128xf32>
    %8 = arith.addf %5, %7 : vector<32x128xf32>
    %cst_7 = arith.constant 0.000000e+00 : f32
    %9 = vector.broadcast %cst_7 : f32 to vector<32x128xf32>
    %10 = arith.maximumf %8, %9 : vector<32x128xf32>
    %11 = arith.truncf %10 : vector<32x128xf32> to vector<32x128xbf16>
    %c0_8 = arith.constant 0 : index
    %c0_9 = arith.constant 0 : index
    %12 = vector.load %arg6[%c0_8, %c0_9] : memref<32x128xbf16, #tpu.memory_space<vmem>>, vector<32x128xbf16>
    tpu.vector_store %arg6[%c0_8, %c0_9], %11 {strides = array<i32>} : memref<32x128xbf16, #tpu.memory_space<vmem>>, vector<32x128xbf16>,
    return
  }
  func.func @transform_0(%arg0: i32, %arg1: i32) -> (i32, i32) {
    %c0_i32 = arith.constant 0 : i32
    %c0_i32_0 = arith.constant 0 : i32
    return %arg0, %c0_i32 : i32, i32
  }
  func.func @transform_1(%arg0: i32, %arg1: i32) -> (i32, i32) {
    %c0_i32 = arith.constant 0 : i32
    %c0_i32_0 = arith.constant 0 : i32
    return %c0_i32, %arg1 : i32, i32
  }
  func.func @transform_2(%arg0: i32, %arg1: i32) -> (i32, i32) {
    %c0_i32 = arith.constant 0 : i32
    %c0_i32_0 = arith.constant 0 : i32
    return %c0_i32, %arg1 : i32, i32
  }
  func.func @transform_3(%arg0: i32, %arg1: i32) -> (i32, i32) {
    %c0_i32 = arith.constant 0 : i32
    %c0_i32_0 = arith.constant 0 : i32
    return %c0_i32, %arg1 : i32, i32
  }
  func.func @transform_4(%arg0: i32, %arg1: i32) -> (i32, i32) {
    %c0_i32 = arith.constant 0 : i32
    return %arg0, %arg1 : i32, i32
  }
}

module attributes {stable_mosaic.version = 11 : i64} {
  func.func @_head_kernel(%arg0: i32, %arg1: memref<1x6x8x128xbf16, #tpu.memory_space<vmem>>, %arg2: memref<9x128x128xbf16, #tpu.memory_space<vmem>>, %arg3: memref<1x128xf32, #tpu.memory_space<vmem>>, %arg4: memref<1x128xf32, #tpu.memory_space<vmem>>, %arg5: memref<128x128xbf16, #tpu.memory_space<vmem>>, %arg6: memref<1x128xf32, #tpu.memory_space<vmem>>, %arg7: memref<16x4xf32, #tpu.memory_space<vmem>>, %arg8: memref<1x16x16x128xf32, #tpu.memory_space<vmem>>) attributes {dimension_semantics = [#tpu.dimension_semantics<parallel>], iteration_bounds = array<i64: 2>, scalar_prefetch = 0 : i64, scratch_operands = 0 : i64, tpu.core_type = #tpu.core_type<tc>, window_params = [{transform_indices = @transform_0, window_bounds = array<i64: 1, 6, 8, 128>}, {pipeline_mode = #tpu.pipeline_mode<synchronous>, transform_indices = @transform_1, window_bounds = array<i64: 9, 128, 128>}, {pipeline_mode = #tpu.pipeline_mode<synchronous>, transform_indices = @transform_2, window_bounds = array<i64: 1, 128>}, {pipeline_mode = #tpu.pipeline_mode<synchronous>, transform_indices = @transform_3, window_bounds = array<i64: 1, 128>}, {pipeline_mode = #tpu.pipeline_mode<synchronous>, transform_indices = @transform_4, window_bounds = array<i64: 128, 128>}, {pipeline_mode = #tpu.pipeline_mode<synchronous>, transform_indices = @transform_5, window_bounds = array<i64: 1, 128>}, {pipeline_mode = #tpu.pipeline_mode<synchronous>, transform_indices = @transform_6, window_bounds = array<i64: 16, 4>}, {transform_indices = @transform_7, window_bounds = array<i64: 1, 16, 16, 128>}]} {
    %c0 = arith.constant 0 : index
    %c0_0 = arith.constant 0 : index
    %c0_1 = arith.constant 0 : index
    %c0_2 = arith.constant 0 : index
    %0 = vector.load %arg1[%c0, %c0_0, %c0_1, %c0_2] : memref<1x6x8x128xbf16, #tpu.memory_space<vmem>>, vector<1x6x8x128xbf16>
    %1 = vector.shape_cast %0 : vector<1x6x8x128xbf16> to vector<6x8x128xbf16>
    %cst = arith.constant 0.000000e+00 : f32
    %2 = vector.broadcast %cst : f32 to vector<4x128xf32>
    %3 = vector.extract_strided_slice %1 {offsets = [0, 0, 0], sizes = [1, 4, 128], strides = [1, 1, 1]} : vector<6x8x128xbf16> to vector<1x4x128xbf16>
    %4 = vector.shape_cast %3 : vector<1x4x128xbf16> to vector<4x128xbf16>
    %c0_3 = arith.constant 0 : index
    %c0_4 = arith.constant 0 : index
    %c0_5 = arith.constant 0 : index
    %5 = vector.load %arg2[%c0_3, %c0_4, %c0_5] : memref<9x128x128xbf16, #tpu.memory_space<vmem>>, vector<1x128x128xbf16>
    %6 = vector.shape_cast %5 : vector<1x128x128xbf16> to vector<128x128xbf16>
    %cst_6 = arith.constant dense<0.000000e+00> : vector<4x128xf32>
    %7 = tpu.matmul %4, %6, %cst_6 {dimension_numbers = #tpu.dot_dimension_numbers<[1], [0], [0], [1], [0, 0, 1, 1], [], []>} : vector<4x128xbf16>, vector<128x128xbf16>, vector<4x128xf32> -> vector<4x128xf32>
    %8 = arith.addf %2, %7 : vector<4x128xf32>
    %9 = vector.extract_strided_slice %1 {offsets = [0, 1, 0], sizes = [1, 4, 128], strides = [1, 1, 1]} : vector<6x8x128xbf16> to vector<1x4x128xbf16>
    %10 = vector.shape_cast %9 : vector<1x4x128xbf16> to vector<4x128xbf16>
    %c1 = arith.constant 1 : index
    %c0_7 = arith.constant 0 : index
    %c0_8 = arith.constant 0 : index
    %11 = vector.load %arg2[%c1, %c0_7, %c0_8] : memref<9x128x128xbf16, #tpu.memory_space<vmem>>, vector<1x128x128xbf16>
    %12 = vector.shape_cast %11 : vector<1x128x128xbf16> to vector<128x128xbf16>
    %cst_9 = arith.constant dense<0.000000e+00> : vector<4x128xf32>
    %13 = tpu.matmul %10, %12, %cst_9 {dimension_numbers = #tpu.dot_dimension_numbers<[1], [0], [0], [1], [0, 0, 1, 1], [], []>} : vector<4x128xbf16>, vector<128x128xbf16>, vector<4x128xf32> -> vector<4x128xf32>
    %14 = arith.addf %8, %13 : vector<4x128xf32>
    %15 = vector.extract_strided_slice %1 {offsets = [0, 2, 0], sizes = [1, 4, 128], strides = [1, 1, 1]} : vector<6x8x128xbf16> to vector<1x4x128xbf16>
    %16 = vector.shape_cast %15 : vector<1x4x128xbf16> to vector<4x128xbf16>
    %c2 = arith.constant 2 : index
    %c0_10 = arith.constant 0 : index
    %c0_11 = arith.constant 0 : index
    %17 = vector.load %arg2[%c2, %c0_10, %c0_11] : memref<9x128x128xbf16, #tpu.memory_space<vmem>>, vector<1x128x128xbf16>
    %18 = vector.shape_cast %17 : vector<1x128x128xbf16> to vector<128x128xbf16>
    %cst_12 = arith.constant dense<0.000000e+00> : vector<4x128xf32>
    %19 = tpu.matmul %16, %18, %cst_12 {dimension_numbers = #tpu.dot_dimension_numbers<[1], [0], [0], [1], [0, 0, 1, 1], [], []>} : vector<4x128xbf16>, vector<128x128xbf16>, vector<4x128xf32> -> vector<4x128xf32>
    %20 = arith.addf %14, %19 : vector<4x128xf32>
    %21 = vector.extract_strided_slice %1 {offsets = [1, 0, 0], sizes = [1, 4, 128], strides = [1, 1, 1]} : vector<6x8x128xbf16> to vector<1x4x128xbf16>
    %22 = vector.shape_cast %21 : vector<1x4x128xbf16> to vector<4x128xbf16>
    %c3 = arith.constant 3 : index
    %c0_13 = arith.constant 0 : index
    %c0_14 = arith.constant 0 : index
    %23 = vector.load %arg2[%c3, %c0_13, %c0_14] : memref<9x128x128xbf16, #tpu.memory_space<vmem>>, vector<1x128x128xbf16>
    %24 = vector.shape_cast %23 : vector<1x128x128xbf16> to vector<128x128xbf16>
    %cst_15 = arith.constant dense<0.000000e+00> : vector<4x128xf32>
    %25 = tpu.matmul %22, %24, %cst_15 {dimension_numbers = #tpu.dot_dimension_numbers<[1], [0], [0], [1], [0, 0, 1, 1], [], []>} : vector<4x128xbf16>, vector<128x128xbf16>, vector<4x128xf32> -> vector<4x128xf32>
    %26 = arith.addf %20, %25 : vector<4x128xf32>
    %27 = vector.extract_strided_slice %1 {offsets = [1, 1, 0], sizes = [1, 4, 128], strides = [1, 1, 1]} : vector<6x8x128xbf16> to vector<1x4x128xbf16>
    %28 = vector.shape_cast %27 : vector<1x4x128xbf16> to vector<4x128xbf16>
    %c4 = arith.constant 4 : index
    %c0_16 = arith.constant 0 : index
    %c0_17 = arith.constant 0 : index
    %29 = vector.load %arg2[%c4, %c0_16, %c0_17] : memref<9x128x128xbf16, #tpu.memory_space<vmem>>, vector<1x128x128xbf16>
    %30 = vector.shape_cast %29 : vector<1x128x128xbf16> to vector<128x128xbf16>
    %cst_18 = arith.constant dense<0.000000e+00> : vector<4x128xf32>
    %31 = tpu.matmul %28, %30, %cst_18 {dimension_numbers = #tpu.dot_dimension_numbers<[1], [0], [0], [1], [0, 0, 1, 1], [], []>} : vector<4x128xbf16>, vector<128x128xbf16>, vector<4x128xf32> -> vector<4x128xf32>
    %32 = arith.addf %26, %31 : vector<4x128xf32>
    %33 = vector.extract_strided_slice %1 {offsets = [1, 2, 0], sizes = [1, 4, 128], strides = [1, 1, 1]} : vector<6x8x128xbf16> to vector<1x4x128xbf16>
    %34 = vector.shape_cast %33 : vector<1x4x128xbf16> to vector<4x128xbf16>
    %c5 = arith.constant 5 : index
    %c0_19 = arith.constant 0 : index
    %c0_20 = arith.constant 0 : index
    %35 = vector.load %arg2[%c5, %c0_19, %c0_20] : memref<9x128x128xbf16, #tpu.memory_space<vmem>>, vector<1x128x128xbf16>
    %36 = vector.shape_cast %35 : vector<1x128x128xbf16> to vector<128x128xbf16>
    %cst_21 = arith.constant dense<0.000000e+00> : vector<4x128xf32>
    %37 = tpu.matmul %34, %36, %cst_21 {dimension_numbers = #tpu.dot_dimension_numbers<[1], [0], [0], [1], [0, 0, 1, 1], [], []>} : vector<4x128xbf16>, vector<128x128xbf16>, vector<4x128xf32> -> vector<4x128xf32>
    %38 = arith.addf %32, %37 : vector<4x128xf32>
    %39 = vector.extract_strided_slice %1 {offsets = [2, 0, 0], sizes = [1, 4, 128], strides = [1, 1, 1]} : vector<6x8x128xbf16> to vector<1x4x128xbf16>
    %40 = vector.shape_cast %39 : vector<1x4x128xbf16> to vector<4x128xbf16>
    %c6 = arith.constant 6 : index
    %c0_22 = arith.constant 0 : index
    %c0_23 = arith.constant 0 : index
    %41 = vector.load %arg2[%c6, %c0_22, %c0_23] : memref<9x128x128xbf16, #tpu.memory_space<vmem>>, vector<1x128x128xbf16>
    %42 = vector.shape_cast %41 : vector<1x128x128xbf16> to vector<128x128xbf16>
    %cst_24 = arith.constant dense<0.000000e+00> : vector<4x128xf32>
    %43 = tpu.matmul %40, %42, %cst_24 {dimension_numbers = #tpu.dot_dimension_numbers<[1], [0], [0], [1], [0, 0, 1, 1], [], []>} : vector<4x128xbf16>, vector<128x128xbf16>, vector<4x128xf32> -> vector<4x128xf32>
    %44 = arith.addf %38, %43 : vector<4x128xf32>
    %45 = vector.extract_strided_slice %1 {offsets = [2, 1, 0], sizes = [1, 4, 128], strides = [1, 1, 1]} : vector<6x8x128xbf16> to vector<1x4x128xbf16>
    %46 = vector.shape_cast %45 : vector<1x4x128xbf16> to vector<4x128xbf16>
    %c7 = arith.constant 7 : index
    %c0_25 = arith.constant 0 : index
    %c0_26 = arith.constant 0 : index
    %47 = vector.load %arg2[%c7, %c0_25, %c0_26] : memref<9x128x128xbf16, #tpu.memory_space<vmem>>, vector<1x128x128xbf16>
    %48 = vector.shape_cast %47 : vector<1x128x128xbf16> to vector<128x128xbf16>
    %cst_27 = arith.constant dense<0.000000e+00> : vector<4x128xf32>
    %49 = tpu.matmul %46, %48, %cst_27 {dimension_numbers = #tpu.dot_dimension_numbers<[1], [0], [0], [1], [0, 0, 1, 1], [], []>} : vector<4x128xbf16>, vector<128x128xbf16>, vector<4x128xf32> -> vector<4x128xf32>
    %50 = arith.addf %44, %49 : vector<4x128xf32>
    %51 = vector.extract_strided_slice %1 {offsets = [2, 2, 0], sizes = [1, 4, 128], strides = [1, 1, 1]} : vector<6x8x128xbf16> to vector<1x4x128xbf16>
    %52 = vector.shape_cast %51 : vector<1x4x128xbf16> to vector<4x128xbf16>
    %c8 = arith.constant 8 : index
    %c0_28 = arith.constant 0 : index
    %c0_29 = arith.constant 0 : index
    %53 = vector.load %arg2[%c8, %c0_28, %c0_29] : memref<9x128x128xbf16, #tpu.memory_space<vmem>>, vector<1x128x128xbf16>
    %54 = vector.shape_cast %53 : vector<1x128x128xbf16> to vector<128x128xbf16>
    %cst_30 = arith.constant dense<0.000000e+00> : vector<4x128xf32>
    %55 = tpu.matmul %52, %54, %cst_30 {dimension_numbers = #tpu.dot_dimension_numbers<[1], [0], [0], [1], [0, 0, 1, 1], [], []>} : vector<4x128xbf16>, vector<128x128xbf16>, vector<4x128xf32> -> vector<4x128xf32>
    %56 = arith.addf %50, %55 : vector<4x128xf32>
    %c0_31 = arith.constant 0 : index
    %c0_32 = arith.constant 0 : index
    %57 = vector.load %arg3[%c0_31, %c0_32] : memref<1x128xf32, #tpu.memory_space<vmem>>, vector<1x128xf32>
    %58 = vector.broadcast %57 : vector<1x128xf32> to vector<4x128xf32>
    %59 = arith.mulf %56, %58 : vector<4x128xf32>
    %c0_33 = arith.constant 0 : index
    %c0_34 = arith.constant 0 : index
    %60 = vector.load %arg4[%c0_33, %c0_34] : memref<1x128xf32, #tpu.memory_space<vmem>>, vector<1x128xf32>
    %61 = vector.broadcast %60 : vector<1x128xf32> to vector<4x128xf32>
    %62 = arith.addf %59, %61 : vector<4x128xf32>
    %cst_35 = arith.constant 0.000000e+00 : f32
    %63 = vector.broadcast %cst_35 : f32 to vector<4x128xf32>
    %64 = arith.maximumf %62, %63 : vector<4x128xf32>
    %65 = arith.truncf %64 : vector<4x128xf32> to vector<4x128xbf16>
    %c0_36 = arith.constant 0 : index
    %c0_37 = arith.constant 0 : index
    %66 = vector.load %arg5[%c0_36, %c0_37] : memref<128x128xbf16, #tpu.memory_space<vmem>>, vector<128x128xbf16>
    %cst_38 = arith.constant dense<0.000000e+00> : vector<4x128xf32>
    %67 = tpu.matmul %65, %66, %cst_38 {dimension_numbers = #tpu.dot_dimension_numbers<[1], [0], [0], [1], [0, 0, 1, 1], [], []>} : vector<4x128xbf16>, vector<128x128xbf16>, vector<4x128xf32> -> vector<4x128xf32>
    %c0_39 = arith.constant 0 : index
    %c0_40 = arith.constant 0 : index
    %68 = vector.load %arg6[%c0_39, %c0_40] : memref<1x128xf32, #tpu.memory_space<vmem>>, vector<1x128xf32>
    %69 = vector.broadcast %68 : vector<1x128xf32> to vector<4x128xf32>
    %70 = arith.addf %67, %69 : vector<4x128xf32>
    %c0_41 = arith.constant 0 : index
    %c0_42 = arith.constant 0 : index
    %71 = vector.load %arg7[%c0_41, %c0_42] : memref<16x4xf32, #tpu.memory_space<vmem>>, vector<16x4xf32>
    %cst_43 = arith.constant dense<0.000000e+00> : vector<16x128xf32>
    %72 = tpu.matmul %71, %70, %cst_43 {dimension_numbers = #tpu.dot_dimension_numbers<[1], [0], [0], [1], [0, 0, 1, 1], [], []>} : vector<16x4xf32>, vector<4x128xf32>, vector<16x128xf32> -> vector<16x128xf32>
    %cst_44 = arith.constant 0.000000e+00 : f32
    %73 = vector.broadcast %cst_44 : f32 to vector<4x128xf32>
    %74 = vector.extract_strided_slice %1 {offsets = [1, 0, 0], sizes = [1, 4, 128], strides = [1, 1, 1]} : vector<6x8x128xbf16> to vector<1x4x128xbf16>
    %75 = vector.shape_cast %74 : vector<1x4x128xbf16> to vector<4x128xbf16>
    %c0_45 = arith.constant 0 : index
    %c0_46 = arith.constant 0 : index
    %c0_47 = arith.constant 0 : index
    %76 = vector.load %arg2[%c0_45, %c0_46, %c0_47] : memref<9x128x128xbf16, #tpu.memory_space<vmem>>, vector<1x128x128xbf16>
    %77 = vector.shape_cast %76 : vector<1x128x128xbf16> to vector<128x128xbf16>
    %cst_48 = arith.constant dense<0.000000e+00> : vector<4x128xf32>
    %78 = tpu.matmul %75, %77, %cst_48 {dimension_numbers = #tpu.dot_dimension_numbers<[1], [0], [0], [1], [0, 0, 1, 1], [], []>} : vector<4x128xbf16>, vector<128x128xbf16>, vector<4x128xf32> -> vector<4x128xf32>
    %79 = arith.addf %73, %78 : vector<4x128xf32>
    %80 = vector.extract_strided_slice %1 {offsets = [1, 1, 0], sizes = [1, 4, 128], strides = [1, 1, 1]} : vector<6x8x128xbf16> to vector<1x4x128xbf16>
    %81 = vector.shape_cast %80 : vector<1x4x128xbf16> to vector<4x128xbf16>
    %c1_49 = arith.constant 1 : index
    %c0_50 = arith.constant 0 : index
    %c0_51 = arith.constant 0 : index
    %82 = vector.load %arg2[%c1_49, %c0_50, %c0_51] : memref<9x128x128xbf16, #tpu.memory_space<vmem>>, vector<1x128x128xbf16>
    %83 = vector.shape_cast %82 : vector<1x128x128xbf16> to vector<128x128xbf16>
    %cst_52 = arith.constant dense<0.000000e+00> : vector<4x128xf32>
    %84 = tpu.matmul %81, %83, %cst_52 {dimension_numbers = #tpu.dot_dimension_numbers<[1], [0], [0], [1], [0, 0, 1, 1], [], []>} : vector<4x128xbf16>, vector<128x128xbf16>, vector<4x128xf32> -> vector<4x128xf32>
    %85 = arith.addf %79, %84 : vector<4x128xf32>
    %86 = vector.extract_strided_slice %1 {offsets = [1, 2, 0], sizes = [1, 4, 128], strides = [1, 1, 1]} : vector<6x8x128xbf16> to vector<1x4x128xbf16>
    %87 = vector.shape_cast %86 : vector<1x4x128xbf16> to vector<4x128xbf16>
    %c2_53 = arith.constant 2 : index
    %c0_54 = arith.constant 0 : index
    %c0_55 = arith.constant 0 : index
    %88 = vector.load %arg2[%c2_53, %c0_54, %c0_55] : memref<9x128x128xbf16, #tpu.memory_space<vmem>>, vector<1x128x128xbf16>
    %89 = vector.shape_cast %88 : vector<1x128x128xbf16> to vector<128x128xbf16>
    %cst_56 = arith.constant dense<0.000000e+00> : vector<4x128xf32>
    %90 = tpu.matmul %87, %89, %cst_56 {dimension_numbers = #tpu.dot_dimension_numbers<[1], [0], [0], [1], [0, 0, 1, 1], [], []>} : vector<4x128xbf16>, vector<128x128xbf16>, vector<4x128xf32> -> vector<4x128xf32>
    %91 = arith.addf %85, %90 : vector<4x128xf32>
    %92 = vector.extract_strided_slice %1 {offsets = [2, 0, 0], sizes = [1, 4, 128], strides = [1, 1, 1]} : vector<6x8x128xbf16> to vector<1x4x128xbf16>
    %93 = vector.shape_cast %92 : vector<1x4x128xbf16> to vector<4x128xbf16>
    %c3_57 = arith.constant 3 : index
    %c0_58 = arith.constant 0 : index
    %c0_59 = arith.constant 0 : index
    %94 = vector.load %arg2[%c3_57, %c0_58, %c0_59] : memref<9x128x128xbf16, #tpu.memory_space<vmem>>, vector<1x128x128xbf16>
    %95 = vector.shape_cast %94 : vector<1x128x128xbf16> to vector<128x128xbf16>
    %cst_60 = arith.constant dense<0.000000e+00> : vector<4x128xf32>
    %96 = tpu.matmul %93, %95, %cst_60 {dimension_numbers = #tpu.dot_dimension_numbers<[1], [0], [0], [1], [0, 0, 1, 1], [], []>} : vector<4x128xbf16>, vector<128x128xbf16>, vector<4x128xf32> -> vector<4x128xf32>
    %97 = arith.addf %91, %96 : vector<4x128xf32>
    %98 = vector.extract_strided_slice %1 {offsets = [2, 1, 0], sizes = [1, 4, 128], strides = [1, 1, 1]} : vector<6x8x128xbf16> to vector<1x4x128xbf16>
    %99 = vector.shape_cast %98 : vector<1x4x128xbf16> to vector<4x128xbf16>
    %c4_61 = arith.constant 4 : index
    %c0_62 = arith.constant 0 : index
    %c0_63 = arith.constant 0 : index
    %100 = vector.load %arg2[%c4_61, %c0_62, %c0_63] : memref<9x128x128xbf16, #tpu.memory_space<vmem>>, vector<1x128x128xbf16>
    %101 = vector.shape_cast %100 : vector<1x128x128xbf16> to vector<128x128xbf16>
    %cst_64 = arith.constant dense<0.000000e+00> : vector<4x128xf32>
    %102 = tpu.matmul %99, %101, %cst_64 {dimension_numbers = #tpu.dot_dimension_numbers<[1], [0], [0], [1], [0, 0, 1, 1], [], []>} : vector<4x128xbf16>, vector<128x128xbf16>, vector<4x128xf32> -> vector<4x128xf32>
    %103 = arith.addf %97, %102 : vector<4x128xf32>
    %104 = vector.extract_strided_slice %1 {offsets = [2, 2, 0], sizes = [1, 4, 128], strides = [1, 1, 1]} : vector<6x8x128xbf16> to vector<1x4x128xbf16>
    %105 = vector.shape_cast %104 : vector<1x4x128xbf16> to vector<4x128xbf16>
    %c5_65 = arith.constant 5 : index
    %c0_66 = arith.constant 0 : index
    %c0_67 = arith.constant 0 : index
    %106 = vector.load %arg2[%c5_65, %c0_66, %c0_67] : memref<9x128x128xbf16, #tpu.memory_space<vmem>>, vector<1x128x128xbf16>
    %107 = vector.shape_cast %106 : vector<1x128x128xbf16> to vector<128x128xbf16>
    %cst_68 = arith.constant dense<0.000000e+00> : vector<4x128xf32>
    %108 = tpu.matmul %105, %107, %cst_68 {dimension_numbers = #tpu.dot_dimension_numbers<[1], [0], [0], [1], [0, 0, 1, 1], [], []>} : vector<4x128xbf16>, vector<128x128xbf16>, vector<4x128xf32> -> vector<4x128xf32>
    %109 = arith.addf %103, %108 : vector<4x128xf32>
    %110 = vector.extract_strided_slice %1 {offsets = [3, 0, 0], sizes = [1, 4, 128], strides = [1, 1, 1]} : vector<6x8x128xbf16> to vector<1x4x128xbf16>
    %111 = vector.shape_cast %110 : vector<1x4x128xbf16> to vector<4x128xbf16>
    %c6_69 = arith.constant 6 : index
    %c0_70 = arith.constant 0 : index
    %c0_71 = arith.constant 0 : index
    %112 = vector.load %arg2[%c6_69, %c0_70, %c0_71] : memref<9x128x128xbf16, #tpu.memory_space<vmem>>, vector<1x128x128xbf16>
    %113 = vector.shape_cast %112 : vector<1x128x128xbf16> to vector<128x128xbf16>
    %cst_72 = arith.constant dense<0.000000e+00> : vector<4x128xf32>
    %114 = tpu.matmul %111, %113, %cst_72 {dimension_numbers = #tpu.dot_dimension_numbers<[1], [0], [0], [1], [0, 0, 1, 1], [], []>} : vector<4x128xbf16>, vector<128x128xbf16>, vector<4x128xf32> -> vector<4x128xf32>
    %115 = arith.addf %109, %114 : vector<4x128xf32>
    %116 = vector.extract_strided_slice %1 {offsets = [3, 1, 0], sizes = [1, 4, 128], strides = [1, 1, 1]} : vector<6x8x128xbf16> to vector<1x4x128xbf16>
    %117 = vector.shape_cast %116 : vector<1x4x128xbf16> to vector<4x128xbf16>
    %c7_73 = arith.constant 7 : index
    %c0_74 = arith.constant 0 : index
    %c0_75 = arith.constant 0 : index
    %118 = vector.load %arg2[%c7_73, %c0_74, %c0_75] : memref<9x128x128xbf16, #tpu.memory_space<vmem>>, vector<1x128x128xbf16>
    %119 = vector.shape_cast %118 : vector<1x128x128xbf16> to vector<128x128xbf16>
    %cst_76 = arith.constant dense<0.000000e+00> : vector<4x128xf32>
    %120 = tpu.matmul %117, %119, %cst_76 {dimension_numbers = #tpu.dot_dimension_numbers<[1], [0], [0], [1], [0, 0, 1, 1], [], []>} : vector<4x128xbf16>, vector<128x128xbf16>, vector<4x128xf32> -> vector<4x128xf32>
    %121 = arith.addf %115, %120 : vector<4x128xf32>
    %122 = vector.extract_strided_slice %1 {offsets = [3, 2, 0], sizes = [1, 4, 128], strides = [1, 1, 1]} : vector<6x8x128xbf16> to vector<1x4x128xbf16>
    %123 = vector.shape_cast %122 : vector<1x4x128xbf16> to vector<4x128xbf16>
    %c8_77 = arith.constant 8 : index
    %c0_78 = arith.constant 0 : index
    %c0_79 = arith.constant 0 : index
    %124 = vector.load %arg2[%c8_77, %c0_78, %c0_79] : memref<9x128x128xbf16, #tpu.memory_space<vmem>>, vector<1x128x128xbf16>
    %125 = vector.shape_cast %124 : vector<1x128x128xbf16> to vector<128x128xbf16>
    %cst_80 = arith.constant dense<0.000000e+00> : vector<4x128xf32>
    %126 = tpu.matmul %123, %125, %cst_80 {dimension_numbers = #tpu.dot_dimension_numbers<[1], [0], [0], [1], [0, 0, 1, 1], [], []>} : vector<4x128xbf16>, vector<128x128xbf16>, vector<4x128xf32> -> vector<4x128xf32>
    %127 = arith.addf %121, %126 : vector<4x128xf32>
    %c0_81 = arith.constant 0 : index
    %c0_82 = arith.constant 0 : index
    %128 = vector.load %arg3[%c0_81, %c0_82] : memref<1x128xf32, #tpu.memory_space<vmem>>, vector<1x128xf32>
    %129 = vector.broadcast %128 : vector<1x128xf32> to vector<4x128xf32>
    %130 = arith.mulf %127, %129 : vector<4x128xf32>
    %c0_83 = arith.constant 0 : index
    %c0_84 = arith.constant 0 : index
    %131 = vector.load %arg4[%c0_83, %c0_84] : memref<1x128xf32, #tpu.memory_space<vmem>>, vector<1x128xf32>
    %132 = vector.broadcast %131 : vector<1x128xf32> to vector<4x128xf32>
    %133 = arith.addf %130, %132 : vector<4x128xf32>
    %cst_85 = arith.constant 0.000000e+00 : f32
    %134 = vector.broadcast %cst_85 : f32 to vector<4x128xf32>
    %135 = arith.maximumf %133, %134 : vector<4x128xf32>
    %136 = arith.truncf %135 : vector<4x128xf32> to vector<4x128xbf16>
    %c0_86 = arith.constant 0 : index
    %c0_87 = arith.constant 0 : index
    %137 = vector.load %arg5[%c0_86, %c0_87] : memref<128x128xbf16, #tpu.memory_space<vmem>>, vector<128x128xbf16>
    %cst_88 = arith.constant dense<0.000000e+00> : vector<4x128xf32>
    %138 = tpu.matmul %136, %137, %cst_88 {dimension_numbers = #tpu.dot_dimension_numbers<[1], [0], [0], [1], [0, 0, 1, 1], [], []>} : vector<4x128xbf16>, vector<128x128xbf16>, vector<4x128xf32> -> vector<4x128xf32>
    %c0_89 = arith.constant 0 : index
    %c0_90 = arith.constant 0 : index
    %139 = vector.load %arg6[%c0_89, %c0_90] : memref<1x128xf32, #tpu.memory_space<vmem>>, vector<1x128xf32>
    %140 = vector.broadcast %139 : vector<1x128xf32> to vector<4x128xf32>
    %141 = arith.addf %138, %140 : vector<4x128xf32>
    %c0_91 = arith.constant 0 : index
    %c0_92 = arith.constant 0 : index
    %142 = vector.load %arg7[%c0_91, %c0_92] : memref<16x4xf32, #tpu.memory_space<vmem>>, vector<16x4xf32>
    %cst_93 = arith.constant dense<0.000000e+00> : vector<16x128xf32>
    %143 = tpu.matmul %142, %141, %cst_93 {dimension_numbers = #tpu.dot_dimension_numbers<[1], [0], [0], [1], [0, 0, 1, 1], [], []>} : vector<16x4xf32>, vector<4x128xf32>, vector<16x128xf32> -> vector<16x128xf32>
    %cst_94 = arith.constant 0.000000e+00 : f32
    %144 = vector.broadcast %cst_94 : f32 to vector<4x128xf32>
    %145 = vector.extract_strided_slice %1 {offsets = [2, 0, 0], sizes = [1, 4, 128], strides = [1, 1, 1]} : vector<6x8x128xbf16> to vector<1x4x128xbf16>
    %146 = vector.shape_cast %145 : vector<1x4x128xbf16> to vector<4x128xbf16>
    %c0_95 = arith.constant 0 : index
    %c0_96 = arith.constant 0 : index
    %c0_97 = arith.constant 0 : index
    %147 = vector.load %arg2[%c0_95, %c0_96, %c0_97] : memref<9x128x128xbf16, #tpu.memory_space<vmem>>, vector<1x128x128xbf16>
    %148 = vector.shape_cast %147 : vector<1x128x128xbf16> to vector<128x128xbf16>
    %cst_98 = arith.constant dense<0.000000e+00> : vector<4x128xf32>
    %149 = tpu.matmul %146, %148, %cst_98 {dimension_numbers = #tpu.dot_dimension_numbers<[1], [0], [0], [1], [0, 0, 1, 1], [], []>} : vector<4x128xbf16>, vector<128x128xbf16>, vector<4x128xf32> -> vector<4x128xf32>
    %150 = arith.addf %144, %149 : vector<4x128xf32>
    %151 = vector.extract_strided_slice %1 {offsets = [2, 1, 0], sizes = [1, 4, 128], strides = [1, 1, 1]} : vector<6x8x128xbf16> to vector<1x4x128xbf16>
    %152 = vector.shape_cast %151 : vector<1x4x128xbf16> to vector<4x128xbf16>
    %c1_99 = arith.constant 1 : index
    %c0_100 = arith.constant 0 : index
    %c0_101 = arith.constant 0 : index
    %153 = vector.load %arg2[%c1_99, %c0_100, %c0_101] : memref<9x128x128xbf16, #tpu.memory_space<vmem>>, vector<1x128x128xbf16>
    %154 = vector.shape_cast %153 : vector<1x128x128xbf16> to vector<128x128xbf16>
    %cst_102 = arith.constant dense<0.000000e+00> : vector<4x128xf32>
    %155 = tpu.matmul %152, %154, %cst_102 {dimension_numbers = #tpu.dot_dimension_numbers<[1], [0], [0], [1], [0, 0, 1, 1], [], []>} : vector<4x128xbf16>, vector<128x128xbf16>, vector<4x128xf32> -> vector<4x128xf32>
    %156 = arith.addf %150, %155 : vector<4x128xf32>
    %157 = vector.extract_strided_slice %1 {offsets = [2, 2, 0], sizes = [1, 4, 128], strides = [1, 1, 1]} : vector<6x8x128xbf16> to vector<1x4x128xbf16>
    %158 = vector.shape_cast %157 : vector<1x4x128xbf16> to vector<4x128xbf16>
    %c2_103 = arith.constant 2 : index
    %c0_104 = arith.constant 0 : index
    %c0_105 = arith.constant 0 : index
    %159 = vector.load %arg2[%c2_103, %c0_104, %c0_105] : memref<9x128x128xbf16, #tpu.memory_space<vmem>>, vector<1x128x128xbf16>
    %160 = vector.shape_cast %159 : vector<1x128x128xbf16> to vector<128x128xbf16>
    %cst_106 = arith.constant dense<0.000000e+00> : vector<4x128xf32>
    %161 = tpu.matmul %158, %160, %cst_106 {dimension_numbers = #tpu.dot_dimension_numbers<[1], [0], [0], [1], [0, 0, 1, 1], [], []>} : vector<4x128xbf16>, vector<128x128xbf16>, vector<4x128xf32> -> vector<4x128xf32>
    %162 = arith.addf %156, %161 : vector<4x128xf32>
    %163 = vector.extract_strided_slice %1 {offsets = [3, 0, 0], sizes = [1, 4, 128], strides = [1, 1, 1]} : vector<6x8x128xbf16> to vector<1x4x128xbf16>
    %164 = vector.shape_cast %163 : vector<1x4x128xbf16> to vector<4x128xbf16>
    %c3_107 = arith.constant 3 : index
    %c0_108 = arith.constant 0 : index
    %c0_109 = arith.constant 0 : index
    %165 = vector.load %arg2[%c3_107, %c0_108, %c0_109] : memref<9x128x128xbf16, #tpu.memory_space<vmem>>, vector<1x128x128xbf16>
    %166 = vector.shape_cast %165 : vector<1x128x128xbf16> to vector<128x128xbf16>
    %cst_110 = arith.constant dense<0.000000e+00> : vector<4x128xf32>
    %167 = tpu.matmul %164, %166, %cst_110 {dimension_numbers = #tpu.dot_dimension_numbers<[1], [0], [0], [1], [0, 0, 1, 1], [], []>} : vector<4x128xbf16>, vector<128x128xbf16>, vector<4x128xf32> -> vector<4x128xf32>
    %168 = arith.addf %162, %167 : vector<4x128xf32>
    %169 = vector.extract_strided_slice %1 {offsets = [3, 1, 0], sizes = [1, 4, 128], strides = [1, 1, 1]} : vector<6x8x128xbf16> to vector<1x4x128xbf16>
    %170 = vector.shape_cast %169 : vector<1x4x128xbf16> to vector<4x128xbf16>
    %c4_111 = arith.constant 4 : index
    %c0_112 = arith.constant 0 : index
    %c0_113 = arith.constant 0 : index
    %171 = vector.load %arg2[%c4_111, %c0_112, %c0_113] : memref<9x128x128xbf16, #tpu.memory_space<vmem>>, vector<1x128x128xbf16>
    %172 = vector.shape_cast %171 : vector<1x128x128xbf16> to vector<128x128xbf16>
    %cst_114 = arith.constant dense<0.000000e+00> : vector<4x128xf32>
    %173 = tpu.matmul %170, %172, %cst_114 {dimension_numbers = #tpu.dot_dimension_numbers<[1], [0], [0], [1], [0, 0, 1, 1], [], []>} : vector<4x128xbf16>, vector<128x128xbf16>, vector<4x128xf32> -> vector<4x128xf32>
    %174 = arith.addf %168, %173 : vector<4x128xf32>
    %175 = vector.extract_strided_slice %1 {offsets = [3, 2, 0], sizes = [1, 4, 128], strides = [1, 1, 1]} : vector<6x8x128xbf16> to vector<1x4x128xbf16>
    %176 = vector.shape_cast %175 : vector<1x4x128xbf16> to vector<4x128xbf16>
    %c5_115 = arith.constant 5 : index
    %c0_116 = arith.constant 0 : index
    %c0_117 = arith.constant 0 : index
    %177 = vector.load %arg2[%c5_115, %c0_116, %c0_117] : memref<9x128x128xbf16, #tpu.memory_space<vmem>>, vector<1x128x128xbf16>
    %178 = vector.shape_cast %177 : vector<1x128x128xbf16> to vector<128x128xbf16>
    %cst_118 = arith.constant dense<0.000000e+00> : vector<4x128xf32>
    %179 = tpu.matmul %176, %178, %cst_118 {dimension_numbers = #tpu.dot_dimension_numbers<[1], [0], [0], [1], [0, 0, 1, 1], [], []>} : vector<4x128xbf16>, vector<128x128xbf16>, vector<4x128xf32> -> vector<4x128xf32>
    %180 = arith.addf %174, %179 : vector<4x128xf32>
    %181 = vector.extract_strided_slice %1 {offsets = [4, 0, 0], sizes = [1, 4, 128], strides = [1, 1, 1]} : vector<6x8x128xbf16> to vector<1x4x128xbf16>
    %182 = vector.shape_cast %181 : vector<1x4x128xbf16> to vector<4x128xbf16>
    %c6_119 = arith.constant 6 : index
    %c0_120 = arith.constant 0 : index
    %c0_121 = arith.constant 0 : index
    %183 = vector.load %arg2[%c6_119, %c0_120, %c0_121] : memref<9x128x128xbf16, #tpu.memory_space<vmem>>, vector<1x128x128xbf16>
    %184 = vector.shape_cast %183 : vector<1x128x128xbf16> to vector<128x128xbf16>
    %cst_122 = arith.constant dense<0.000000e+00> : vector<4x128xf32>
    %185 = tpu.matmul %182, %184, %cst_122 {dimension_numbers = #tpu.dot_dimension_numbers<[1], [0], [0], [1], [0, 0, 1, 1], [], []>} : vector<4x128xbf16>, vector<128x128xbf16>, vector<4x128xf32> -> vector<4x128xf32>
    %186 = arith.addf %180, %185 : vector<4x128xf32>
    %187 = vector.extract_strided_slice %1 {offsets = [4, 1, 0], sizes = [1, 4, 128], strides = [1, 1, 1]} : vector<6x8x128xbf16> to vector<1x4x128xbf16>
    %188 = vector.shape_cast %187 : vector<1x4x128xbf16> to vector<4x128xbf16>
    %c7_123 = arith.constant 7 : index
    %c0_124 = arith.constant 0 : index
    %c0_125 = arith.constant 0 : index
    %189 = vector.load %arg2[%c7_123, %c0_124, %c0_125] : memref<9x128x128xbf16, #tpu.memory_space<vmem>>, vector<1x128x128xbf16>
    %190 = vector.shape_cast %189 : vector<1x128x128xbf16> to vector<128x128xbf16>
    %cst_126 = arith.constant dense<0.000000e+00> : vector<4x128xf32>
    %191 = tpu.matmul %188, %190, %cst_126 {dimension_numbers = #tpu.dot_dimension_numbers<[1], [0], [0], [1], [0, 0, 1, 1], [], []>} : vector<4x128xbf16>, vector<128x128xbf16>, vector<4x128xf32> -> vector<4x128xf32>
    %192 = arith.addf %186, %191 : vector<4x128xf32>
    %193 = vector.extract_strided_slice %1 {offsets = [4, 2, 0], sizes = [1, 4, 128], strides = [1, 1, 1]} : vector<6x8x128xbf16> to vector<1x4x128xbf16>
    %194 = vector.shape_cast %193 : vector<1x4x128xbf16> to vector<4x128xbf16>
    %c8_127 = arith.constant 8 : index
    %c0_128 = arith.constant 0 : index
    %c0_129 = arith.constant 0 : index
    %195 = vector.load %arg2[%c8_127, %c0_128, %c0_129] : memref<9x128x128xbf16, #tpu.memory_space<vmem>>, vector<1x128x128xbf16>
    %196 = vector.shape_cast %195 : vector<1x128x128xbf16> to vector<128x128xbf16>
    %cst_130 = arith.constant dense<0.000000e+00> : vector<4x128xf32>
    %197 = tpu.matmul %194, %196, %cst_130 {dimension_numbers = #tpu.dot_dimension_numbers<[1], [0], [0], [1], [0, 0, 1, 1], [], []>} : vector<4x128xbf16>, vector<128x128xbf16>, vector<4x128xf32> -> vector<4x128xf32>
    %198 = arith.addf %192, %197 : vector<4x128xf32>
    %c0_131 = arith.constant 0 : index
    %c0_132 = arith.constant 0 : index
    %199 = vector.load %arg3[%c0_131, %c0_132] : memref<1x128xf32, #tpu.memory_space<vmem>>, vector<1x128xf32>
    %200 = vector.broadcast %199 : vector<1x128xf32> to vector<4x128xf32>
    %201 = arith.mulf %198, %200 : vector<4x128xf32>
    %c0_133 = arith.constant 0 : index
    %c0_134 = arith.constant 0 : index
    %202 = vector.load %arg4[%c0_133, %c0_134] : memref<1x128xf32, #tpu.memory_space<vmem>>, vector<1x128xf32>
    %203 = vector.broadcast %202 : vector<1x128xf32> to vector<4x128xf32>
    %204 = arith.addf %201, %203 : vector<4x128xf32>
    %cst_135 = arith.constant 0.000000e+00 : f32
    %205 = vector.broadcast %cst_135 : f32 to vector<4x128xf32>
    %206 = arith.maximumf %204, %205 : vector<4x128xf32>
    %207 = arith.truncf %206 : vector<4x128xf32> to vector<4x128xbf16>
    %c0_136 = arith.constant 0 : index
    %c0_137 = arith.constant 0 : index
    %208 = vector.load %arg5[%c0_136, %c0_137] : memref<128x128xbf16, #tpu.memory_space<vmem>>, vector<128x128xbf16>
    %cst_138 = arith.constant dense<0.000000e+00> : vector<4x128xf32>
    %209 = tpu.matmul %207, %208, %cst_138 {dimension_numbers = #tpu.dot_dimension_numbers<[1], [0], [0], [1], [0, 0, 1, 1], [], []>} : vector<4x128xbf16>, vector<128x128xbf16>, vector<4x128xf32> -> vector<4x128xf32>
    %c0_139 = arith.constant 0 : index
    %c0_140 = arith.constant 0 : index
    %210 = vector.load %arg6[%c0_139, %c0_140] : memref<1x128xf32, #tpu.memory_space<vmem>>, vector<1x128xf32>
    %211 = vector.broadcast %210 : vector<1x128xf32> to vector<4x128xf32>
    %212 = arith.addf %209, %211 : vector<4x128xf32>
    %c0_141 = arith.constant 0 : index
    %c0_142 = arith.constant 0 : index
    %213 = vector.load %arg7[%c0_141, %c0_142] : memref<16x4xf32, #tpu.memory_space<vmem>>, vector<16x4xf32>
    %cst_143 = arith.constant dense<0.000000e+00> : vector<16x128xf32>
    %214 = tpu.matmul %213, %212, %cst_143 {dimension_numbers = #tpu.dot_dimension_numbers<[1], [0], [0], [1], [0, 0, 1, 1], [], []>} : vector<16x4xf32>, vector<4x128xf32>, vector<16x128xf32> -> vector<16x128xf32>
    %cst_144 = arith.constant 0.000000e+00 : f32
    %215 = vector.broadcast %cst_144 : f32 to vector<4x128xf32>
    %216 = vector.extract_strided_slice %1 {offsets = [3, 0, 0], sizes = [1, 4, 128], strides = [1, 1, 1]} : vector<6x8x128xbf16> to vector<1x4x128xbf16>
    %217 = vector.shape_cast %216 : vector<1x4x128xbf16> to vector<4x128xbf16>
    %c0_145 = arith.constant 0 : index
    %c0_146 = arith.constant 0 : index
    %c0_147 = arith.constant 0 : index
    %218 = vector.load %arg2[%c0_145, %c0_146, %c0_147] : memref<9x128x128xbf16, #tpu.memory_space<vmem>>, vector<1x128x128xbf16>
    %219 = vector.shape_cast %218 : vector<1x128x128xbf16> to vector<128x128xbf16>
    %cst_148 = arith.constant dense<0.000000e+00> : vector<4x128xf32>
    %220 = tpu.matmul %217, %219, %cst_148 {dimension_numbers = #tpu.dot_dimension_numbers<[1], [0], [0], [1], [0, 0, 1, 1], [], []>} : vector<4x128xbf16>, vector<128x128xbf16>, vector<4x128xf32> -> vector<4x128xf32>
    %221 = arith.addf %215, %220 : vector<4x128xf32>
    %222 = vector.extract_strided_slice %1 {offsets = [3, 1, 0], sizes = [1, 4, 128], strides = [1, 1, 1]} : vector<6x8x128xbf16> to vector<1x4x128xbf16>
    %223 = vector.shape_cast %222 : vector<1x4x128xbf16> to vector<4x128xbf16>
    %c1_149 = arith.constant 1 : index
    %c0_150 = arith.constant 0 : index
    %c0_151 = arith.constant 0 : index
    %224 = vector.load %arg2[%c1_149, %c0_150, %c0_151] : memref<9x128x128xbf16, #tpu.memory_space<vmem>>, vector<1x128x128xbf16>
    %225 = vector.shape_cast %224 : vector<1x128x128xbf16> to vector<128x128xbf16>
    %cst_152 = arith.constant dense<0.000000e+00> : vector<4x128xf32>
    %226 = tpu.matmul %223, %225, %cst_152 {dimension_numbers = #tpu.dot_dimension_numbers<[1], [0], [0], [1], [0, 0, 1, 1], [], []>} : vector<4x128xbf16>, vector<128x128xbf16>, vector<4x128xf32> -> vector<4x128xf32>
    %227 = arith.addf %221, %226 : vector<4x128xf32>
    %228 = vector.extract_strided_slice %1 {offsets = [3, 2, 0], sizes = [1, 4, 128], strides = [1, 1, 1]} : vector<6x8x128xbf16> to vector<1x4x128xbf16>
    %229 = vector.shape_cast %228 : vector<1x4x128xbf16> to vector<4x128xbf16>
    %c2_153 = arith.constant 2 : index
    %c0_154 = arith.constant 0 : index
    %c0_155 = arith.constant 0 : index
    %230 = vector.load %arg2[%c2_153, %c0_154, %c0_155] : memref<9x128x128xbf16, #tpu.memory_space<vmem>>, vector<1x128x128xbf16>
    %231 = vector.shape_cast %230 : vector<1x128x128xbf16> to vector<128x128xbf16>
    %cst_156 = arith.constant dense<0.000000e+00> : vector<4x128xf32>
    %232 = tpu.matmul %229, %231, %cst_156 {dimension_numbers = #tpu.dot_dimension_numbers<[1], [0], [0], [1], [0, 0, 1, 1], [], []>} : vector<4x128xbf16>, vector<128x128xbf16>, vector<4x128xf32> -> vector<4x128xf32>
    %233 = arith.addf %227, %232 : vector<4x128xf32>
    %234 = vector.extract_strided_slice %1 {offsets = [4, 0, 0], sizes = [1, 4, 128], strides = [1, 1, 1]} : vector<6x8x128xbf16> to vector<1x4x128xbf16>
    %235 = vector.shape_cast %234 : vector<1x4x128xbf16> to vector<4x128xbf16>
    %c3_157 = arith.constant 3 : index
    %c0_158 = arith.constant 0 : index
    %c0_159 = arith.constant 0 : index
    %236 = vector.load %arg2[%c3_157, %c0_158, %c0_159] : memref<9x128x128xbf16, #tpu.memory_space<vmem>>, vector<1x128x128xbf16>
    %237 = vector.shape_cast %236 : vector<1x128x128xbf16> to vector<128x128xbf16>
    %cst_160 = arith.constant dense<0.000000e+00> : vector<4x128xf32>
    %238 = tpu.matmul %235, %237, %cst_160 {dimension_numbers = #tpu.dot_dimension_numbers<[1], [0], [0], [1], [0, 0, 1, 1], [], []>} : vector<4x128xbf16>, vector<128x128xbf16>, vector<4x128xf32> -> vector<4x128xf32>
    %239 = arith.addf %233, %238 : vector<4x128xf32>
    %240 = vector.extract_strided_slice %1 {offsets = [4, 1, 0], sizes = [1, 4, 128], strides = [1, 1, 1]} : vector<6x8x128xbf16> to vector<1x4x128xbf16>
    %241 = vector.shape_cast %240 : vector<1x4x128xbf16> to vector<4x128xbf16>
    %c4_161 = arith.constant 4 : index
    %c0_162 = arith.constant 0 : index
    %c0_163 = arith.constant 0 : index
    %242 = vector.load %arg2[%c4_161, %c0_162, %c0_163] : memref<9x128x128xbf16, #tpu.memory_space<vmem>>, vector<1x128x128xbf16>
    %243 = vector.shape_cast %242 : vector<1x128x128xbf16> to vector<128x128xbf16>
    %cst_164 = arith.constant dense<0.000000e+00> : vector<4x128xf32>
    %244 = tpu.matmul %241, %243, %cst_164 {dimension_numbers = #tpu.dot_dimension_numbers<[1], [0], [0], [1], [0, 0, 1, 1], [], []>} : vector<4x128xbf16>, vector<128x128xbf16>, vector<4x128xf32> -> vector<4x128xf32>
    %245 = arith.addf %239, %244 : vector<4x128xf32>
    %246 = vector.extract_strided_slice %1 {offsets = [4, 2, 0], sizes = [1, 4, 128], strides = [1, 1, 1]} : vector<6x8x128xbf16> to vector<1x4x128xbf16>
    %247 = vector.shape_cast %246 : vector<1x4x128xbf16> to vector<4x128xbf16>
    %c5_165 = arith.constant 5 : index
    %c0_166 = arith.constant 0 : index
    %c0_167 = arith.constant 0 : index
    %248 = vector.load %arg2[%c5_165, %c0_166, %c0_167] : memref<9x128x128xbf16, #tpu.memory_space<vmem>>, vector<1x128x128xbf16>
    %249 = vector.shape_cast %248 : vector<1x128x128xbf16> to vector<128x128xbf16>
    %cst_168 = arith.constant dense<0.000000e+00> : vector<4x128xf32>
    %250 = tpu.matmul %247, %249, %cst_168 {dimension_numbers = #tpu.dot_dimension_numbers<[1], [0], [0], [1], [0, 0, 1, 1], [], []>} : vector<4x128xbf16>, vector<128x128xbf16>, vector<4x128xf32> -> vector<4x128xf32>
    %251 = arith.addf %245, %250 : vector<4x128xf32>
    %252 = vector.extract_strided_slice %1 {offsets = [5, 0, 0], sizes = [1, 4, 128], strides = [1, 1, 1]} : vector<6x8x128xbf16> to vector<1x4x128xbf16>
    %253 = vector.shape_cast %252 : vector<1x4x128xbf16> to vector<4x128xbf16>
    %c6_169 = arith.constant 6 : index
    %c0_170 = arith.constant 0 : index
    %c0_171 = arith.constant 0 : index
    %254 = vector.load %arg2[%c6_169, %c0_170, %c0_171] : memref<9x128x128xbf16, #tpu.memory_space<vmem>>, vector<1x128x128xbf16>
    %255 = vector.shape_cast %254 : vector<1x128x128xbf16> to vector<128x128xbf16>
    %cst_172 = arith.constant dense<0.000000e+00> : vector<4x128xf32>
    %256 = tpu.matmul %253, %255, %cst_172 {dimension_numbers = #tpu.dot_dimension_numbers<[1], [0], [0], [1], [0, 0, 1, 1], [], []>} : vector<4x128xbf16>, vector<128x128xbf16>, vector<4x128xf32> -> vector<4x128xf32>
    %257 = arith.addf %251, %256 : vector<4x128xf32>
    %258 = vector.extract_strided_slice %1 {offsets = [5, 1, 0], sizes = [1, 4, 128], strides = [1, 1, 1]} : vector<6x8x128xbf16> to vector<1x4x128xbf16>
    %259 = vector.shape_cast %258 : vector<1x4x128xbf16> to vector<4x128xbf16>
    %c7_173 = arith.constant 7 : index
    %c0_174 = arith.constant 0 : index
    %c0_175 = arith.constant 0 : index
    %260 = vector.load %arg2[%c7_173, %c0_174, %c0_175] : memref<9x128x128xbf16, #tpu.memory_space<vmem>>, vector<1x128x128xbf16>
    %261 = vector.shape_cast %260 : vector<1x128x128xbf16> to vector<128x128xbf16>
    %cst_176 = arith.constant dense<0.000000e+00> : vector<4x128xf32>
    %262 = tpu.matmul %259, %261, %cst_176 {dimension_numbers = #tpu.dot_dimension_numbers<[1], [0], [0], [1], [0, 0, 1, 1], [], []>} : vector<4x128xbf16>, vector<128x128xbf16>, vector<4x128xf32> -> vector<4x128xf32>
    %263 = arith.addf %257, %262 : vector<4x128xf32>
    %264 = vector.extract_strided_slice %1 {offsets = [5, 2, 0], sizes = [1, 4, 128], strides = [1, 1, 1]} : vector<6x8x128xbf16> to vector<1x4x128xbf16>
    %265 = vector.shape_cast %264 : vector<1x4x128xbf16> to vector<4x128xbf16>
    %c8_177 = arith.constant 8 : index
    %c0_178 = arith.constant 0 : index
    %c0_179 = arith.constant 0 : index
    %266 = vector.load %arg2[%c8_177, %c0_178, %c0_179] : memref<9x128x128xbf16, #tpu.memory_space<vmem>>, vector<1x128x128xbf16>
    %267 = vector.shape_cast %266 : vector<1x128x128xbf16> to vector<128x128xbf16>
    %cst_180 = arith.constant dense<0.000000e+00> : vector<4x128xf32>
    %268 = tpu.matmul %265, %267, %cst_180 {dimension_numbers = #tpu.dot_dimension_numbers<[1], [0], [0], [1], [0, 0, 1, 1], [], []>} : vector<4x128xbf16>, vector<128x128xbf16>, vector<4x128xf32> -> vector<4x128xf32>
    %269 = arith.addf %263, %268 : vector<4x128xf32>
    %c0_181 = arith.constant 0 : index
    %c0_182 = arith.constant 0 : index
    %270 = vector.load %arg3[%c0_181, %c0_182] : memref<1x128xf32, #tpu.memory_space<vmem>>, vector<1x128xf32>
    %271 = vector.broadcast %270 : vector<1x128xf32> to vector<4x128xf32>
    %272 = arith.mulf %269, %271 : vector<4x128xf32>
    %c0_183 = arith.constant 0 : index
    %c0_184 = arith.constant 0 : index
    %273 = vector.load %arg4[%c0_183, %c0_184] : memref<1x128xf32, #tpu.memory_space<vmem>>, vector<1x128xf32>
    %274 = vector.broadcast %273 : vector<1x128xf32> to vector<4x128xf32>
    %275 = arith.addf %272, %274 : vector<4x128xf32>
    %cst_185 = arith.constant 0.000000e+00 : f32
    %276 = vector.broadcast %cst_185 : f32 to vector<4x128xf32>
    %277 = arith.maximumf %275, %276 : vector<4x128xf32>
    %278 = arith.truncf %277 : vector<4x128xf32> to vector<4x128xbf16>
    %c0_186 = arith.constant 0 : index
    %c0_187 = arith.constant 0 : index
    %279 = vector.load %arg5[%c0_186, %c0_187] : memref<128x128xbf16, #tpu.memory_space<vmem>>, vector<128x128xbf16>
    %cst_188 = arith.constant dense<0.000000e+00> : vector<4x128xf32>
    %280 = tpu.matmul %278, %279, %cst_188 {dimension_numbers = #tpu.dot_dimension_numbers<[1], [0], [0], [1], [0, 0, 1, 1], [], []>} : vector<4x128xbf16>, vector<128x128xbf16>, vector<4x128xf32> -> vector<4x128xf32>
    %c0_189 = arith.constant 0 : index
    %c0_190 = arith.constant 0 : index
    %281 = vector.load %arg6[%c0_189, %c0_190] : memref<1x128xf32, #tpu.memory_space<vmem>>, vector<1x128xf32>
    %282 = vector.broadcast %281 : vector<1x128xf32> to vector<4x128xf32>
    %283 = arith.addf %280, %282 : vector<4x128xf32>
    %c0_191 = arith.constant 0 : index
    %c0_192 = arith.constant 0 : index
    %284 = vector.load %arg7[%c0_191, %c0_192] : memref<16x4xf32, #tpu.memory_space<vmem>>, vector<16x4xf32>
    %cst_193 = arith.constant dense<0.000000e+00> : vector<16x128xf32>
    %285 = tpu.matmul %284, %283, %cst_193 {dimension_numbers = #tpu.dot_dimension_numbers<[1], [0], [0], [1], [0, 0, 1, 1], [], []>} : vector<16x4xf32>, vector<4x128xf32>, vector<16x128xf32> -> vector<16x128xf32>
    %cst_194 = arith.constant 1.000000e+00 : f32
    %286 = vector.broadcast %cst_194 : f32 to vector<16x128xf32>
    %287 = arith.mulf %286, %72 : vector<16x128xf32>
    %cst_195 = arith.constant 0.000000e+00 : f32
    %288 = vector.broadcast %cst_195 : f32 to vector<16x128xf32>
    %289 = arith.mulf %288, %143 : vector<16x128xf32>
    %290 = arith.addf %287, %289 : vector<16x128xf32>
    %cst_196 = arith.constant 1.000000e+00 : f32
    %291 = vector.broadcast %cst_196 : f32 to vector<16x128xf32>
    %292 = arith.mulf %291, %72 : vector<16x128xf32>
    %cst_197 = arith.constant 0.000000e+00 : f32
    %293 = vector.broadcast %cst_197 : f32 to vector<16x128xf32>
    %294 = arith.mulf %293, %143 : vector<16x128xf32>
    %295 = arith.addf %292, %294 : vector<16x128xf32>
    %cst_198 = arith.constant 8.750000e-01 : f32
    %296 = vector.broadcast %cst_198 : f32 to vector<16x128xf32>
    %297 = arith.mulf %296, %72 : vector<16x128xf32>
    %cst_199 = arith.constant 1.250000e-01 : f32
    %298 = vector.broadcast %cst_199 : f32 to vector<16x128xf32>
    %299 = arith.mulf %298, %143 : vector<16x128xf32>
    %300 = arith.addf %297, %299 : vector<16x128xf32>
    %cst_200 = arith.constant 6.250000e-01 : f32
    %301 = vector.broadcast %cst_200 : f32 to vector<16x128xf32>
    %302 = arith.mulf %301, %72 : vector<16x128xf32>
    %cst_201 = arith.constant 3.750000e-01 : f32
    %303 = vector.broadcast %cst_201 : f32 to vector<16x128xf32>
    %304 = arith.mulf %303, %143 : vector<16x128xf32>
    %305 = arith.addf %302, %304 : vector<16x128xf32>
    %cst_202 = arith.constant 3.750000e-01 : f32
    %306 = vector.broadcast %cst_202 : f32 to vector<16x128xf32>
    %307 = arith.mulf %306, %72 : vector<16x128xf32>
    %cst_203 = arith.constant 6.250000e-01 : f32
    %308 = vector.broadcast %cst_203 : f32 to vector<16x128xf32>
    %309 = arith.mulf %308, %143 : vector<16x128xf32>
    %310 = arith.addf %307, %309 : vector<16x128xf32>
    %cst_204 = arith.constant 1.250000e-01 : f32
    %311 = vector.broadcast %cst_204 : f32 to vector<16x128xf32>
    %312 = arith.mulf %311, %72 : vector<16x128xf32>
    %cst_205 = arith.constant 8.750000e-01 : f32
    %313 = vector.broadcast %cst_205 : f32 to vector<16x128xf32>
    %314 = arith.mulf %313, %143 : vector<16x128xf32>
    %315 = arith.addf %312, %314 : vector<16x128xf32>
    %cst_206 = arith.constant 8.750000e-01 : f32
    %316 = vector.broadcast %cst_206 : f32 to vector<16x128xf32>
    %317 = arith.mulf %316, %143 : vector<16x128xf32>
    %cst_207 = arith.constant 1.250000e-01 : f32
    %318 = vector.broadcast %cst_207 : f32 to vector<16x128xf32>
    %319 = arith.mulf %318, %214 : vector<16x128xf32>
    %320 = arith.addf %317, %319 : vector<16x128xf32>
    %cst_208 = arith.constant 6.250000e-01 : f32
    %321 = vector.broadcast %cst_208 : f32 to vector<16x128xf32>
    %322 = arith.mulf %321, %143 : vector<16x128xf32>
    %cst_209 = arith.constant 3.750000e-01 : f32
    %323 = vector.broadcast %cst_209 : f32 to vector<16x128xf32>
    %324 = arith.mulf %323, %214 : vector<16x128xf32>
    %325 = arith.addf %322, %324 : vector<16x128xf32>
    %cst_210 = arith.constant 3.750000e-01 : f32
    %326 = vector.broadcast %cst_210 : f32 to vector<16x128xf32>
    %327 = arith.mulf %326, %143 : vector<16x128xf32>
    %cst_211 = arith.constant 6.250000e-01 : f32
    %328 = vector.broadcast %cst_211 : f32 to vector<16x128xf32>
    %329 = arith.mulf %328, %214 : vector<16x128xf32>
    %330 = arith.addf %327, %329 : vector<16x128xf32>
    %cst_212 = arith.constant 1.250000e-01 : f32
    %331 = vector.broadcast %cst_212 : f32 to vector<16x128xf32>
    %332 = arith.mulf %331, %143 : vector<16x128xf32>
    %cst_213 = arith.constant 8.750000e-01 : f32
    %333 = vector.broadcast %cst_213 : f32 to vector<16x128xf32>
    %334 = arith.mulf %333, %214 : vector<16x128xf32>
    %335 = arith.addf %332, %334 : vector<16x128xf32>
    %cst_214 = arith.constant 8.750000e-01 : f32
    %336 = vector.broadcast %cst_214 : f32 to vector<16x128xf32>
    %337 = arith.mulf %336, %214 : vector<16x128xf32>
    %cst_215 = arith.constant 1.250000e-01 : f32
    %338 = vector.broadcast %cst_215 : f32 to vector<16x128xf32>
    %339 = arith.mulf %338, %285 : vector<16x128xf32>
    %340 = arith.addf %337, %339 : vector<16x128xf32>
    %cst_216 = arith.constant 6.250000e-01 : f32
    %341 = vector.broadcast %cst_216 : f32 to vector<16x128xf32>
    %342 = arith.mulf %341, %214 : vector<16x128xf32>
    %cst_217 = arith.constant 3.750000e-01 : f32
    %343 = vector.broadcast %cst_217 : f32 to vector<16x128xf32>
    %344 = arith.mulf %343, %285 : vector<16x128xf32>
    %345 = arith.addf %342, %344 : vector<16x128xf32>
    %cst_218 = arith.constant 3.750000e-01 : f32
    %346 = vector.broadcast %cst_218 : f32 to vector<16x128xf32>
    %347 = arith.mulf %346, %214 : vector<16x128xf32>
    %cst_219 = arith.constant 6.250000e-01 : f32
    %348 = vector.broadcast %cst_219 : f32 to vector<16x128xf32>
    %349 = arith.mulf %348, %285 : vector<16x128xf32>
    %350 = arith.addf %347, %349 : vector<16x128xf32>
    %cst_220 = arith.constant 1.250000e-01 : f32
    %351 = vector.broadcast %cst_220 : f32 to vector<16x128xf32>
    %352 = arith.mulf %351, %214 : vector<16x128xf32>
    %cst_221 = arith.constant 8.750000e-01 : f32
    %353 = vector.broadcast %cst_221 : f32 to vector<16x128xf32>
    %354 = arith.mulf %353, %285 : vector<16x128xf32>
    %355 = arith.addf %352, %354 : vector<16x128xf32>
    %cst_222 = arith.constant 8.750000e-01 : f32
    %356 = vector.broadcast %cst_222 : f32 to vector<16x128xf32>
    %357 = arith.mulf %356, %285 : vector<16x128xf32>
    %cst_223 = arith.constant 1.250000e-01 : f32
    %358 = vector.broadcast %cst_223 : f32 to vector<16x128xf32>
    %359 = arith.mulf %358, %285 : vector<16x128xf32>
    %360 = arith.addf %357, %359 : vector<16x128xf32>
    %cst_224 = arith.constant 6.250000e-01 : f32
    %361 = vector.broadcast %cst_224 : f32 to vector<16x128xf32>
    %362 = arith.mulf %361, %285 : vector<16x128xf32>
    %cst_225 = arith.constant 3.750000e-01 : f32
    %363 = vector.broadcast %cst_225 : f32 to vector<16x128xf32>
    %364 = arith.mulf %363, %285 : vector<16x128xf32>
    %365 = arith.addf %362, %364 : vector<16x128xf32>
    %366 = vector.shape_cast %290 : vector<16x128xf32> to vector<1x16x128xf32>
    %367 = vector.shape_cast %295 : vector<16x128xf32> to vector<1x16x128xf32>
    %368 = vector.shape_cast %300 : vector<16x128xf32> to vector<1x16x128xf32>
    %369 = vector.shape_cast %305 : vector<16x128xf32> to vector<1x16x128xf32>
    %370 = vector.shape_cast %310 : vector<16x128xf32> to vector<1x16x128xf32>
    %371 = vector.shape_cast %315 : vector<16x128xf32> to vector<1x16x128xf32>
    %372 = vector.shape_cast %320 : vector<16x128xf32> to vector<1x16x128xf32>
    %373 = vector.shape_cast %325 : vector<16x128xf32> to vector<1x16x128xf32>
    %374 = vector.shape_cast %330 : vector<16x128xf32> to vector<1x16x128xf32>
    %375 = vector.shape_cast %335 : vector<16x128xf32> to vector<1x16x128xf32>
    %376 = vector.shape_cast %340 : vector<16x128xf32> to vector<1x16x128xf32>
    %377 = vector.shape_cast %345 : vector<16x128xf32> to vector<1x16x128xf32>
    %378 = vector.shape_cast %350 : vector<16x128xf32> to vector<1x16x128xf32>
    %379 = vector.shape_cast %355 : vector<16x128xf32> to vector<1x16x128xf32>
    %380 = vector.shape_cast %360 : vector<16x128xf32> to vector<1x16x128xf32>
    %381 = vector.shape_cast %365 : vector<16x128xf32> to vector<1x16x128xf32>
    %382 = tpu.concatenate %366, %367, %368, %369, %370, %371, %372, %373, %374, %375, %376, %377, %378, %379, %380, %381 in 0 : vector<1x16x128xf32>, vector<1x16x128xf32>, vector<1x16x128xf32>, vector<1x16x128xf32>, vector<1x16x128xf32>, vector<1x16x128xf32>, vector<1x16x128xf32>, vector<1x16x128xf32>, vector<1x16x128xf32>, vector<1x16x128xf32>, vector<1x16x128xf32>, vector<1x16x128xf32>, vector<1x16x128xf32>, vector<1x16x128xf32>, vector<1x16x128xf32>, vector<1x16x128xf32> -> vector<16x16x128xf32>
    %c0_226 = arith.constant 0 : index
    %c0_227 = arith.constant 0 : index
    %c0_228 = arith.constant 0 : index
    %c0_229 = arith.constant 0 : index
    %383 = vector.load %arg8[%c0_226, %c0_227, %c0_228, %c0_229] : memref<1x16x16x128xf32, #tpu.memory_space<vmem>>, vector<1x16x16x128xf32>
    %384 = vector.shape_cast %383 : vector<1x16x16x128xf32> to vector<16x16x128xf32>
    %385 = vector.shape_cast %382 : vector<16x16x128xf32> to vector<1x16x16x128xf32>
    tpu.vector_store %arg8[%c0_226, %c0_227, %c0_228, %c0_229], %385 {strides = array<i32>} : memref<1x16x16x128xf32, #tpu.memory_space<vmem>>, vector<1x16x16x128xf32>,
    return
  }
  func.func @transform_0(%arg0: i32) -> (i32, i32, i32, i32) {
    %c0_i32 = arith.constant 0 : i32
    %c0_i32_0 = arith.constant 0 : i32
    %c0_i32_1 = arith.constant 0 : i32
    %c0_i32_2 = arith.constant 0 : i32
    return %arg0, %c0_i32, %c0_i32_0, %c0_i32_1 : i32, i32, i32, i32
  }
  func.func @transform_1(%arg0: i32) -> (i32, i32, i32) {
    %c0_i32 = arith.constant 0 : i32
    %c0_i32_0 = arith.constant 0 : i32
    %c0_i32_1 = arith.constant 0 : i32
    %c0_i32_2 = arith.constant 0 : i32
    return %c0_i32, %c0_i32_0, %c0_i32_1 : i32, i32, i32
  }
  func.func @transform_2(%arg0: i32) -> (i32, i32) {
    %c0_i32 = arith.constant 0 : i32
    %c0_i32_0 = arith.constant 0 : i32
    %c0_i32_1 = arith.constant 0 : i32
    return %c0_i32, %c0_i32_0 : i32, i32
  }
  func.func @transform_3(%arg0: i32) -> (i32, i32) {
    %c0_i32 = arith.constant 0 : i32
    %c0_i32_0 = arith.constant 0 : i32
    %c0_i32_1 = arith.constant 0 : i32
    return %c0_i32, %c0_i32_0 : i32, i32
  }
  func.func @transform_4(%arg0: i32) -> (i32, i32) {
    %c0_i32 = arith.constant 0 : i32
    %c0_i32_0 = arith.constant 0 : i32
    %c0_i32_1 = arith.constant 0 : i32
    return %c0_i32, %c0_i32_0 : i32, i32
  }
  func.func @transform_5(%arg0: i32) -> (i32, i32) {
    %c0_i32 = arith.constant 0 : i32
    %c0_i32_0 = arith.constant 0 : i32
    %c0_i32_1 = arith.constant 0 : i32
    return %c0_i32, %c0_i32_0 : i32, i32
  }
  func.func @transform_6(%arg0: i32) -> (i32, i32) {
    %c0_i32 = arith.constant 0 : i32
    %c0_i32_0 = arith.constant 0 : i32
    %c0_i32_1 = arith.constant 0 : i32
    return %c0_i32, %c0_i32_0 : i32, i32
  }
  func.func @transform_7(%arg0: i32) -> (i32, i32, i32, i32) {
    %c0_i32 = arith.constant 0 : i32
    %c0_i32_0 = arith.constant 0 : i32
    %c0_i32_1 = arith.constant 0 : i32
    %c0_i32_2 = arith.constant 0 : i32
    return %arg0, %c0_i32, %c0_i32_0, %c0_i32_1 : i32, i32, i32, i32
  }
}

</mosaic_0001>

<bundles_post_ra>
// kernel: forward.3
= control target key start
LH: loop header
LB: loop body
LE: loop exit
PB: predicated region body
PF: predicated region fallthrough
CT: control target
= control target key end

     0   :  { %s687_s1 = inlined_call_operand.vmem [shape: bf16[128,128], index: 1, kind: input, shape index: {}]   ;;  %s688_s0 = inlined_call_operand.vmem [shape: bf16[128,128], index: 0, kind: input, shape index: {}]   ;;  %s689_s2 = inlined_call_operand.vmem [shape: f32[1,128], index: 2, kind: input, shape index: {}]   ;;  %s690_s3 = inlined_call_operand.vmem [shape: f32[1,128], index: 3, kind: input, shape index: {}]   ;;  %s691_s4 = inlined_call_operand.vmem [shape: bf16[128,128], index: 4, kind: output, shape index: {}]  }
   0x1   :  { %v550_v0 = vld [vmem:[%s687_s1 + $0x38] sm:$0xff]   ;;  %v551_v1 = vld [vmem:[%s687_s1 + $0x30] sm:$0xff]   ;;  %v552_v2 = vld [vmem:[%s687_s1 + $0x28] sm:$0xff]  }
   0x2   :  { %502 = vmatprep.subr.bf16.mxu0 %v550_v0  ;;  %534 = vmatprep.subr.bf16.mxu1 %v550_v0  ;;  %v553_v3 = vld [vmem:[%s687_s1 + $0x20] sm:$0xff]   ;;  %v554_v6 = vld [vmem:[%s687_s1 + $0x18] sm:$0xff]   ;;  %v555_v7 = vld [vmem:[%s687_s1 + $0x10] sm:$0xff]  }
   0x3   :  { %503 = vmatpush3.bf16.msra.mxu0 %v550_v0  ;;  %542 = vmatpush3.bf16.msra.mxu1 %v550_v0  ;;  %v558_v4 = vld [vmem:[%s688_s0] sm:$0xff]   ;;  %v556_v8 = vld [vmem:[%s687_s1 + $0x8] sm:$0xff]   ;;  %v562_v12 = vld [vmem:[%s688_s0 + $0x10] sm:$0xff]  }
   0x4   :  { %504 = vmatprep.subr.bf16.mxu0 %v551_v1  ;;  %535 = vmatprep.subr.bf16.mxu1 %v551_v1  ;;  %v559_v5 = vld [vmem:[%s688_s0 + $0x20] sm:$0xff]   ;;  %v560_v10 = vld [vmem:[%s688_s0 + $0x8] sm:$0xff]   ;;  %v563_v13 = vld [vmem:[%s688_s0 + $0x30] sm:$0xff]  }
   0x5   :  { %518 = vmatprep.mubr.bf16.mxu0 %v558_v4  ;;  %526 = vmatprep.mubr.bf16.mxu1 %v559_v5  ;;  %v557_v9 = vld [vmem:[%s687_s1] sm:$0xff]   ;;  %v561_v11 = vld [vmem:[%s688_s0 + $0x28] sm:$0xff]   ;;  %v564_v14 = vld [vmem:[%s688_s0 + $0x18] sm:$0xff]  }
   0x6   :  { %v565_v15 = vld [vmem:[%s688_s0 + $0x38] sm:$0xff]   ;;  %v642_v16 = vld [vmem:[%s689_s2] ss:$0 sm:$0xff] }
   0x7   :  { %505 = vmatpush3.bf16.msra.mxu0 %v551_v1  ;;  %543 = vmatpush3.bf16.msra.mxu1 %v551_v1  ;;  %v406_v21 = vld [vmem:[%s690_s3] ss:$0 sm:$0xff] }
   0x8   :  { %506 = vmatprep.subr.bf16.mxu0 %v552_v2  ;;  %536 = vmatprep.subr.bf16.mxu1 %v552_v2 }
   0xb   :  { %507 = vmatpush3.bf16.msra.mxu0 %v552_v2  ;;  %544 = vmatpush3.bf16.msra.mxu1 %v552_v2 }
   0xc   :  { %508 = vmatprep.subr.bf16.mxu0 %v553_v3  ;;  %537 = vmatprep.subr.bf16.mxu1 %v553_v3 }
   0xf   :  { %509 = vmatpush3.bf16.msra.mxu0 %v553_v3  ;;  %545 = vmatpush3.bf16.msra.mxu1 %v553_v3 }
  0x10   :  { %510 = vmatprep.subr.bf16.mxu0 %v554_v6  ;;  %538 = vmatprep.subr.bf16.mxu1 %v554_v6 }
  0x13   :  { %511 = vmatpush3.bf16.msra.mxu0 %v554_v6  ;;  %546 = vmatpush3.bf16.msra.mxu1 %v554_v6 }
  0x14   :  { %512 = vmatprep.subr.bf16.mxu0 %v555_v7  ;;  %539 = vmatprep.subr.bf16.mxu1 %v555_v7 }
  0x17   :  { %513 = vmatpush3.bf16.msra.mxu0 %v555_v7  ;;  %547 = vmatpush3.bf16.msra.mxu1 %v555_v7 }
  0x18   :  { %514 = vmatprep.subr.bf16.mxu0 %v556_v8  ;;  %540 = vmatprep.subr.bf16.mxu1 %v556_v8 }
  0x1b   :  { %515 = vmatpush3.bf16.msra.mxu0 %v556_v8  ;;  %548 = vmatpush3.bf16.msra.mxu1 %v556_v8 }
  0x1c   :  { %516 = vmatprep.subr.bf16.mxu0 %v557_v9  ;;  %541 = vmatprep.subr.bf16.mxu1 %v557_v9 }
  0x1f   :  { %517 = vmatpush3.bf16.msra.mxu0 %v557_v9  ;;  %549 = vmatpush3.bf16.msra.mxu1 %v557_v9 }
  0x22   :  { %519 = vmatmul.mubr.bf16.vlgmr.msra.gmra.mxu0 %v560_v10  ;;  %527 = vmatmul.mubr.bf16.vlgmr.msra.gmra.mxu1 %v561_v11 }
  0x23   :  { %522 = vmatprep.mubr.bf16.mxu0 %v562_v12  ;;  %530 = vmatprep.mubr.bf16.mxu1 %v563_v13 }
  0x2a   :  { %523 = vmatmul.mubr.bf16.gmra.mxu0 %v564_v14  ;;  %531 = vmatmul.mubr.bf16.gmra.mxu1 %v565_v15 }
  0xe2   :  { %v520_v17 = vpop.f32.mrf.mxu0  ;;  %v528_v18 = vpop.f32.mrf.mxu1 }
  0xe3   :  { %v252_v19 = vmul.f32 %v520_v17, %v642_v16  ;;  %v260_v20 = vmul.f32 %v528_v18, %v642_v16 }
  0xe4   :  { %v180_v22 = vpop.f32.mrf.mxu0  ;;  %v212_v23 = vpop.f32.mrf.mxu1 }
  0xe5   :  { %v250_v24 = vmul.f32 %v642_v16, %v180_v22  ;;  %v258_v25 = vmul.f32 %v642_v16, %v212_v23  ;;  %v275_v28 = vadd.f32 %v406_v21, %v252_v19  ;;  %v283_v29 = vadd.f32 %v406_v21, %v260_v20 }
  0xe6   :  { %v521_v26 = vpop.f32.mrf.mxu0  ;;  %v529_v27 = vpop.f32.mrf.mxu1 }
  0xe7   :  { %v253_v30 = vmul.f32 %v521_v26, %v642_v16  ;;  %v261_v31 = vmul.f32 %v529_v27, %v642_v16  ;;  %v273_v34 = vadd.f32 %v406_v21, %v250_v24  ;;  %v281_v35 = vadd.f32 %v406_v21, %v258_v25 }
  0xe8   :  { %v183_v32 = vpop.f32.mrf.mxu0  ;;  %v215_v33 = vpop.f32.mrf.mxu1  ;;  %v291_v42 = vmax.f32 %v275_v28, 0.0  ;;  %v299_v43 = vmax.f32 %v283_v29, 0.0 }
  0xe9   :  { %v251_v36 = vmul.f32 %v642_v16, %v183_v32  ;;  %v259_v37 = vmul.f32 %v642_v16, %v215_v33  ;;  %v276_v38 = vadd.f32 %v406_v21, %v253_v30  ;;  %v284_v39 = vadd.f32 %v406_v21, %v261_v31 }
  0xea   :  { %v524_v40 = vpop.f32.mrf.mxu0  ;;  %v532_v41 = vpop.f32.mrf.mxu1  ;;  %v289_v52 = vmax.f32 %v273_v34, 0.0  ;;  %v297_v53 = vmax.f32 %v281_v35, 0.0 }
  0xeb   :  { %v274_v44 = vadd.f32 %v406_v21, %v251_v36  ;;  %v282_v45 = vadd.f32 %v406_v21, %v259_v37  ;;  %v292_v46 = vmax.f32 %v276_v38, 0.0  ;;  %v300_v47 = vmax.f32 %v284_v39, 0.0 }
  0xec   :  { %v256_v48 = vmul.f32 %v524_v40, %v642_v16  ;;  %v264_v49 = vmul.f32 %v532_v41, %v642_v16  ;;  %v196_v50 = vpop.f32.mrf.mxu0  ;;  %v228_v51 = vpop.f32.mrf.mxu1 }
  0xed   :  { %v290_v54 = vmax.f32 %v274_v44, 0.0  ;;  %v298_v55 = vmax.f32 %v282_v45, 0.0  ;;  %v447_v56 = vpack.c.bf16 %v292_v46, %v291_v42  ;;  %v467_v57 = vpack.c.bf16 %v300_v47, %v299_v43 }
  0xee   :  { %v254_v58 = vmul.f32 %v642_v16, %v196_v50  ;;  %v262_v59 = vmul.f32 %v642_v16, %v228_v51  ;;  %v525_v60 = vpop.f32.mrf.mxu0  ;;  %v533_v61 = vpop.f32.mrf.mxu1  ;;  %v279_v0 = vadd.f32 %v406_v21, %v256_v48  ;;  %v287_v1 = vadd.f32 %v406_v21, %v264_v49 }
  0xef   :  { %v442_v62 = vpack.c.bf16 %v290_v54, %v289_v52  ;;  %v462_v63 = vpack.c.bf16 %v298_v55, %v297_v53  ;;  %479 = vst [vmem:[%s691_s4 + $0x8] sm:$0xff] %v447_v56   ;;  %483 = vst [vmem:[%s691_s4 + $0x28] sm:$0xff] %v467_v57   ;;  %v257_v2 = vmul.f32 %v525_v60, %v642_v16 }
  0xf0   :  { %v265_v3 = vmul.f32 %v533_v61, %v642_v16  ;;  %v199_v4 = vpop.f32.mrf.mxu0  ;;  %v231_v5 = vpop.f32.mrf.mxu1  ;;  %v277_v6 = vadd.f32 %v406_v21, %v254_v58  ;;  %v285_v7 = vadd.f32 %v406_v21, %v262_v59  ;;  %v295_v14 = vmax.f32 %v279_v0, 0.0 }
  0xf1   :  { %443 = vst [vmem:[%s691_s4] sm:$0xff] %v442_v62   ;;  %482 = vst [vmem:[%s691_s4 + $0x20] sm:$0xff] %v462_v63   ;;  %v255_v8 = vmul.f32 %v642_v16, %v199_v4  ;;  %v263_v9 = vmul.f32 %v642_v16, %v231_v5  ;;  %v280_v10 = vadd.f32 %v406_v21, %v257_v2  ;;  %v303_v15 = vmax.f32 %v287_v1, 0.0 }
  0xf2   :  { %v288_v11 = vadd.f32 %v406_v21, %v265_v3  ;;  %v293_v19 = vmax.f32 %v277_v6, 0.0  ;;  %v301_v20 = vmax.f32 %v285_v7, 0.0 }
  0xf3   :  { %v278_v12 = vadd.f32 %v406_v21, %v255_v8  ;;  %v286_v13 = vadd.f32 %v406_v21, %v263_v9  ;;  %v296_v17 = vmax.f32 %v280_v10, 0.0 }
  0xf4   :  { %v304_v18 = vmax.f32 %v288_v11, 0.0 }
  0xf5   :  { %v294_v22 = vmax.f32 %v278_v12, 0.0  ;;  %v302_v23 = vmax.f32 %v286_v13, 0.0  ;;  %v457_v24 = vpack.c.bf16 %v296_v17, %v295_v14 }
  0xf6   :  { %v477_v25 = vpack.c.bf16 %v304_v18, %v303_v15 }
  0xf7   :  { %v452_v26 = vpack.c.bf16 %v294_v22, %v293_v19  ;;  %v472_v27 = vpack.c.bf16 %v302_v23, %v301_v20  ;;  %481 = vst [vmem:[%s691_s4 + $0x18] sm:$0xff] %v457_v24  }
  0xf8   :  { %485 = vst [vmem:[%s691_s4 + $0x38] sm:$0xff] %v477_v25  }
  0xf9   :  { %480 = vst [vmem:[%s691_s4 + $0x10] sm:$0xff] %v452_v26   ;;  %484 = vst [vmem:[%s691_s4 + $0x30] sm:$0xff] %v472_v27  }

// kernel: forward.4
= control target key start
LH: loop header
LB: loop body
LE: loop exit
PB: predicated region body
PF: predicated region fallthrough
CT: control target
= control target key end

     0   :  { %s473_s1 = inlined_call_operand.vmem [shape: bf16[256,128], index: 1, kind: input, shape index: {}]   ;;  %s474_s0 = inlined_call_operand.vmem [shape: bf16[32,256], index: 0, kind: input, shape index: {}]   ;;  %s475_s2 = inlined_call_operand.vmem [shape: f32[1,128], index: 2, kind: input, shape index: {}]   ;;  %s476_s3 = inlined_call_operand.vmem [shape: f32[1,128], index: 3, kind: input, shape index: {}]   ;;  %s477_s4 = inlined_call_operand.vmem [shape: bf16[32,128], index: 4, kind: output, shape index: {}]  }
   0x1   :  { %v354_v0 = vld [vmem:[%s473_s1 + $0x78] sm:$0xff]   ;;  %v356_v2 = vld [vmem:[%s473_s1 + $0x70] sm:$0xff]   ;;  %v358_v4 = vld [vmem:[%s473_s1 + $0x68] sm:$0xff]  }
   0x2   :  { %v355_v1 = vld [vmem:[%s473_s1 + $0x38] sm:$0xff]   ;;  %310 = vmatprep.subr.bf16.mxu0 %v354_v0  ;;  %338 = vmatprep.subr.bf16.mxu1 %v354_v0  ;;  %v357_v3 = vld [vmem:[%s473_s1 + $0x30] sm:$0xff]   ;;  %v359_v5 = vld [vmem:[%s473_s1 + $0x28] sm:$0xff]  }
   0x3   :  { %311 = vmatpush3.bf16.msra.mxu0 %v355_v1  ;;  %346 = vmatpush3.bf16.msra.mxu1 %v355_v1  ;;  %v360_v6 = vld [vmem:[%s473_s1 + $0x60] sm:$0xff]   ;;  %v362_v8 = vld [vmem:[%s473_s1 + $0x58] sm:$0xff]   ;;  %v364_v10 = vld [vmem:[%s473_s1 + $0x50] sm:$0xff]  }
   0x4   :  { %312 = vmatprep.subr.bf16.mxu0 %v356_v2  ;;  %339 = vmatprep.subr.bf16.mxu1 %v356_v2  ;;  %v361_v7 = vld [vmem:[%s473_s1 + $0x20] sm:$0xff]   ;;  %v363_v9 = vld [vmem:[%s473_s1 + $0x18] sm:$0xff]   ;;  %v365_v13 = vld [vmem:[%s473_s1 + $0x10] sm:$0xff]  }
   0x5   :  { %v372_v11 = vld [vmem:[%s474_s0 + $0x4] ss:$8 sps:$4 sm:$0xff]   ;;  %v375_v12 = vld [vmem:[%s474_s0 + $0x14] ss:$8 sps:$4 sm:$0xff]   ;;  %v370_v18 = vld [vmem:[%s474_s0] ss:$8 sps:$4 sm:$0xff]  }
   0x6   :  { %v366_v14 = vld [vmem:[%s473_s1 + $0x48] sm:$0xff]   ;;  %202 = vmatprep.mubr.bf16.mxu0 %v372_v11  ;;  %210 = vmatprep.mubr.bf16.mxu1 %v375_v12  ;;  %v368_v16 = vld [vmem:[%s473_s1 + $0x40] sm:$0xff]   ;;  %v373_v19 = vld [vmem:[%s474_s0 + $0x10] ss:$8 sps:$4 sm:$0xff]  }
   0x7   :  { %313 = vmatpush3.bf16.msra.mxu0 %v357_v3  ;;  %347 = vmatpush3.bf16.msra.mxu1 %v357_v3  ;;  %v367_v15 = vld [vmem:[%s473_s1 + $0x8] sm:$0xff]   ;;  %v369_v17 = vld [vmem:[%s473_s1] sm:$0xff]  }
   0x8   :  { %314 = vmatprep.subr.bf16.mxu0 %v358_v4  ;;  %340 = vmatprep.subr.bf16.mxu1 %v358_v4  ;;  %v289_v23 = vld [vmem:[%s475_s2] ss:$0 sm:$0xff] }
   0x9   :  { %v290_v31 = vld [vmem:[%s476_s3] ss:$0 sm:$0xff] }
   0xb   :  { %315 = vmatpush3.bf16.msra.mxu0 %v359_v5  ;;  %348 = vmatpush3.bf16.msra.mxu1 %v359_v5 }
   0xc   :  { %316 = vmatprep.subr.bf16.mxu0 %v360_v6  ;;  %341 = vmatprep.subr.bf16.mxu1 %v360_v6 }
   0xf   :  { %317 = vmatpush3.bf16.msra.mxu0 %v361_v7  ;;  %349 = vmatpush3.bf16.msra.mxu1 %v361_v7 }
  0x10   :  { %318 = vmatprep.subr.bf16.mxu0 %v362_v8  ;;  %342 = vmatprep.subr.bf16.mxu1 %v362_v8 }
  0x13   :  { %319 = vmatpush3.bf16.msra.mxu0 %v363_v9  ;;  %350 = vmatpush3.bf16.msra.mxu1 %v363_v9 }
  0x14   :  { %320 = vmatprep.subr.bf16.mxu0 %v364_v10  ;;  %343 = vmatprep.subr.bf16.mxu1 %v364_v10 }
  0x17   :  { %321 = vmatpush3.bf16.msra.mxu0 %v365_v13  ;;  %351 = vmatpush3.bf16.msra.mxu1 %v365_v13 }
  0x18   :  { %322 = vmatprep.subr.bf16.mxu0 %v366_v14  ;;  %344 = vmatprep.subr.bf16.mxu1 %v366_v14 }
  0x1b   :  { %323 = vmatpush3.bf16.msra.mxu0 %v367_v15  ;;  %352 = vmatpush3.bf16.msra.mxu1 %v367_v15 }
  0x1c   :  { %324 = vmatprep.subr.bf16.mxu0 %v368_v16  ;;  %345 = vmatprep.subr.bf16.mxu1 %v368_v16 }
  0x1f   :  { %325 = vmatpush3.bf16.msra.mxu0 %v369_v17  ;;  %353 = vmatpush3.bf16.msra.mxu1 %v369_v17 }
  0x22   :  { %203 = vmatmul.mubr.bf16.vlgmr.msra.gmra.mxu0 %v370_v18  ;;  %211 = vmatmul.mubr.bf16.vlgmr.msra.gmra.mxu1 %v373_v19 }
  0xe2   :  { %v326_v20 = vpop.f32.mrf.mxu0  ;;  %v332_v21 = vpop.f32.mrf.mxu1 }
  0xe4   :  { %v327_v22 = vpop.f32.mrf.mxu0  ;;  %v333_v24 = vpop.f32.mrf.mxu1 }
  0xe5   :  { %v328_v25 = vadd.f32 %v327_v22, %v326_v20  ;;  %v334_v26 = vadd.f32 %v333_v24, %v332_v21 }
  0xe6   :  { %v329_v27 = vpop.f32.mrf.mxu0  ;;  %v335_v28 = vpop.f32.mrf.mxu1 }
  0xe7   :  { %v226_v29 = vmul.f32 %v328_v25, %v289_v23  ;;  %v228_v30 = vmul.f32 %v334_v26, %v289_v23 }
  0xe8   :  { %v330_v32 = vpop.f32.mrf.mxu0  ;;  %v336_v33 = vpop.f32.mrf.mxu1 }
  0xe9   :  { %v331_v34 = vadd.f32 %v330_v32, %v329_v27  ;;  %v337_v35 = vadd.f32 %v336_v33, %v335_v28  ;;  %v237_v36 = vadd.f32 %v290_v31, %v226_v29  ;;  %v239_v37 = vadd.f32 %v290_v31, %v228_v30 }
  0xeb   :  { %v227_v38 = vmul.f32 %v331_v34, %v289_v23  ;;  %v229_v39 = vmul.f32 %v337_v35, %v289_v23  ;;  %v241_v42 = vmax.f32 %v237_v36, 0.0  ;;  %v243_v43 = vmax.f32 %v239_v37, 0.0 }
  0xed   :  { %v238_v40 = vadd.f32 %v290_v31, %v227_v38  ;;  %v240_v41 = vadd.f32 %v290_v31, %v229_v39 }
  0xef   :  { %v242_v44 = vmax.f32 %v238_v40, 0.0  ;;  %v244_v45 = vmax.f32 %v240_v41, 0.0 }
  0xf1   :  { %v302_v46 = vpack.c.bf16 %v242_v44, %v241_v42  ;;  %v307_v47 = vpack.c.bf16 %v244_v45, %v243_v43 }
  0xf3   :  { %303 = vst [vmem:[%s477_s4] sm:$0xff] %v302_v46   ;;  %309 = vst [vmem:[%s477_s4 + $0x8] sm:$0xff] %v307_v47  }

// kernel: forward.5
= control target key start
LH: loop header
LB: loop body
LE: loop exit
PB: predicated region body
PF: predicated region fallthrough
CT: control target
= control target key end

     0   :  { %s4822_s24 = smov 0   ;;  %s6613_s0 = inlined_call_operand.vmem [shape: bf16[2,6,8,128], index: 0, kind: input, shape index: {}]   ;;  %s6614_s1 = inlined_call_operand.vmem [shape: bf16[9,128,128], index: 1, kind: input, shape index: {}]   ;;  %s6615_s2 = inlined_call_operand.vmem [shape: f32[1,128], index: 2, kind: input, shape index: {}]   ;;  %s6616_s3 = inlined_call_operand.vmem [shape: f32[1,128], index: 3, kind: input, shape index: {}]   ;;  %s6617_s4 = inlined_call_operand.vmem [shape: bf16[128,128], index: 4, kind: input, shape index: {}]   ;;  %s6618_s5 = inlined_call_operand.vmem [shape: f32[1,128], index: 5, kind: input, shape index: {}]   ;;  %s6619_s6 = inlined_call_operand.vmem [shape: f32[16,4], index: 6, kind: input, shape index: {}]   ;;  %s6620_s7 = inlined_call_operand.vmem [shape: f32[2,16,16,128], index: 7, kind: output, shape index: {}]  }
   0x1 LB: > { %s3150_s25 = sadd.s32 4294967295, %s4778_s24   ;;  %p3154_p0 = scmp.ge.s32.totalorder %s4778_s24, 1  ;;  %s4778_s24 = sphi %s4822_s24, %s17_s24  }
   0x2   : > { %p237_p1 = scmp.lt.s32.totalorder %s4778_s24, 3 }
   0x4   : > { %p238_p2 = pnand %p3154_p0, %p237_p1 }
   0x6   : > { %241 = sbr.rel (%p238_p2) target bundleno = 2365 (0x93d), region = 48 }
   0xb   : > { %v4833_v0 = vld [vmem:[%s6614_s1 + $0x78] sm:$0xff]   ;;  %v6662_v1 = vmov 0.0   ;;  %v4844_v3 = vld [vmem:[%s6614_s1 + $0x70] sm:$0xff]   ;;  %vm4781_vm0 = vmmov 0   ;;  %p269_p3 = scmp.lt.s32.totalorder %s3150_s25, 1  ;;  %v4861_v5 = vld [vmem:[%s6614_s1 + $0x68] sm:$0xff]  }
   0xc   : > { %3762 = vmatprep.subr.bf16.mxu0 %v6662_v1  ;;  %3782 = vmatprep.subr.bf16.mxu1 %v6662_v1  ;;  %v4594_v2 = vld [vmem:[%s6614_s1 + $0x38] sm:$0xff]   ;;  %v4596_v4 = vld [vmem:[%s6614_s1 + $0x30] sm:$0xff]   ;;  %v4598_v6 = vld [vmem:[%s6614_s1 + $0x28] sm:$0xff]   ;;  %vm1407_vm1 = vcmask 31744   ;;  %vm1414_vm2 = vcmask 1043456  }
   0xd   : > { %3763 = vmatpush3.bf16.msra.mxu0 %v4833_v0  ;;  %3778 = vmatprep.mubr.msk.bf16.mxu0 %vm4781_vm0, %v6662_v1  ;;  %s6824_s25 = smov (!%p269_p3, %s3150_s25), 1  ;;  %v4873_v7 = vld [vmem:[%s6614_s1 + $0x60] sm:$0xff]   ;;  %v4889_v9 = vld [vmem:[%s6614_s1 + $0x58] sm:$0xff]   ;;  %v4903_v13 = vld [vmem:[%s6614_s1 + $0x50] sm:$0xff]  }
   0xe   : > { %3783 = vmatpush3.bf16.msra.mxu1 %v4594_v2  ;;  %3764 = vmatprep.subr.bf16.mxu0 %v6662_v1  ;;  %s4582_s15 = smul.u32 24, %s6824_s25  ;;  %v4600_v8 = vld [vmem:[%s6614_s1 + $0x20] sm:$0xff]   ;;  %v4602_v10 = vld [vmem:[%s6614_s1 + $0x18] sm:$0xff]   ;;  %v4604_v14 = vld [vmem:[%s6614_s1 + $0x10] sm:$0xff]   ;;  %s3389_s12 = sshll.u32 %s6824_s25, 8 }
   0xf   : > { %3784 = vmatprep.subr.bf16.mxu1 %v6662_v1  ;;  %3798 = vmatprep.mubr.msk.bf16.mxu1 %vm4781_vm0, %v6662_v1  ;;  %v4915_v16 = vld [vmem:[%s6614_s1 + $0x48] sm:$0xff]   ;;  %v4927_v20 = vld [vmem:[%s6614_s1 + $0x40] sm:$0xff]   ;;  %v4940_v23 = vld [vmem:[%s6614_s1 + $0xb8] sm:$0xff]   ;;  %s6209_s25 = scalar_lea.vmem %s6620_s7, %s3389_s12 }
  0x10   : > { %s4883_s22 = scalar_lea.vmem %s6613_s0, %s4582_s15  ;;  %v4606_v17 = vld [vmem:[%s6614_s1 + $0x8] sm:$0xff]   ;;  %v4933_v21 = vld [vmem:[%s6614_s1] sm:$0xff]   ;;  %v4947_v24 = vld [vmem:[%s6614_s1 + $0xf8] sm:$0xff]  }
  0x11   : > { %3765 = vmatpush3.bf16.msra.mxu0 %v4844_v3  ;;  %v280_v11 = vld [vmem:[%s4883_s22] sm:$0xf]  ;;  %6693 = vst [vmem:[#allocation2_spill] sm:$0xff] %v4933_v21  ;;  %6694 = vst [vmem:[#allocation3_spill] sm:$0xff] %v4947_v24  ;;  %v4954_v25 = vld [vmem:[%s6614_s1 + $0xb0] sm:$0xff]  }
  0x12   : > { %3785 = vmatpush3.bf16.msra.mxu1 %v4596_v4  ;;  %3766 = vmatprep.subr.bf16.mxu0 %v6662_v1  ;;  %v4897_v12 = vcombine.low %v280_v11, %v280_v11  ;;  %v4961_v26 = vld [vmem:[%s6614_s1 + $0xf0] sm:$0xff]   ;;  %v4972_v27 = vld [vmem:[%s6614_s1 + $0xa8] sm:$0xff]   ;;  %v4986_v29 = vld [vmem:[%s6614_s1 + $0xa0] sm:$0xff]  }
  0x13   : > { %3786 = vmatprep.subr.bf16.mxu1 %v6662_v1  ;;  %6695 = vst [vmem:[#allocation4_spill] sm:$0xff] %v4961_v26  ;;  %v4979_v28 = vld [vmem:[%s6614_s1 + $0xe8] sm:$0xff]   ;;  %v4993_v30 = vld [vmem:[%s6614_s1 + $0xe0] sm:$0xff]   ;;  %v5000_v31 = vld [vmem:[%s6614_s1 + $0x98] sm:$0xff]  }
  0x14   : > { %v325_v15 = vshll.u32 %v4897_v12, 16  ;;  %v323_v18 = vshrl.u32 %v4897_v12, 16  ;;  %6696 = vst [vmem:[#allocation5_spill] sm:$0xff] %v4979_v28  ;;  %6697 = vst [vmem:[#allocation6_spill] sm:$0xff] %v4993_v30  ;;  %v5007_v32 = vld [vmem:[%s6614_s1 + $0xd8] sm:$0xff]   ;;  %v5014_v33 = vld [vmem:[%s6614_s1 + $0x90] sm:$0xff]  }
  0x15   : > { %3767 = vmatpush3.bf16.msra.mxu0 %v4861_v5  ;;  %6698 = vst [vmem:[#allocation7_spill] sm:$0xff] %v5007_v32  ;;  %v5021_v34 = vld [vmem:[%s6614_s1 + $0xd0] sm:$0xff]   ;;  %v5028_v35 = vld [vmem:[%s6614_s1 + $0x88] sm:$0xff]   ;;  %v5042_v37 = vld [vmem:[%s6614_s1 + $0x80] sm:$0xff]   ;;  %v523_v39 = vrot.slane %v4897_v12, 1 }
  0x16   : > { %3787 = vmatpush3.bf16.msra.mxu1 %v4598_v6  ;;  %3768 = vmatprep.subr.bf16.mxu0 %v6662_v1  ;;  %v327_v19 = vrot.slane %v325_v15, 1  ;;  %6699 = vst [vmem:[#allocation8_spill] sm:$0xff] %v5021_v34  ;;  %v5035_v36 = vld [vmem:[%s6614_s1 + $0xc8] sm:$0xff]   ;;  %v5049_v38 = vld [vmem:[%s6614_s1 + $0xc0] sm:$0xff]   ;;  %v5056_v40 = vld [vmem:[%s6614_s1 + $0x138] sm:$0xff]  }
  0x17   : > { %3788 = vmatprep.subr.bf16.mxu1 %v6662_v1  ;;  %6700 = vst [vmem:[#allocation9_spill] sm:$0xff] %v5035_v36  ;;  %6701 = vst [vmem:[#allocation10_spill] sm:$0xff] %v5049_v38  ;;  %v5060_v41 = vld [vmem:[%s4883_s22 + $0x4] sm:$0xf]  ;;  %v5067_v42 = vld [vmem:[%s6614_s1 + $0x178] sm:$0xff]  }
  0x18   : > { %v328_v22 = vor.u32 %v327_v19, %v323_v18  ;;  %6702 = vst [vmem:[#allocation11_spill] sm:$0xff] %v5060_v41  ;;  %6703 = vst [vmem:[#allocation12_spill] sm:$0xff] %v5067_v42  ;;  %v5075_v43 = vld [vmem:[%s6614_s1 + $0x130] sm:$0xff]   ;;  %v5093_v45 = vld [vmem:[%s6614_s1 + $0x128] sm:$0xff]   ;;  %v5133_v51 = vcombine.low %v5060_v41, %v5060_v41 }
  0x19   : > { %3769 = vmatpush3.bf16.msra.mxu0 %v4873_v7  ;;  %v5082_v44 = vld [vmem:[%s6614_s1 + $0x170] sm:$0xff]   ;;  %v5100_v46 = vld [vmem:[%s6614_s1 + $0x168] sm:$0xff]   ;;  %v5106_v47 = vld [vmem:[%s6614_s1 + $0x120] sm:$0xff]  }
  0x1a   : > { %3789 = vmatpush3.bf16.msra.mxu1 %v4600_v8  ;;  %3770 = vmatprep.subr.bf16.mxu0 %v6662_v1  ;;  %6704 = vst [vmem:[#allocation13_spill] sm:$0xff] %v5082_v44  ;;  %6705 = vst [vmem:[#allocation14_spill] sm:$0xff] %v5100_v46  ;;  %v5111_v48 = vld [vmem:[%s6614_s1 + $0x160] sm:$0xff]   ;;  %v5121_v49 = vld [vmem:[%s6614_s1 + $0x118] sm:$0xff]   ;;  %v743_v54 = vshll.u32 %v5133_v51, 16  ;;  %v741_v57 = vshrl.u32 %v5133_v51, 16 }
  0x1b   : > { %3790 = vmatprep.subr.bf16.mxu1 %v6662_v1  ;;  %6706 = vst [vmem:[#allocation15_spill] sm:$0xff] %v5111_v48  ;;  %v5128_v50 = vld [vmem:[%s6614_s1 + $0x158] sm:$0xff]   ;;  %v5139_v52 = vld [vmem:[%s6614_s1 + $0x110] sm:$0xff]   ;;  %v5154_v55 = vld [vmem:[%s6614_s1 + $0x108] sm:$0xff]   ;;  %v6621_v63 = vrot.slane %v5133_v51, 1 }
  0x1c   : > { %6707 = vst [vmem:[#allocation16_spill] sm:$0xff] %v5128_v50  ;;  %v5146_v53 = vld [vmem:[%s6614_s1 + $0x150] sm:$0xff]   ;;  %v5161_v56 = vld [vmem:[%s6614_s1 + $0x148] sm:$0xff]   ;;  %v745_v58 = vrot.slane %v743_v54, 1  ;;  %v5169_v59 = vld [vmem:[%s6614_s1 + $0x100] sm:$0xff]  }
  0x1d   : > { %3771 = vmatpush3.bf16.msra.mxu0 %v4889_v9  ;;  %6708 = vst [vmem:[#allocation17_spill] sm:$0xff] %v5146_v53  ;;  %6709 = vst [vmem:[#allocation18_spill] sm:$0xff] %v5161_v56  ;;  %v5176_v60 = vld [vmem:[%s6614_s1 + $0x140] sm:$0xff]   ;;  %v5185_v62 = vld [vmem:[%s6614_s1 + $0x1b8] sm:$0xff]  }
  0x1e   : > { %3791 = vmatpush3.bf16.msra.mxu1 %v4602_v10  ;;  %3772 = vmatprep.subr.bf16.mxu0 %v6662_v1  ;;  %6710 = vst [vmem:[#allocation19_spill] sm:$0xff] %v5176_v60  ;;  %v5179_v61 = vor.u32 %v745_v58, %v741_v57  ;;  %v5193_v2 = vld [vmem:[%s6614_s1 + $0x1f8] sm:$0xff]   ;;  %v5203_v4 = vld [vmem:[%s6614_s1 + $0x1b0] sm:$0xff]   ;;  %v5221_v8 = vld [vmem:[%s6614_s1 + $0x1a8] sm:$0xff]  }
  0x1f   : > { %3792 = vmatprep.subr.bf16.mxu1 %v6662_v1  ;;  %6711 = vst [vmem:[#allocation20_spill] sm:$0xff] %v5193_v2  ;;  %v5210_v6 = vld [vmem:[%s6614_s1 + $0x1f0] sm:$0xff]   ;;  %v5228_v10 = vld [vmem:[%s6614_s1 + $0x1e8] sm:$0xff]   ;;  %v5242_v12 = vld [vmem:[%s6614_s1 + $0x1e0] sm:$0xff]  }
  0x20   : > { %6712 = vst [vmem:[#allocation21_spill] sm:$0xff] %v5210_v6  ;;  %6713 = vst [vmem:[#allocation22_spill] sm:$0xff] %v5228_v10  ;;  %v5256_v15 = vld [vmem:[%s6614_s1 + $0x1d8] sm:$0xff]   ;;  %v5266_v18 = vld [vmem:[%s6614_s1 + $0x190] sm:$0xff]  }
  0x21   : > { %3773 = vmatpush3.bf16.msra.mxu0 %v4903_v13  ;;  %6714 = vst [vmem:[#allocation23_spill] sm:$0xff] %v5242_v12  ;;  %6715 = vst [vmem:[#allocation24_spill] sm:$0xff] %v5256_v15  ;;  %v5289_v57 = vld [vmem:[%s6614_s1 + $0x1c8] sm:$0xff]   ;;  %v5296_v58 = vld [vmem:[%s6614_s1 + $0x180] sm:$0xff]  }
  0x22   : > { %3793 = vmatpush3.bf16.msra.mxu1 %v4604_v14  ;;  %3774 = vmatprep.subr.bf16.mxu0 %v6662_v1  ;;  %v5249_v14 = vld [vmem:[%s6614_s1 + $0x198] sm:$0xff]   ;;  %6718 = vst [vmem:[#allocation27_spill] sm:$0xff] %v5289_v57 }
  0x23   : > { %3794 = vmatprep.subr.bf16.mxu1 %v6662_v1 }
  0x25   : > { %3775 = vmatpush3.bf16.msra.mxu0 %v4915_v16 }
  0x26   : > { %3795 = vmatpush3.bf16.msra.mxu1 %v4606_v17  ;;  %3776 = vmatprep.subr.bf16.mxu0 %v6662_v1  ;;  %v5259_v17 = vld [vmem:[%s4883_s22 + $0x8] sm:$0xf] }
  0x27   : > { %3796 = vmatprep.subr.bf16.mxu1 %v6662_v1  ;;  %6716 = vst [vmem:[#allocation25_spill] sm:$0xff] %v5259_v17  ;;  %v3328_v19 = vcombine.low %v5259_v17, %v5259_v17 }
  0x29   : > { %3777 = vmatpush3.bf16.msra.mxu0 %v4927_v20  ;;  %v1074_v54 = vshll.u32 %v3328_v19, 16 }
  0x2a   : > { %3797 = vmatpush3.bf16.msra.mxu1 %v4933_v21  ;;  %3802 = vmatprep.subr.bf16.mxu0 %v6662_v1 }
  0x2b   : > { %3822 = vmatprep.subr.bf16.mxu1 %v6662_v1 }
  0x2c   : > { %3779 = vmatmul.mubr.bf16.vlgmr.msra.gmra.mxu0 %v328_v22  ;;  %v5275_v22 = vld [vmem:[%s6614_s1 + $0x1d0] sm:$0xff]  }
  0x2d   : > { %3799 = vmatmul.mubr.bf16.vlgmr.msra.gmra.mxu1 %v280_v11  ;;  %3803 = vmatpush3.bf16.msra.mxu0 %v4940_v23  ;;  %v5235_v11 = vld [vmem:[%s6614_s1 + $0x1a0] sm:$0xff]   ;;  %6717 = vst [vmem:[#allocation26_spill] sm:$0xff] %v5275_v22 }
  0x2e   : > { %3823 = vmatpush3.bf16.msra.mxu1 %v4947_v24  ;;  %3804 = vmatprep.subr.bf16.mxu0 %v6662_v1 }
  0x2f   : > { %3824 = vmatprep.subr.bf16.mxu1 %v6662_v1  ;;  %3818 = vmatprep.mubr.msk.bf16.mxu0 %vm4781_vm0, %v6662_v1 }
  0x30   : > { %3838 = vmatprep.mubr.msk.bf16.mxu1 %vm4781_vm0, %v6662_v1 }
  0x31   : > { %3805 = vmatpush3.bf16.msra.mxu0 %v4954_v25 }
  0x32   : > { %3825 = vmatpush3.bf16.msra.mxu1 %v4961_v26  ;;  %3806 = vmatprep.subr.bf16.mxu0 %v6662_v1 }
  0x33   : > { %3826 = vmatprep.subr.bf16.mxu1 %v6662_v1 }
  0x35   : > { %3807 = vmatpush3.bf16.msra.mxu0 %v4972_v27 }
  0x36   : > { %3827 = vmatpush3.bf16.msra.mxu1 %v4979_v28  ;;  %3808 = vmatprep.subr.bf16.mxu0 %v6662_v1 }
  0x37   : > { %3828 = vmatprep.subr.bf16.mxu1 %v6662_v1 }
  0x39   : > { %3809 = vmatpush3.bf16.msra.mxu0 %v4986_v29 }
  0x3a   : > { %3829 = vmatpush3.bf16.msra.mxu1 %v4993_v30  ;;  %3810 = vmatprep.subr.bf16.mxu0 %v6662_v1 }
  0x3b   : > { %3830 = vmatprep.subr.bf16.mxu1 %v6662_v1 }
  0x3d   : > { %3811 = vmatpush3.bf16.msra.mxu0 %v5000_v31 }
  0x3e   : > { %3831 = vmatpush3.bf16.msra.mxu1 %v5007_v32  ;;  %3812 = vmatprep.subr.bf16.mxu0 %v6662_v1 }
  0x3f   : > { %3832 = vmatprep.subr.bf16.mxu1 %v6662_v1 }
  0x41   : > { %3813 = vmatpush3.bf16.msra.mxu0 %v5014_v33 }
  0x42   : > { %3833 = vmatpush3.bf16.msra.mxu1 %v5021_v34  ;;  %3814 = vmatprep.subr.bf16.mxu0 %v6662_v1 }
  0x43   : > { %3834 = vmatprep.subr.bf16.mxu1 %v6662_v1 }
  0x45   : > { %3815 = vmatpush3.bf16.msra.mxu0 %v5028_v35 }
  0x46   : > { %3835 = vmatpush3.bf16.msra.mxu1 %v5035_v36  ;;  %3816 = vmatprep.subr.bf16.mxu0 %v6662_v1 }
  0x47   : > { %3836 = vmatprep.subr.bf16.mxu1 %v6662_v1 }
  0x49   : > { %3817 = vmatpush3.bf16.msra.mxu0 %v5042_v37 }
  0x4a   : > { %3837 = vmatpush3.bf16.msra.mxu1 %v5049_v38  ;;  %3842 = vmatprep.subr.bf16.mxu0 %v6662_v1 }
  0x4b   : > { %3862 = vmatprep.subr.bf16.mxu1 %v6662_v1 }
  0x4c   : > { %3819 = vmatmul.mubr.bf16.vlgmr.msra.gmra.mxu0 %v523_v39  ;;  %v5282_v39 = vld [vmem:[%s6614_s1 + $0x188] sm:$0xff]  }
  0x4d   : > { %3843 = vmatpush3.bf16.msra.mxu0 %v5056_v40  ;;  %3839 = vmatmul.mubr.bf16.vlgmr.msra.gmra.mxu1 %v5060_v41 }
  0x4e   : > { %3863 = vmatpush3.bf16.msra.mxu1 %v5067_v42  ;;  %3844 = vmatprep.subr.bf16.mxu0 %v6662_v1 }
  0x4f   : > { %3864 = vmatprep.subr.bf16.mxu1 %v6662_v1  ;;  %3858 = vmatprep.mubr.msk.bf16.mxu0 %vm4781_vm0, %v6662_v1 }
  0x50   : > { %3878 = vmatprep.mubr.msk.bf16.mxu1 %vm4781_vm0, %v6662_v1 }
  0x51   : > { %3845 = vmatpush3.bf16.msra.mxu0 %v5075_v43 }
  0x52   : > { %3865 = vmatpush3.bf16.msra.mxu1 %v5082_v44  ;;  %3846 = vmatprep.subr.bf16.mxu0 %v6662_v1 }
  0x53   : > { %3866 = vmatprep.subr.bf16.mxu1 %v6662_v1 }
  0x55   : > { %3847 = vmatpush3.bf16.msra.mxu0 %v5093_v45 }
  0x56   : > { %3867 = vmatpush3.bf16.msra.mxu1 %v5100_v46  ;;  %3848 = vmatprep.subr.bf16.mxu0 %v6662_v1  ;;  %v5421_v46 = vld [vmem:[%s6617_s4 + $0x8] sm:$0xff]  }
  0x57   : > { %3868 = vmatprep.subr.bf16.mxu1 %v6662_v1  ;;  %6728 = vst [vmem:[#allocation37_spill] sm:$0xff] %v5421_v46 }
  0x59   : > { %3849 = vmatpush3.bf16.msra.mxu0 %v5106_v47 }
  0x5a   : > { %3869 = vmatpush3.bf16.msra.mxu1 %v5111_v48  ;;  %3850 = vmatprep.subr.bf16.mxu0 %v6662_v1 }
  0x5b   : > { %3870 = vmatprep.subr.bf16.mxu1 %v6662_v1 }
  0x5d   : > { %3851 = vmatpush3.bf16.msra.mxu0 %v5121_v49 }
  0x5e   : > { %3871 = vmatpush3.bf16.msra.mxu1 %v5128_v50  ;;  %3852 = vmatprep.subr.bf16.mxu0 %v6662_v1 }
  0x5f   : > { %3872 = vmatprep.subr.bf16.mxu1 %v6662_v1 }
  0x61   : > { %3853 = vmatpush3.bf16.msra.mxu0 %v5139_v52 }
  0x62   : > { %3873 = vmatpush3.bf16.msra.mxu1 %v5146_v53  ;;  %3854 = vmatprep.subr.bf16.mxu0 %v6662_v1  ;;  %v5385_v53 = vld [vmem:[%s6617_s4 + $0x30] sm:$0xff]  }
  0x63   : > { %3874 = vmatprep.subr.bf16.mxu1 %v6662_v1  ;;  %6723 = vst [vmem:[#allocation32_spill] sm:$0xff] %v5385_v53 }
  0x65   : > { %3855 = vmatpush3.bf16.msra.mxu0 %v5154_v55 }
  0x66   : > { %3875 = vmatpush3.bf16.msra.mxu1 %v5161_v56  ;;  %3856 = vmatprep.subr.bf16.mxu0 %v6662_v1  ;;  %v5379_v56 = vld [vmem:[%s6617_s4 + $0x38] sm:$0xff]  }
  0x67   : > { %3876 = vmatprep.subr.bf16.mxu1 %v6662_v1  ;;  %6722 = vst [vmem:[#allocation31_spill] sm:$0xff] %v5379_v56 }
  0x69   : > { %3857 = vmatpush3.bf16.msra.mxu0 %v5169_v59 }
  0x6a   : > { %3877 = vmatpush3.bf16.msra.mxu1 %v5176_v60  ;;  %3882 = vmatprep.subr.bf16.mxu0 %v6662_v1  ;;  %v5372_v60 = vrot.slane %v3328_v19, 1 }
  0x6b   : > { %3902 = vmatprep.subr.bf16.mxu1 %v6662_v1 }
  0x6c   : > { %3859 = vmatmul.mubr.bf16.vlgmr.msra.gmra.mxu0 %v5179_v61  ;;  %6721 = vst [vmem:[#allocation30_spill] sm:$0xff] %v5372_v60 }
  0x6d   : > { %3883 = vmatpush3.bf16.msra.mxu0 %v5185_v62  ;;  %3879 = vmatmul.mubr.bf16.vlgmr.msra.gmra.mxu1 %v6621_v63  ;;  %v1072_v63 = vshrl.u32 %v3328_v19, 16  ;;  %v5392_v19 = vld [vmem:[%s6617_s4 + $0x28] sm:$0xff]  }
  0x6e   : > { %3903 = vmatpush3.bf16.msra.mxu1 %v5193_v2  ;;  %3884 = vmatprep.subr.bf16.mxu0 %v6662_v1  ;;  %v5369_v2 = vld [vmem:[%s6614_s1 + $0x200] sm:$0xff]   ;;  %6724 = vst [vmem:[#allocation33_spill] sm:$0xff] %v5392_v19 }
  0x6f   : > { %3904 = vmatprep.subr.bf16.mxu1 %v6662_v1  ;;  %3898 = vmatprep.mubr.msk.bf16.mxu0 %vm4781_vm0, %v6662_v1  ;;  %6720 = vst [vmem:[#allocation29_spill] sm:$0xff] %v5369_v2 }
  0x70   : > { %3918 = vmatprep.mubr.msk.bf16.mxu1 %vm4781_vm0, %v6662_v1 }
  0x71   : > { %3885 = vmatpush3.bf16.msra.mxu0 %v5203_v4 }
  0x72   : > { %3905 = vmatpush3.bf16.msra.mxu1 %v5210_v6  ;;  %3886 = vmatprep.subr.bf16.mxu0 %v6662_v1  ;;  %v5362_v6 = vld [vmem:[%s6614_s1 + $0x208] sm:$0xff]  }
  0x73   : > { %3906 = vmatprep.subr.bf16.mxu1 %v6662_v1 }
  0x75   : > { %3887 = vmatpush3.bf16.msra.mxu0 %v5221_v8 }
  0x76   : > { %3907 = vmatpush3.bf16.msra.mxu1 %v5228_v10  ;;  %3888 = vmatprep.subr.bf16.mxu0 %v6662_v1 }
  0x77   : > { %3908 = vmatprep.subr.bf16.mxu1 %v6662_v1 }
  0x79   : > { %3889 = vmatpush3.bf16.msra.mxu0 %v5235_v11 }
  0x7a   : > { %3909 = vmatpush3.bf16.msra.mxu1 %v5242_v12  ;;  %3890 = vmatprep.subr.bf16.mxu0 %v6662_v1  ;;  %v5310_v12 = vld [vmem:[%s6614_s1 + $0x238] sm:$0xff]  }
  0x7b   : > { %3910 = vmatprep.subr.bf16.mxu1 %v6662_v1 }
  0x7d   : > { %3891 = vmatpush3.bf16.msra.mxu0 %v5249_v14 }
  0x7e   : > { %3911 = vmatpush3.bf16.msra.mxu1 %v5256_v15  ;;  %3892 = vmatprep.subr.bf16.mxu0 %v6662_v1  ;;  %v1076_v15 = vrot.slane %v1074_v54, 1  ;;  %v5323_v54 = vld [vmem:[%s6614_s1 + $0x230] sm:$0xff]  }
  0x7f   : > { %3912 = vmatprep.subr.bf16.mxu1 %v6662_v1 }
  0x80   : > { %v5312_v10 = vor.u32 %v1076_v15, %v1072_v63  ;;  %v5334_v63 = vld [vmem:[%s6614_s1 + $0x228] sm:$0xff]   ;;  %v5341_v15 = vld [vmem:[%s6614_s1 + $0x220] sm:$0xff]  }
  0x81   : > { %3893 = vmatpush3.bf16.msra.mxu0 %v5266_v18 }
  0x82   : > { %3913 = vmatpush3.bf16.msra.mxu1 %v5275_v22  ;;  %3894 = vmatprep.subr.bf16.mxu0 %v6662_v1  ;;  %v5303_v22 = vld [vmem:[%s6614_s1 + $0x1c0] sm:$0xff]  }
  0x83   : > { %3914 = vmatprep.subr.bf16.mxu1 %v6662_v1  ;;  %6719 = vst [vmem:[#allocation28_spill] sm:$0xff] %v5303_v22 }
  0x85   : > { %3895 = vmatpush3.bf16.msra.mxu0 %v5282_v39 }
  0x86   : > { %3915 = vmatpush3.bf16.msra.mxu1 %v5289_v57  ;;  %3896 = vmatprep.subr.bf16.mxu0 %v6662_v1  ;;  %v5355_v57 = vld [vmem:[%s6614_s1 + $0x210] sm:$0xff]  }
  0x87   : > { %3916 = vmatprep.subr.bf16.mxu1 %v6662_v1 }
  0x89   : > { %3897 = vmatpush3.bf16.msra.mxu0 %v5296_v58 }
  0x8a   : > { %3917 = vmatpush3.bf16.msra.mxu1 %v5303_v22  ;;  %3922 = vmatprep.subr.bf16.mxu0 %v6662_v1  ;;  %v5348_v22 = vld [vmem:[%s6614_s1 + $0x218] sm:$0xff]  }
  0x8b   : > { %3942 = vmatprep.subr.bf16.mxu1 %v6662_v1 }
  0x8c   : > { %3899 = vmatmul.mubr.bf16.vlgmr.msra.gmra.mxu0 %v5259_v17 }
  0x8d   : > { %3923 = vmatpush3.bf16.msra.mxu0 %v5310_v12  ;;  %3919 = vmatmul.mubr.bf16.vlgmr.msra.gmra.mxu1 %v5312_v10 }
  0x8e   : > { %3924 = vmatprep.subr.bf16.mxu0 %v6662_v1  ;;  %3938 = vmatprep.mubr.msk.bf16.mxu0 %vm4781_vm0, %v6662_v1 }
  0x8f   : > { %3958 = vmatprep.mubr.msk.bf16.mxu1 %vm4781_vm0, %v6662_v1  ;;  %3943 = vmatpush3.bf16.msra.mxu1 %v5379_v56  ;;  %v5399_v56 = vld [vmem:[%s6617_s4 + $0x20] sm:$0xff]  }
  0x90   : > { %3944 = vmatprep.subr.bf16.mxu1 %v6662_v1  ;;  %6725 = vst [vmem:[#allocation34_spill] sm:$0xff] %v5399_v56 }
  0x91   : > { %3925 = vmatpush3.bf16.msra.mxu0 %v5323_v54 }
  0x92   : > { %3926 = vmatprep.subr.bf16.mxu0 %v6662_v1 }
  0x93   : > { %3945 = vmatpush3.bf16.msra.mxu1 %v5385_v53  ;;  %v5406_v53 = vld [vmem:[%s6617_s4 + $0x18] sm:$0xff]  }
  0x94   : > { %3946 = vmatprep.subr.bf16.mxu1 %v6662_v1  ;;  %6726 = vst [vmem:[#allocation35_spill] sm:$0xff] %v5406_v53 }
  0x95   : > { %3927 = vmatpush3.bf16.msra.mxu0 %v5334_v63 }
  0x96   : > { %3928 = vmatprep.subr.bf16.mxu0 %v6662_v1 }
  0x97   : > { %3947 = vmatpush3.bf16.msra.mxu1 %v5392_v19  ;;  %v5414_v19 = vld [vmem:[%s6617_s4 + $0x10] sm:$0xff]  }
  0x98   : > { %3948 = vmatprep.subr.bf16.mxu1 %v6662_v1  ;;  %6727 = vst [vmem:[#allocation36_spill] sm:$0xff] %v5414_v19 }
  0x99   : > { %3929 = vmatpush3.bf16.msra.mxu0 %v5341_v15 }
  0x9a   : > { %3930 = vmatprep.subr.bf16.mxu0 %v6662_v1 }
  0x9b   : > { %3949 = vmatpush3.bf16.msra.mxu1 %v5399_v56 }
  0x9c   : > { %3950 = vmatprep.subr.bf16.mxu1 %v6662_v1 }
  0x9d   : > { %3931 = vmatpush3.bf16.msra.mxu0 %v5348_v22 }
  0x9e   : > { %3932 = vmatprep.subr.bf16.mxu0 %v6662_v1 }
  0x9f   : > { %3951 = vmatpush3.bf16.msra.mxu1 %v5406_v53 }
  0xa0   : > { %3952 = vmatprep.subr.bf16.mxu1 %v6662_v1 }
  0xa1   : > { %3933 = vmatpush3.bf16.msra.mxu0 %v5355_v57 }
  0xa2   : > { %3934 = vmatprep.subr.bf16.mxu0 %v6662_v1 }
  0xa3   : > { %3953 = vmatpush3.bf16.msra.mxu1 %v5414_v19  ;;  %v5428_v19 = vld [vmem:[%s6617_s4] sm:$0xff]  }
  0xa4   : > { %3954 = vmatprep.subr.bf16.mxu1 %v6662_v1  ;;  %6729 = vst [vmem:[#allocation38_spill] sm:$0xff] %v5428_v19 }
  0xa5   : > { %3935 = vmatpush3.bf16.msra.mxu0 %v5362_v6 }
  0xa6   : > { %3936 = vmatprep.subr.bf16.mxu0 %v6662_v1 }
  0xa7   : > { %3955 = vmatpush3.bf16.msra.mxu1 %v5421_v46 }
  0xa8   : > { %3956 = vmatprep.subr.bf16.mxu1 %v6662_v1 }
  0xa9   : > { %3937 = vmatpush3.bf16.msra.mxu0 %v5369_v2 }
  0xab   : > { %3957 = vmatpush3.bf16.msra.mxu1 %v5428_v19 }
  0xac   : > { %3939 = vmatmul.mubr.bf16.vlgmr.msra.gmra.mxu0 %v5372_v60  ;;  %3967 = vmatprep.subr.bf16.mxu1 %v6662_v1 }
  0xec   : > { %v412_v60 = vpop.f32.mrf.mxu0 }
  0xed   : > { %v500_v56 = vpop.f32.mrf.mxu1 }
  0xee   : > { %v501_v50 = vadd.f32 %v500_v56, %v412_v60  ;;  %v3780_v48 = vpop.f32.mrf.mxu0 }
  0xef   : > { %v3800_v53 = vpop.f32.mrf.mxu1 }
  0xf0   : > { %v415_v44 = vpop.f32.mrf.mxu0 }
  0xf1   : > { %v503_v42 = vpop.f32.mrf.mxu1 }
  0xf2   : > { %v3781_v17 = vpop.f32.mrf.mxu0 }
  0xf3   : > { %v3801_v56 = vpop.f32.mrf.mxu1 }
 0x10c   : > { %v607_v48 = vpop.f32.mrf.mxu0 }
 0x10d   : > { %v613_v60 = vadd.f32 %v607_v48, %v501_v50  ;;  %v713_v53 = vpop.f32.mrf.mxu1 }
 0x10e   : > { %v3820_v44 = vpop.f32.mrf.mxu0 }
 0x10f   : > { %v719_v38 = vadd.f32 %v713_v53, %v613_v60  ;;  %v3840_v46 = vpop.f32.mrf.mxu1 }
 0x110   : > { %v610_v42 = vpop.f32.mrf.mxu0 }
 0x111   : > { %v716_v36 = vpop.f32.mrf.mxu1 }
 0x112   : > { %v3821_v34 = vpop.f32.mrf.mxu0 }
 0x113   : > { %v3841_v17 = vpop.f32.mrf.mxu1 }
 0x12c   : > { %v830_v32 = vpop.f32.mrf.mxu0 }
 0x12d   : > { %v938_v30 = vpop.f32.mrf.mxu1  ;;  %v836_v53 = vadd.f32 %v830_v32, %v719_v38  ;;  %v6730_v38 = vmov 0.0  }
 0x12e   : > { %v3860_v28 = vpop.f32.mrf.mxu0 }
 0x12f   : > { %v3880_v26 = vpop.f32.mrf.mxu1  ;;  %v944_v36 = vadd.f32 %v938_v30, %v836_v53  ;;  %v5440_v28 = vld [vmem:[%s6616_s3] ss:$0 sm:$0xff]  ;;  %v6737_v53 = vld [vmem:[#allocation5_spill] sm:$0xff] }
 0x130   : > { %v833_v24 = vpop.f32.mrf.mxu0 }
 0x131   : > { %v941_v56 = vpop.f32.mrf.mxu1  ;;  %v5435_v24 = vld [vmem:[%s6615_s2] ss:$0 sm:$0xff] }
 0x132   : > { %v3861_v41 = vpop.f32.mrf.mxu0 }
 0x133   : > { %v3881_v19 = vpop.f32.mrf.mxu1 }
 0x14c   : > { %v1044_v21 = vpop.f32.mrf.mxu0 }
 0x14d   : > { %v1161_v1 = vpop.f32.mrf.mxu1  ;;  %v1050_v34 = vadd.f32 %v1044_v21, %v944_v36  ;;  %v6738_v36 = vld [vmem:[#allocation6_spill] sm:$0xff] }
 0x14e   : > { %v3900_v2 = vpop.f32.mrf.mxu0 }
 0x14f   : > { %v3920_v50 = vpop.f32.mrf.mxu1  ;;  %v1167_v42 = vadd.f32 %v1161_v1, %v1050_v34  ;;  %v6739_v34 = vld [vmem:[#allocation7_spill] sm:$0xff] }
 0x150   : > { %v1047_v48 = vpop.f32.mrf.mxu0 }
 0x151   : > { %v1164_v44 = vpop.f32.mrf.mxu1  ;;  %v6734_v48 = vld [vmem:[#allocation11_spill] sm:$0xff] }
 0x152   : > { %v3901_v60 = vpop.f32.mrf.mxu0  ;;  %v6735_v44 = vld [vmem:[#allocation3_spill] sm:$0xff] }
 0x153   : > { %v3921_v46 = vpop.f32.mrf.mxu1 }
 0x154   : > { %v6736_v46 = vld [vmem:[#allocation4_spill] sm:$0xff] }
 0x16c   : > { %v1269_v17 = vpop.f32.mrf.mxu0 }
 0x16d   : > { %v1275_v26 = vadd.f32 %v1269_v17, %v1167_v42  ;;  %v6740_v42 = vld [vmem:[#allocation8_spill] sm:$0xff]  ;;  %v6741_v17 = vld [vmem:[#allocation9_spill] sm:$0xff] }
 0x16e   : > { %v3940_v41 = vpop.f32.mrf.mxu0 }
 0x16f   : > { %v1283_v2 = vmul.f32 %v5435_v24, %v1275_v26  ;;  %v6742_v26 = vld [vmem:[#allocation10_spill] sm:$0xff]  ;;  %v6743_v41 = vld [vmem:[#allocation25_spill] sm:$0xff] }
 0x170   : > { %v1272_v19 = vpop.f32.mrf.mxu0 }
 0x171   : > { %v1291_v30 = vadd.f32 %v5440_v28, %v1283_v2  ;;  %v6744_v2 = vld [vmem:[#allocation12_spill] sm:$0xff] }
 0x172   : > { %v3941_v21 = vpop.f32.mrf.mxu0 }
 0x173   : > { %v1292_v1 = vmax.f32 %v1291_v30, 0.0  ;;  %v6745_v30 = vld [vmem:[#allocation13_spill] sm:$0xff] }
 0x175   : > { %v1293_v32 = vpack.c.bf16 %v1292_v1, %v1292_v1 }
 0x177   : > { %3959 = vmatmul.mubr.bf16.vlgmr.msra.gmra.mxu1 %v1293_v32  ;;  %v6746_v32 = vld [vmem:[#allocation14_spill] sm:$0xff] }
 0x178   : > { %3968 = vmatpush3.bf16.msra.mxu1 %v4833_v0  ;;  %3983 = vmatprep.mubr.msk.bf16.mxu1 %vm4781_vm0, %v6730_v38  ;;  %v6731_v0 = vrot.slane %v5133_v51, 1 }
 0x179   : > { %3969 = vmatprep.subr.bf16.mxu1 %v6730_v38 }
 0x17c   : > { %3970 = vmatpush3.bf16.msra.mxu1 %v4844_v3  ;;  %v5490_v3 = vld [vmem:[%s6619_s6] sm:$0xff] }
 0x17d   : > { %3971 = vmatprep.subr.bf16.mxu1 %v6730_v38  ;;  %3964 = vmatprep.mubr.msk.f32.mxu0 %vm1407_vm1, %v5490_v3 }
 0x180   : > { %3972 = vmatpush3.bf16.msra.mxu1 %v4861_v5  ;;  %v5528_v5 = vld [vmem:[%s4883_s22 + $0xc] sm:$0xf] }
 0x181   : > { %3973 = vmatprep.subr.bf16.mxu1 %v6730_v38 }
 0x184   : > { %3974 = vmatpush3.bf16.msra.mxu1 %v4873_v7  ;;  %v5547_v7 = vcombine.low %v5528_v5, %v5528_v5 }
 0x185   : > { %3975 = vmatprep.subr.bf16.mxu1 %v6730_v38 }
 0x188   : > { %3976 = vmatpush3.bf16.msra.mxu1 %v4889_v9  ;;  %v5554_v9 = vld [vmem:[%s6618_s5] ss:$0 sm:$0xff] }
 0x189   : > { %3977 = vmatprep.subr.bf16.mxu1 %v6730_v38 }
 0x18c   : > { %3978 = vmatpush3.bf16.msra.mxu1 %v4903_v13  ;;  %v6732_v13 = vld [vmem:[#allocation29_spill] sm:$0xff] }
 0x18d   : > { %3979 = vmatprep.subr.bf16.mxu1 %v6730_v38 }
 0x190   : > { %3980 = vmatpush3.bf16.msra.mxu1 %v4915_v16  ;;  %v5558_v16 = vrot.slane %v5547_v7, 1 }
 0x191   : > { %3981 = vmatprep.subr.bf16.mxu1 %v6730_v38 }
 0x194   : > { %3982 = vmatpush3.bf16.msra.mxu1 %v4927_v20 }
 0x195   : > { %4007 = vmatprep.subr.bf16.mxu1 %v6730_v38 }
 0x197   : > { %3984 = vmatmul.mubr.bf16.vlgmr.msra.gmra.mxu1 %v5179_v61  ;;  %v6733_v61 = vld [vmem:[#allocation2_spill] sm:$0xff] }
 0x198   : > { %4008 = vmatpush3.bf16.msra.mxu1 %v4940_v23  ;;  %4023 = vmatprep.mubr.msk.bf16.mxu1 %vm4781_vm0, %v6730_v38 }
 0x199   : > { %4009 = vmatprep.subr.bf16.mxu1 %v6730_v38 }
 0x19c   : > { %4010 = vmatpush3.bf16.msra.mxu1 %v4954_v25 }
 0x19d   : > { %4011 = vmatprep.subr.bf16.mxu1 %v6730_v38 }
 0x1a0   : > { %4012 = vmatpush3.bf16.msra.mxu1 %v4972_v27  ;;  %v5564_v27 = vld [vmem:[%s6619_s6 + $0x8] sm:$0xff] }
 0x1a1   : > { %4013 = vmatprep.subr.bf16.mxu1 %v6730_v38 }
 0x1a4   : > { %4014 = vmatpush3.bf16.msra.mxu1 %v4986_v29 }
 0x1a5   : > { %4015 = vmatprep.subr.bf16.mxu1 %v6730_v38 }
 0x1a8   : > { %4016 = vmatpush3.bf16.msra.mxu1 %v5000_v31 }
 0x1a9   : > { %4017 = vmatprep.subr.bf16.mxu1 %v6730_v38 }
 0x1ac   : > { %4018 = vmatpush3.bf16.msra.mxu1 %v5014_v33  ;;  %v5577_v33 = vld [vmem:[%s6614_s1 + $0x38] sm:$0xff]  }
 0x1ad   : > { %4019 = vmatprep.subr.bf16.mxu1 %v6730_v38 }
 0x1b0   : > { %4020 = vmatpush3.bf16.msra.mxu1 %v5028_v35  ;;  %v5586_v35 = vld [vmem:[%s6614_s1 + $0x30] sm:$0xff]  }
 0x1b1   : > { %4021 = vmatprep.subr.bf16.mxu1 %v6730_v38 }
 0x1b4   : > { %4022 = vmatpush3.bf16.msra.mxu1 %v5042_v37  ;;  %v5593_v37 = vld [vmem:[%s6614_s1 + $0x28] sm:$0xff]  }
 0x1b5   : > { %4047 = vmatprep.subr.bf16.mxu1 %v6730_v38 }
 0x1b7   : > { %4024 = vmatmul.mubr.bf16.vlgmr.msra.gmra.mxu1 %v6731_v0 }
 0x1b8   : > { %4048 = vmatpush3.bf16.msra.mxu1 %v5056_v40  ;;  %4063 = vmatprep.mubr.msk.bf16.mxu1 %vm4781_vm0, %v6730_v38  ;;  %v5600_v40 = vld [vmem:[%s6614_s1 + $0x20] sm:$0xff]  }
 0x1b9   : > { %4049 = vmatprep.subr.bf16.mxu1 %v6730_v38 }
 0x1bc   : > { %4050 = vmatpush3.bf16.msra.mxu1 %v5075_v43  ;;  %v5607_v43 = vld [vmem:[%s6614_s1 + $0x18] sm:$0xff]  }
 0x1bd   : > { %4051 = vmatprep.subr.bf16.mxu1 %v6730_v38 }
 0x1c0   : > { %4052 = vmatpush3.bf16.msra.mxu1 %v5093_v45  ;;  %v5614_v45 = vld [vmem:[%s6614_s1 + $0x10] sm:$0xff]  }
 0x1c1   : > { %4053 = vmatprep.subr.bf16.mxu1 %v6730_v38 }
 0x1c4   : > { %4054 = vmatpush3.bf16.msra.mxu1 %v5106_v47  ;;  %v5621_v47 = vld [vmem:[%s6614_s1 + $0x8] sm:$0xff]  }
 0x1c5   : > { %4055 = vmatprep.subr.bf16.mxu1 %v6730_v38 }
 0x1c8   : > { %4056 = vmatpush3.bf16.msra.mxu1 %v5121_v49 }
 0x1c9   : > { %4057 = vmatprep.subr.bf16.mxu1 %v6730_v38 }
 0x1cc   : > { %4058 = vmatpush3.bf16.msra.mxu1 %v5139_v52 }
 0x1cd   : > { %4059 = vmatprep.subr.bf16.mxu1 %v6730_v38 }
 0x1d0   : > { %4060 = vmatpush3.bf16.msra.mxu1 %v5154_v55 }
 0x1d1   : > { %4061 = vmatprep.subr.bf16.mxu1 %v6730_v38 }
 0x1d4   : > { %4062 = vmatpush3.bf16.msra.mxu1 %v5169_v59 }
 0x1d5   : > { %4087 = vmatprep.subr.bf16.mxu1 %v6730_v38 }
 0x1d7   : > { %4064 = vmatmul.mubr.bf16.vlgmr.msra.gmra.mxu1 %v5312_v10 }
 0x1d8   : > { %4088 = vmatpush3.bf16.msra.mxu1 %v5185_v62  ;;  %4103 = vmatprep.mubr.msk.bf16.mxu1 %vm4781_vm0, %v6730_v38 }
 0x1d9   : > { %4089 = vmatprep.subr.bf16.mxu1 %v6730_v38 }
 0x1dc   : > { %4090 = vmatpush3.bf16.msra.mxu1 %v5203_v4 }
 0x1dd   : > { %4091 = vmatprep.subr.bf16.mxu1 %v6730_v38 }
 0x1e0   : > { %4092 = vmatpush3.bf16.msra.mxu1 %v5221_v8 }
 0x1e1   : > { %4093 = vmatprep.subr.bf16.mxu1 %v6730_v38 }
 0x1e4   : > { %4094 = vmatpush3.bf16.msra.mxu1 %v5235_v11 }
 0x1e5   : > { %4095 = vmatprep.subr.bf16.mxu1 %v6730_v38 }
 0x1e8   : > { %4096 = vmatpush3.bf16.msra.mxu1 %v5249_v14 }
 0x1e9   : > { %4097 = vmatprep.subr.bf16.mxu1 %v6730_v38 }
 0x1ec   : > { %4098 = vmatpush3.bf16.msra.mxu1 %v5266_v18 }
 0x1ed   : > { %4099 = vmatprep.subr.bf16.mxu1 %v6730_v38 }
 0x1f0   : > { %4100 = vmatpush3.bf16.msra.mxu1 %v5282_v39 }
 0x1f1   : > { %4101 = vmatprep.subr.bf16.mxu1 %v6730_v38 }
 0x1f4   : > { %4102 = vmatpush3.bf16.msra.mxu1 %v5296_v58 }
 0x1f5   : > { %4127 = vmatprep.subr.bf16.mxu1 %v6730_v38 }
 0x1f7   : > { %4104 = vmatmul.mubr.bf16.vlgmr.msra.gmra.mxu1 %v5528_v5 }
 0x1f8   : > { %4128 = vmatpush3.bf16.msra.mxu1 %v5310_v12  ;;  %4143 = vmatprep.mubr.msk.bf16.mxu1 %vm4781_vm0, %v6730_v38 }
 0x1f9   : > { %4129 = vmatprep.subr.bf16.mxu1 %v6730_v38 }
 0x1fc   : > { %4130 = vmatpush3.bf16.msra.mxu1 %v5323_v54 }
 0x1fd   : > { %4131 = vmatprep.subr.bf16.mxu1 %v6730_v38 }
 0x200   : > { %4132 = vmatpush3.bf16.msra.mxu1 %v5334_v63 }
 0x201   : > { %4133 = vmatprep.subr.bf16.mxu1 %v6730_v38 }
 0x204   : > { %4134 = vmatpush3.bf16.msra.mxu1 %v5341_v15 }
 0x205   : > { %4135 = vmatprep.subr.bf16.mxu1 %v6730_v38 }
 0x208   : > { %4136 = vmatpush3.bf16.msra.mxu1 %v5348_v22 }
 0x209   : > { %4137 = vmatprep.subr.bf16.mxu1 %v6730_v38 }
 0x20c   : > { %4138 = vmatpush3.bf16.msra.mxu1 %v5355_v57 }
 0x20d   : > { %4139 = vmatprep.subr.bf16.mxu1 %v6730_v38 }
 0x210   : > { %4140 = vmatpush3.bf16.msra.mxu1 %v5362_v6 }
 0x211   : > { %4141 = vmatprep.subr.bf16.mxu1 %v6730_v38 }
 0x214   : > { %4142 = vmatpush3.bf16.msra.mxu1 %v6732_v13 }
 0x217   : > { %4144 = vmatmul.mubr.bf16.vlgmr.msra.gmra.mxu1 %v5558_v16 }
 0x218   : > { %4169 = vmatprep.mubr.msk.f32.mxu1 %vm1407_vm1, %v5490_v3 }
 0x237   : > { %v1399_v20 = vpop.f32.mrf.mxu1 }
 0x238   : > { %v1400_v23 = vadd.f32 %v5554_v9, %v1399_v20  ;;  %v6747_v20 = vld [vmem:[#allocation15_spill] sm:$0xff] }
 0x239   : > { %v3960_v25 = vpop.f32.mrf.mxu1 }
 0x23a   : > { %3962 = vmatprep.subr.msk.mxu0 %vm1414_vm2, %v1400_v23  ;;  %v6749_v25 = vld [vmem:[#allocation17_spill] sm:$0xff] }
 0x23b   : > { %v1402_v29 = vpop.f32.mrf.mxu1  ;;  %3963 = vmatpush3.msk.msra.mxu0 %vm1414_vm2, %v1400_v23  ;;  %v6748_v23 = vld [vmem:[#allocation16_spill] sm:$0xff] }
 0x23c   : > { %3965 = vmatmul.mubr.msk.f32.vlgmr.msra.gmra.mxu0 %vm1407_vm1, %v5564_v27  ;;  %3987 = vmatprep.subr.bf16.mxu0 %v6730_v38  ;;  %v6750_v29 = vld [vmem:[#allocation18_spill] sm:$0xff] }
 0x23d   : > { %v3961_v31 = vpop.f32.mrf.mxu1  ;;  %3988 = vmatpush3.bf16.msra.mxu0 %v5577_v33  ;;  %4003 = vmatprep.mubr.msk.bf16.mxu0 %vm4781_vm0, %v6730_v38 }
 0x23e   : > { %3989 = vmatprep.subr.bf16.mxu0 %v6730_v38  ;;  %v6751_v31 = vld [vmem:[#allocation19_spill] sm:$0xff] }
 0x241   : > { %3990 = vmatpush3.bf16.msra.mxu0 %v5586_v35 }
 0x242   : > { %3991 = vmatprep.subr.bf16.mxu0 %v6730_v38 }
 0x245   : > { %3992 = vmatpush3.bf16.msra.mxu0 %v5593_v37 }
 0x246   : > { %3993 = vmatprep.subr.bf16.mxu0 %v6730_v38 }
 0x249   : > { %3994 = vmatpush3.bf16.msra.mxu0 %v5600_v40 }
 0x24a   : > { %3995 = vmatprep.subr.bf16.mxu0 %v6730_v38 }
 0x24d   : > { %3996 = vmatpush3.bf16.msra.mxu0 %v5607_v43 }
 0x24e   : > { %3997 = vmatprep.subr.bf16.mxu0 %v6730_v38 }
 0x251   : > { %3998 = vmatpush3.bf16.msra.mxu0 %v5614_v45 }
 0x252   : > { %3999 = vmatprep.subr.bf16.mxu0 %v6730_v38 }
 0x255   : > { %4000 = vmatpush3.bf16.msra.mxu0 %v5621_v47 }
 0x256   : > { %4001 = vmatprep.subr.bf16.mxu0 %v6730_v38 }
 0x257   : > { %v5625_v51 = vpop.f32.mrf.mxu1 }
 0x259   : > { %4002 = vmatpush3.bf16.msra.mxu0 %v6733_v61  ;;  %v3985_v56 = vpop.f32.mrf.mxu1  ;;  %v6752_v61 = vld [vmem:[#allocation30_spill] sm:$0xff] }
 0x25a   : > { %4027 = vmatprep.subr.bf16.mxu0 %v6730_v38  ;;  %v6753_v56 = vld [vmem:[#allocation20_spill] sm:$0xff] }
 0x25b   : > { %v1530_v50 = vpop.f32.mrf.mxu1 }
 0x25c   : > { %4004 = vmatmul.mubr.bf16.vlgmr.msra.gmra.mxu0 %v6734_v48  ;;  %v6754_v50 = vld [vmem:[#allocation21_spill] sm:$0xff] }
 0x25d   : > { %4028 = vmatpush3.bf16.msra.mxu0 %v6735_v44  ;;  %4043 = vmatprep.mubr.msk.bf16.mxu0 %vm4781_vm0, %v6730_v38  ;;  %v3986_v60 = vpop.f32.mrf.mxu1 }
 0x25e   : > { %4029 = vmatprep.subr.bf16.mxu0 %v6730_v38  ;;  %v6755_v60 = vld [vmem:[#allocation22_spill] sm:$0xff] }
 0x261   : > { %4030 = vmatpush3.bf16.msra.mxu0 %v6736_v46 }
 0x262   : > { %4031 = vmatprep.subr.bf16.mxu0 %v6730_v38 }
 0x265   : > { %4032 = vmatpush3.bf16.msra.mxu0 %v6737_v53 }
 0x266   : > { %4033 = vmatprep.subr.bf16.mxu0 %v6730_v38 }
 0x269   : > { %4034 = vmatpush3.bf16.msra.mxu0 %v6738_v36  ;;  %v6756_v36 = vld [vmem:[#allocation23_spill] sm:$0xff] }
 0x26a   : > { %4035 = vmatprep.subr.bf16.mxu0 %v6730_v38 }
 0x26d   : > { %4036 = vmatpush3.bf16.msra.mxu0 %v6739_v34  ;;  %v6757_v34 = vld [vmem:[#allocation24_spill] sm:$0xff] }
 0x26e   : > { %4037 = vmatprep.subr.bf16.mxu0 %v6730_v38 }
 0x271   : > { %4038 = vmatpush3.bf16.msra.mxu0 %v6740_v42  ;;  %v1784_v42 = vshll.u32 %v5547_v7, 16 }
 0x272   : > { %4039 = vmatprep.subr.bf16.mxu0 %v6730_v38 }
 0x275   : > { %4040 = vmatpush3.bf16.msra.mxu0 %v6741_v17  ;;  %v6758_v17 = vld [vmem:[#allocation26_spill] sm:$0xff] }
 0x276   : > { %4041 = vmatprep.subr.bf16.mxu0 %v6730_v38 }
 0x277   : > { %v5653_v19 = vpop.f32.mrf.mxu1 }
 0x279   : > { %4042 = vmatpush3.bf16.msra.mxu0 %v6742_v26  ;;  %v4025_v21 = vpop.f32.mrf.mxu1  ;;  %v1782_v26 = vshrl.u32 %v5547_v7, 16  ;;  %v6762_v7 = vld [vmem:[#allocation32_spill] sm:$0xff] }
 0x27a   : > { %4067 = vmatprep.subr.bf16.mxu0 %v6730_v38 }
 0x27b   : > { %v1610_v1 = vpop.f32.mrf.mxu1 }
 0x27c   : > { %4044 = vmatmul.mubr.bf16.vlgmr.msra.gmra.mxu0 %v6743_v41  ;;  %v6760_v1 = vld [vmem:[#allocation28_spill] sm:$0xff] }
 0x27d   : > { %4068 = vmatpush3.bf16.msra.mxu0 %v6744_v2  ;;  %4083 = vmatprep.mubr.msk.bf16.mxu0 %vm4781_vm0, %v6730_v38  ;;  %v4026_v0 = vpop.f32.mrf.mxu1  ;;  %v1786_v2 = vrot.slane %v1784_v42, 1 }
 0x27e   : > { %4069 = vmatprep.subr.bf16.mxu0 %v6730_v38  ;;  %v6763_v0 = vld [vmem:[#allocation33_spill] sm:$0xff] }
 0x27f   : > { %v5690_v21 = vor.u32 %v1786_v2, %v1782_v26 }
 0x281   : > { %4070 = vmatpush3.bf16.msra.mxu0 %v6745_v30  ;;  %v6759_v30 = vld [vmem:[#allocation27_spill] sm:$0xff] }
 0x282   : > { %4071 = vmatprep.subr.bf16.mxu0 %v6730_v38 }
 0x285   : > { %4072 = vmatpush3.bf16.msra.mxu0 %v6746_v32  ;;  %v6761_v32 = vld [vmem:[#allocation31_spill] sm:$0xff] }
 0x286   : > { %4073 = vmatprep.subr.bf16.mxu0 %v6730_v38 }
 0x289   : > { %4074 = vmatpush3.bf16.msra.mxu0 %v6747_v20  ;;  %v6764_v20 = vld [vmem:[#allocation34_spill] sm:$0xff] }
 0x28a   : > { %4075 = vmatprep.subr.bf16.mxu0 %v6730_v38 }
 0x28d   : > { %4076 = vmatpush3.bf16.msra.mxu0 %v6748_v23  ;;  %v6765_v23 = vld [vmem:[#allocation35_spill] sm:$0xff] }
 0x28e   : > { %4077 = vmatprep.subr.bf16.mxu0 %v6730_v38 }
 0x291   : > { %4078 = vmatpush3.bf16.msra.mxu0 %v6749_v25  ;;  %v6766_v25 = vld [vmem:[#allocation36_spill] sm:$0xff] }
 0x292   : > { %4079 = vmatprep.subr.bf16.mxu0 %v6730_v38 }
 0x295   : > { %4080 = vmatpush3.bf16.msra.mxu0 %v6750_v29  ;;  %v6767_v29 = vld [vmem:[#allocation37_spill] sm:$0xff] }
 0x296   : > { %4081 = vmatprep.subr.bf16.mxu0 %v6730_v38 }
 0x297   : > { %v5676_v48 = vpop.f32.mrf.mxu1 }
 0x299   : > { %4082 = vmatpush3.bf16.msra.mxu0 %v6751_v31  ;;  %v4065_v44 = vpop.f32.mrf.mxu1 }
 0x29a   : > { %4107 = vmatprep.subr.bf16.mxu0 %v6730_v38 }
 0x29b   : > { %v1692_v46 = vpop.f32.mrf.mxu1 }
 0x29c   : > { %4084 = vmatmul.mubr.bf16.vlgmr.msra.gmra.mxu0 %v6752_v61 }
 0x29d   : > { %4108 = vmatpush3.bf16.msra.mxu0 %v6753_v56  ;;  %4123 = vmatprep.mubr.msk.bf16.mxu0 %vm4781_vm0, %v6730_v38  ;;  %v4066_v53 = vpop.f32.mrf.mxu1  ;;  %v6768_v56 = vld [vmem:[#allocation38_spill] sm:$0xff] }
 0x29e   : > { %4109 = vmatprep.subr.bf16.mxu0 %v6730_v38 }
 0x2a1   : > { %4110 = vmatpush3.bf16.msra.mxu0 %v6754_v50 }
 0x2a2   : > { %4111 = vmatprep.subr.bf16.mxu0 %v6730_v38 }
 0x2a5   : > { %4112 = vmatpush3.bf16.msra.mxu0 %v6755_v60 }
 0x2a6   : > { %4113 = vmatprep.subr.bf16.mxu0 %v6730_v38 }
 0x2a9   : > { %4114 = vmatpush3.bf16.msra.mxu0 %v6756_v36 }
 0x2aa   : > { %4115 = vmatprep.subr.bf16.mxu0 %v6730_v38 }
 0x2ad   : > { %4116 = vmatpush3.bf16.msra.mxu0 %v6757_v34 }
 0x2ae   : > { %4117 = vmatprep.subr.bf16.mxu0 %v6730_v38 }
 0x2b1   : > { %4118 = vmatpush3.bf16.msra.mxu0 %v6758_v17 }
 0x2b2   : > { %4119 = vmatprep.subr.bf16.mxu0 %v6730_v38 }
 0x2b5   : > { %4120 = vmatpush3.bf16.msra.mxu0 %v6759_v30 }
 0x2b6   : > { %4121 = vmatprep.subr.bf16.mxu0 %v6730_v38 }
 0x2b7   : > { %v1771_v31 = vpop.f32.mrf.mxu1 }
 0x2b9   : > { %4122 = vmatpush3.bf16.msra.mxu0 %v6760_v1  ;;  %v4105_v50 = vpop.f32.mrf.mxu1 }
 0x2ba   : > { %4147 = vmatprep.subr.bf16.mxu0 %v6730_v38 }
 0x2bb   : > { %v1774_v44 = vpop.f32.mrf.mxu1 }
 0x2bc   : > { %4124 = vmatmul.mubr.bf16.vlgmr.msra.gmra.mxu0 %v5690_v21 }
 0x2bd   : > { %4148 = vmatpush3.bf16.msra.mxu0 %v6761_v32  ;;  %4163 = vmatprep.mubr.msk.bf16.mxu0 %vm4781_vm0, %v6730_v38  ;;  %v4106_v60 = vpop.f32.mrf.mxu1 }
 0x2be   : > { %4149 = vmatprep.subr.bf16.mxu0 %v6730_v38 }
 0x2c1   : > { %4150 = vmatpush3.bf16.msra.mxu0 %v6762_v7 }
 0x2c2   : > { %4151 = vmatprep.subr.bf16.mxu0 %v6730_v38 }
 0x2c5   : > { %4152 = vmatpush3.bf16.msra.mxu0 %v6763_v0 }
 0x2c6   : > { %4153 = vmatprep.subr.bf16.mxu0 %v6730_v38 }
 0x2c9   : > { %4154 = vmatpush3.bf16.msra.mxu0 %v6764_v20 }
 0x2ca   : > { %4155 = vmatprep.subr.bf16.mxu0 %v6730_v38 }
 0x2cd   : > { %4156 = vmatpush3.bf16.msra.mxu0 %v6765_v23 }
 0x2ce   : > { %4157 = vmatprep.subr.bf16.mxu0 %v6730_v38 }
 0x2d1   : > { %4158 = vmatpush3.bf16.msra.mxu0 %v6766_v25 }
 0x2d2   : > { %4159 = vmatprep.subr.bf16.mxu0 %v6730_v38 }
 0x2d5   : > { %4160 = vmatpush3.bf16.msra.mxu0 %v6767_v29 }
 0x2d6   : > { %4161 = vmatprep.subr.bf16.mxu0 %v6730_v38 }
 0x2d7   : > { %v1866_v46 = vpop.f32.mrf.mxu1 }
 0x2d9   : > { %4162 = vmatpush3.bf16.msra.mxu0 %v6768_v56  ;;  %v4145_v53 = vpop.f32.mrf.mxu1 }
 0x2da   : > { %4172 = vmatprep.subr.bf16.mxu0 %v6730_v38 }
 0x2db   : > { %v1869_v36 = vpop.f32.mrf.mxu1 }
 0x2dd   : > { %v4146_v34 = vpop.f32.mrf.mxu1 }
 0x2fc   : > { %v5713_v42 = vpop.f32.mrf.mxu0 }
 0x2fd   : > { %6769 = vst [vmem:[#allocation29_spill] sm:$0xff] %v5713_v42 }
 0x2fe   : > { %v5715_v17 = vpop.f32.mrf.mxu0 }
 0x2ff   : > { %6770 = vst [vmem:[#allocation2_spill] sm:$0xff] %v5715_v17 }
 0x31c   : > { %v1567_v26 = vpop.f32.mrf.mxu0 }
 0x31d   : > { %v1568_v60 = vadd.f32 %v1567_v26, %v5625_v51  ;;  %v5725_v51 = vld [vmem:[%s6614_s1 + $0x78] sm:$0xff]   ;;  %v5807_v26 = vld [vmem:[%s6614_s1 + $0xa0] sm:$0xff]  }
 0x31e   : > { %v4005_v2 = vpop.f32.mrf.mxu0 }
 0x31f   : > { %v1613_v53 = vadd.f32 %v5653_v19, %v1568_v60  ;;  %v5748_v19 = vld [vmem:[%s6614_s1 + $0x60] sm:$0xff]   ;;  %v5828_v60 = vld [vmem:[%s6614_s1 + $0x88] sm:$0xff]  }
 0x320   : > { %v1570_v30 = vpop.f32.mrf.mxu0 }
 0x322   : > { %v4006_v1 = vpop.f32.mrf.mxu0 }
 0x33c   : > { %v1648_v32 = vpop.f32.mrf.mxu0 }
 0x33d   : > { %v1654_v36 = vadd.f32 %v1648_v32, %v1613_v53  ;;  %v5814_v32 = vld [vmem:[%s6614_s1 + $0x98] sm:$0xff]   ;;  %v5835_v53 = vld [vmem:[%s6614_s1 + $0x80] sm:$0xff]  }
 0x33e   : > { %v4045_v7 = vpop.f32.mrf.mxu0 }
 0x33f   : > { %v1695_v34 = vadd.f32 %v5676_v48, %v1654_v36  ;;  %v5755_v48 = vld [vmem:[%s6614_s1 + $0x58] sm:$0xff]  }
 0x340   : > { %v1651_v0 = vpop.f32.mrf.mxu0  ;;  %v5843_v36 = vld [vmem:[%s6614_s1 + $0x138] sm:$0xff]  }
 0x342   : > { %v4046_v20 = vpop.f32.mrf.mxu0 }
 0x35c   : > { %v1730_v23 = vpop.f32.mrf.mxu0 }
 0x35d   : > { %v1736_v17 = vadd.f32 %v1730_v23, %v1695_v34  ;;  %v5821_v23 = vld [vmem:[%s6614_s1 + $0x90] sm:$0xff]  }
 0x35e   : > { %v4085_v25 = vpop.f32.mrf.mxu0  ;;  %v5852_v34 = vld [vmem:[%s6614_s1 + $0x130] sm:$0xff]  }
 0x35f   : > { %v1777_v42 = vadd.f32 %v1771_v31, %v1736_v17  ;;  %v5762_v31 = vld [vmem:[%s6614_s1 + $0x50] sm:$0xff]  }
 0x360   : > { %v1733_v50 = vpop.f32.mrf.mxu0  ;;  %v5793_v17 = vld [vmem:[%s6614_s1 + $0xb0] sm:$0xff]  }
 0x362   : > { %v4086_v44 = vpop.f32.mrf.mxu0 }
 0x37c   : > { %v1823_v2 = vpop.f32.mrf.mxu0 }
 0x37d   : > { %v1829_v30 = vadd.f32 %v1823_v2, %v1777_v42  ;;  %v5784_v42 = vld [vmem:[%s6614_s1 + $0xb8] sm:$0xff]   ;;  %v5866_v2 = vld [vmem:[%s6614_s1 + $0x120] sm:$0xff]  }
 0x37e   : > { %v4125_v1 = vpop.f32.mrf.mxu0 }
 0x37f   : > { %v1872_v56 = vadd.f32 %v1866_v46, %v1829_v30  ;;  %v5776_v46 = vld [vmem:[%s6614_s1 + $0x40] sm:$0xff]   ;;  %v6082_v1 = vld [vmem:[%s6614_s1 + $0x1f8] sm:$0xff]  }
 0x380   : > { %v1826_v7 = vpop.f32.mrf.mxu0  ;;  %v6074_v30 = vld [vmem:[%s6614_s1 + $0x140] sm:$0xff]   ;;  %6779 = vst [vmem:[#allocation10_spill] sm:$0xff] %v6082_v1 }
 0x381   : > { %v1873_v0 = vmul.f32 %v5435_v24, %v1872_v56  ;;  %v5734_v24 = vld [vmem:[%s6614_s1 + $0x70] sm:$0xff]   ;;  %v5769_v56 = vld [vmem:[%s6614_s1 + $0x48] sm:$0xff]   ;;  %6778 = vst [vmem:[#allocation9_spill] sm:$0xff] %v6074_v30 }
 0x382   : > { %v4126_v20 = vpop.f32.mrf.mxu0  ;;  %v6091_v7 = vld [vmem:[%s6614_s1 + $0x1f0] sm:$0xff]  }
 0x383   : > { %v1874_v25 = vadd.f32 %v5440_v28, %v1873_v0  ;;  %v5741_v28 = vld [vmem:[%s6614_s1 + $0x68] sm:$0xff]   ;;  %6780 = vst [vmem:[#allocation25_spill] sm:$0xff] %v6091_v7 }
 0x385   : > { %v1875_v50 = vmax.f32 %v1874_v25, 0.0  ;;  %v6100_v25 = vld [vmem:[%s6614_s1 + $0x1e8] sm:$0xff]  }
 0x386   : > { %6781 = vst [vmem:[#allocation12_spill] sm:$0xff] %v6100_v25 }
 0x387   : > { %v1876_v44 = vpack.c.bf16 %v1875_v50, %v1875_v50 }
 0x389   : > { %4164 = vmatmul.mubr.bf16.vlgmr.msra.gmra.mxu0 %v1876_v44 }
 0x38a   : > { %4173 = vmatpush3.bf16.msra.mxu0 %v5725_v51  ;;  %4188 = vmatprep.mubr.msk.bf16.mxu0 %vm4781_vm0, %v6730_v38 }
 0x38b   : > { %4174 = vmatprep.subr.bf16.mxu0 %v6730_v38 }
 0x38e   : > { %4175 = vmatpush3.bf16.msra.mxu0 %v5734_v24 }
 0x38f   : > { %4176 = vmatprep.subr.bf16.mxu0 %v6730_v38 }
 0x392   : > { %4177 = vmatpush3.bf16.msra.mxu0 %v5741_v28 }
 0x393   : > { %4178 = vmatprep.subr.bf16.mxu0 %v6730_v38 }
 0x396   : > { %4179 = vmatpush3.bf16.msra.mxu0 %v5748_v19 }
 0x397   : > { %4180 = vmatprep.subr.bf16.mxu0 %v6730_v38 }
 0x39a   : > { %4181 = vmatpush3.bf16.msra.mxu0 %v5755_v48 }
 0x39b   : > { %4182 = vmatprep.subr.bf16.mxu0 %v6730_v38 }
 0x39e   : > { %4183 = vmatpush3.bf16.msra.mxu0 %v5762_v31 }
 0x39f   : > { %4184 = vmatprep.subr.bf16.mxu0 %v6730_v38 }
 0x3a2   : > { %4185 = vmatpush3.bf16.msra.mxu0 %v5769_v56 }
 0x3a3   : > { %4186 = vmatprep.subr.bf16.mxu0 %v6730_v38 }
 0x3a6   : > { %4187 = vmatpush3.bf16.msra.mxu0 %v5776_v46 }
 0x3a7   : > { %4212 = vmatprep.subr.bf16.mxu0 %v6730_v38 }
 0x3a9   : > { %4189 = vmatmul.mubr.bf16.vlgmr.msra.gmra.mxu0 %v5312_v10  ;;  %v5800_v10 = vld [vmem:[%s6614_s1 + $0xa8] sm:$0xff]  }
 0x3aa   : > { %4213 = vmatpush3.bf16.msra.mxu0 %v5784_v42  ;;  %4228 = vmatprep.mubr.msk.bf16.mxu0 %vm4781_vm0, %v6730_v38 }
 0x3ab   : > { %4214 = vmatprep.subr.bf16.mxu0 %v6730_v38 }
 0x3ae   : > { %4215 = vmatpush3.bf16.msra.mxu0 %v5793_v17 }
 0x3af   : > { %4216 = vmatprep.subr.bf16.mxu0 %v6730_v38 }
 0x3b2   : > { %4217 = vmatpush3.bf16.msra.mxu0 %v5800_v10 }
 0x3b3   : > { %4218 = vmatprep.subr.bf16.mxu0 %v6730_v38 }
 0x3b6   : > { %4219 = vmatpush3.bf16.msra.mxu0 %v5807_v26 }
 0x3b7   : > { %4220 = vmatprep.subr.bf16.mxu0 %v6730_v38 }
 0x3ba   : > { %4221 = vmatpush3.bf16.msra.mxu0 %v5814_v32 }
 0x3bb   : > { %4222 = vmatprep.subr.bf16.mxu0 %v6730_v38 }
 0x3be   : > { %4223 = vmatpush3.bf16.msra.mxu0 %v5821_v23 }
 0x3bf   : > { %4224 = vmatprep.subr.bf16.mxu0 %v6730_v38 }
 0x3c2   : > { %4225 = vmatpush3.bf16.msra.mxu0 %v5828_v60 }
 0x3c3   : > { %4226 = vmatprep.subr.bf16.mxu0 %v6730_v38 }
 0x3c6   : > { %4227 = vmatpush3.bf16.msra.mxu0 %v5835_v53 }
 0x3c7   : > { %4252 = vmatprep.subr.bf16.mxu0 %v6730_v38 }
 0x3c9   : > { %4229 = vmatmul.mubr.bf16.vlgmr.msra.gmra.mxu0 %v6752_v61  ;;  %v5859_v61 = vld [vmem:[%s6614_s1 + $0x128] sm:$0xff]  }
 0x3ca   : > { %4253 = vmatpush3.bf16.msra.mxu0 %v5843_v36  ;;  %4268 = vmatprep.mubr.msk.bf16.mxu0 %vm4781_vm0, %v6730_v38 }
 0x3cb   : > { %4254 = vmatprep.subr.bf16.mxu0 %v6730_v38 }
 0x3ce   : > { %4255 = vmatpush3.bf16.msra.mxu0 %v5852_v34 }
 0x3cf   : > { %4256 = vmatprep.subr.bf16.mxu0 %v6730_v38 }
 0x3d2   : > { %4257 = vmatpush3.bf16.msra.mxu0 %v5859_v61 }
 0x3d3   : > { %4258 = vmatprep.subr.bf16.mxu0 %v6730_v38 }
 0x3d6   : > { %4259 = vmatpush3.bf16.msra.mxu0 %v5866_v2 }
 0x3d7   : > { %4260 = vmatprep.subr.bf16.mxu0 %v6730_v38 }
 0x3da   : > { %4261 = vmatpush3.bf16.msra.mxu0 %v5121_v49  ;;  %v5898_v49 = vld [vmem:[%s4883_s22 + $0x10] sm:$0xf] }
 0x3db   : > { %4262 = vmatprep.subr.bf16.mxu0 %v6730_v38 }
 0x3de   : > { %4263 = vmatpush3.bf16.msra.mxu0 %v5139_v52  ;;  %v5917_v52 = vcombine.low %v5898_v49, %v5898_v49 }
 0x3df   : > { %4264 = vmatprep.subr.bf16.mxu0 %v6730_v38 }
 0x3e0   : > { %6771 = vst [vmem:[#allocation11_spill] sm:$0xff] %v5917_v52 }
 0x3e2   : > { %4265 = vmatpush3.bf16.msra.mxu0 %v5154_v55  ;;  %v6668_v55 = vrot.slane %v5917_v52, 1 }
 0x3e3   : > { %4266 = vmatprep.subr.bf16.mxu0 %v6730_v38 }
 0x3e6   : > { %4267 = vmatpush3.bf16.msra.mxu0 %v5169_v59 }
 0x3e7   : > { %4292 = vmatprep.subr.bf16.mxu0 %v6730_v38 }
 0x3e9   : > { %4269 = vmatmul.mubr.bf16.vlgmr.msra.gmra.mxu0 %v5690_v21 }
 0x3ea   : > { %4293 = vmatpush3.bf16.msra.mxu0 %v5185_v62  ;;  %4308 = vmatprep.mubr.msk.bf16.mxu0 %vm4781_vm0, %v6730_v38 }
 0x3eb   : > { %4294 = vmatprep.subr.bf16.mxu0 %v6730_v38 }
 0x3ee   : > { %4295 = vmatpush3.bf16.msra.mxu0 %v5203_v4 }
 0x3ef   : > { %4296 = vmatprep.subr.bf16.mxu0 %v6730_v38 }
 0x3f2   : > { %4297 = vmatpush3.bf16.msra.mxu0 %v5221_v8 }
 0x3f3   : > { %4298 = vmatprep.subr.bf16.mxu0 %v6730_v38 }
 0x3f6   : > { %4299 = vmatpush3.bf16.msra.mxu0 %v5235_v11 }
 0x3f7   : > { %4300 = vmatprep.subr.bf16.mxu0 %v6730_v38 }
 0x3fa   : > { %4301 = vmatpush3.bf16.msra.mxu0 %v5249_v14 }
 0x3fb   : > { %4302 = vmatprep.subr.bf16.mxu0 %v6730_v38 }
 0x3fe   : > { %4303 = vmatpush3.bf16.msra.mxu0 %v5266_v18 }
 0x3ff   : > { %4304 = vmatprep.subr.bf16.mxu0 %v6730_v38 }
 0x402   : > { %4305 = vmatpush3.bf16.msra.mxu0 %v5282_v39 }
 0x403   : > { %4306 = vmatprep.subr.bf16.mxu0 %v6730_v38 }
 0x406   : > { %4307 = vmatpush3.bf16.msra.mxu0 %v5296_v58  ;;  %v5978_v58 = vld [vmem:[%s6614_s1 + $0xe8] sm:$0xff]  }
 0x407   : > { %4332 = vmatprep.subr.bf16.mxu0 %v6730_v38 }
 0x409   : > { %4309 = vmatmul.mubr.bf16.vlgmr.msra.gmra.mxu0 %v5898_v49 }
 0x40a   : > { %4333 = vmatpush3.bf16.msra.mxu0 %v5310_v12  ;;  %4348 = vmatprep.mubr.msk.bf16.mxu0 %vm4781_vm0, %v6730_v38  ;;  %v5954_v12 = vld [vmem:[%s6614_s1] sm:$0xff]  }
 0x40b   : > { %4334 = vmatprep.subr.bf16.mxu0 %v6730_v38 }
 0x40e   : > { %4335 = vmatpush3.bf16.msra.mxu0 %v5323_v54  ;;  %v5985_v54 = vld [vmem:[%s6614_s1 + $0xe0] sm:$0xff]  }
 0x40f   : > { %4336 = vmatprep.subr.bf16.mxu0 %v6730_v38 }
 0x412   : > { %4337 = vmatpush3.bf16.msra.mxu0 %v5334_v63  ;;  %v5992_v63 = vld [vmem:[%s6614_s1 + $0xd8] sm:$0xff]  }
 0x413   : > { %4338 = vmatprep.subr.bf16.mxu0 %v6730_v38 }
 0x416   : > { %4339 = vmatpush3.bf16.msra.mxu0 %v5341_v15  ;;  %v5999_v15 = vld [vmem:[%s6614_s1 + $0xd0] sm:$0xff]  }
 0x417   : > { %4340 = vmatprep.subr.bf16.mxu0 %v6730_v38 }
 0x41a   : > { %4341 = vmatpush3.bf16.msra.mxu0 %v5348_v22  ;;  %v5962_v22 = vld [vmem:[%s6614_s1 + $0xf8] sm:$0xff]  }
 0x41b   : > { %4342 = vmatprep.subr.bf16.mxu0 %v6730_v38 }
 0x41e   : > { %4343 = vmatpush3.bf16.msra.mxu0 %v5355_v57  ;;  %v5971_v57 = vld [vmem:[%s6614_s1 + $0xf0] sm:$0xff]  }
 0x41f   : > { %4344 = vmatprep.subr.bf16.mxu0 %v6730_v38 }
 0x422   : > { %4345 = vmatpush3.bf16.msra.mxu0 %v5362_v6 }
 0x423   : > { %4346 = vmatprep.subr.bf16.mxu0 %v6730_v38 }
 0x426   : > { %4347 = vmatpush3.bf16.msra.mxu0 %v6732_v13  ;;  %v6021_v13 = vld [vmem:[%s6614_s1 + $0x178] sm:$0xff]  }
 0x429   : > { %4349 = vmatmul.mubr.bf16.vlgmr.msra.gmra.mxu0 %v6668_v55 }
 0x42a   : > { %4374 = vmatprep.mubr.msk.f32.mxu0 %vm1407_vm1, %v5490_v3  ;;  %v6006_v3 = vld [vmem:[%s6614_s1 + $0xc8] sm:$0xff]  }
 0x449   : > { %v1911_v59 = vpop.f32.mrf.mxu0 }
 0x44a   : > { %v1912_v62 = vadd.f32 %v5554_v9, %v1911_v59  ;;  %v6013_v9 = vld [vmem:[%s6614_s1 + $0xc0] sm:$0xff]  }
 0x44b   : > { %v4165_v4 = vpop.f32.mrf.mxu0  ;;  %v6107_v59 = vld [vmem:[%s6614_s1 + $0x1e0] sm:$0xff]  }
 0x44c   : > { %4167 = vmatprep.subr.msk.mxu1 %vm1414_vm2, %v1912_v62  ;;  %6782 = vst [vmem:[#allocation13_spill] sm:$0xff] %v6107_v59  ;;  %v2286_v4 = vshll.u32 %v5917_v52, 16 }
 0x44d   : > { %v1914_v8 = vpop.f32.mrf.mxu0  ;;  %4168 = vmatpush3.msk.msra.mxu1 %vm1414_vm2, %v1912_v62  ;;  %v6114_v62 = vld [vmem:[%s6614_s1 + $0x1d8] sm:$0xff]  }
 0x44e   : > { %4170 = vmatmul.mubr.msk.f32.vlgmr.msra.gmra.mxu1 %vm1407_vm1, %v5564_v27  ;;  %4192 = vmatprep.subr.bf16.mxu1 %v6730_v38  ;;  %v6030_v27 = vld [vmem:[%s6614_s1 + $0x170] sm:$0xff]   ;;  %6783 = vst [vmem:[#allocation14_spill] sm:$0xff] %v6114_v62 }
 0x44f   : > { %v4166_v6 = vpop.f32.mrf.mxu0  ;;  %4193 = vmatpush3.bf16.msra.mxu1 %v5577_v33  ;;  %4208 = vmatprep.mubr.msk.bf16.mxu1 %vm4781_vm0, %v6730_v38  ;;  %6772 = vst [vmem:[#allocation3_spill] sm:$0xff] %v6030_v27  ;;  %v6122_v8 = vld [vmem:[%s6614_s1 + $0x1d0] sm:$0xff]  }
 0x450   : > { %4194 = vmatprep.subr.bf16.mxu1 %v6730_v38  ;;  %6784 = vst [vmem:[#allocation15_spill] sm:$0xff] %v6122_v8  ;;  %v2284_v6 = vshrl.u32 %v5917_v52, 16 }
 0x453   : > { %4195 = vmatpush3.bf16.msra.mxu1 %v5586_v35 }
 0x454   : > { %4196 = vmatprep.subr.bf16.mxu1 %v6730_v38 }
 0x457   : > { %4197 = vmatpush3.bf16.msra.mxu1 %v5593_v37  ;;  %v6046_v37 = vld [vmem:[%s6614_s1 + $0x160] sm:$0xff]  }
 0x458   : > { %4198 = vmatprep.subr.bf16.mxu1 %v6730_v38  ;;  %6774 = vst [vmem:[#allocation5_spill] sm:$0xff] %v6046_v37 }
 0x45b   : > { %4199 = vmatpush3.bf16.msra.mxu1 %v5600_v40 }
 0x45c   : > { %4200 = vmatprep.subr.bf16.mxu1 %v6730_v38 }
 0x45f   : > { %4201 = vmatpush3.bf16.msra.mxu1 %v5607_v43 }
 0x460   : > { %4202 = vmatprep.subr.bf16.mxu1 %v6730_v38 }
 0x463   : > { %4203 = vmatpush3.bf16.msra.mxu1 %v5614_v45  ;;  %v6053_v45 = vld [vmem:[%s6614_s1 + $0x158] sm:$0xff]  }
 0x464   : > { %4204 = vmatprep.subr.bf16.mxu1 %v6730_v38  ;;  %6775 = vst [vmem:[#allocation6_spill] sm:$0xff] %v6053_v45 }
 0x467   : > { %4205 = vmatpush3.bf16.msra.mxu1 %v5621_v47  ;;  %v6060_v47 = vld [vmem:[%s6614_s1 + $0x150] sm:$0xff]  }
 0x468   : > { %4206 = vmatprep.subr.bf16.mxu1 %v6730_v38  ;;  %6776 = vst [vmem:[#allocation7_spill] sm:$0xff] %v6060_v47 }
 0x469   : > { %v5949_v11 = vpop.f32.mrf.mxu0 }
 0x46b   : > { %4207 = vmatpush3.bf16.msra.mxu1 %v5954_v12  ;;  %v4190_v14 = vpop.f32.mrf.mxu0 }
 0x46c   : > { %4232 = vmatprep.subr.bf16.mxu1 %v6730_v38  ;;  %v2288_v14 = vrot.slane %v2286_v4, 1  ;;  %v6184_v4 = vld [vmem:[%s6617_s4 + $0x10] sm:$0xff]  }
 0x46d   : > { %v2032_v18 = vpop.f32.mrf.mxu0  ;;  %6792 = vst [vmem:[#allocation22_spill] sm:$0xff] %v6184_v4 }
 0x46e   : > { %4209 = vmatmul.mubr.bf16.vlgmr.msra.gmra.mxu1 %v6743_v41  ;;  %v6067_v41 = vld [vmem:[%s6614_s1 + $0x148] sm:$0xff]  }
 0x46f   : > { %4233 = vmatpush3.bf16.msra.mxu1 %v5962_v22  ;;  %4248 = vmatprep.mubr.msk.bf16.mxu1 %vm4781_vm0, %v6730_v38  ;;  %v4191_v39 = vpop.f32.mrf.mxu0  ;;  %6777 = vst [vmem:[#allocation8_spill] sm:$0xff] %v6067_v41  ;;  %v6130_v18 = vld [vmem:[%s6614_s1 + $0x1c8] sm:$0xff]  }
 0x470   : > { %4234 = vmatprep.subr.bf16.mxu1 %v6730_v38  ;;  %6785 = vst [vmem:[#allocation16_spill] sm:$0xff] %v6130_v18  ;;  %v6134_v39 = vor.u32 %v2288_v14, %v2284_v6  ;;  %v6793_v14 = vld [vmem:[#allocation38_spill] sm:$0xff] }
 0x473   : > { %4235 = vmatpush3.bf16.msra.mxu1 %v5971_v57 }
 0x474   : > { %4236 = vmatprep.subr.bf16.mxu1 %v6730_v38 }
 0x477   : > { %4237 = vmatpush3.bf16.msra.mxu1 %v5978_v58 }
 0x478   : > { %4238 = vmatprep.subr.bf16.mxu1 %v6730_v38 }
 0x47b   : > { %4239 = vmatpush3.bf16.msra.mxu1 %v5985_v54 }
 0x47c   : > { %4240 = vmatprep.subr.bf16.mxu1 %v6730_v38 }
 0x47f   : > { %4241 = vmatpush3.bf16.msra.mxu1 %v5992_v63 }
 0x480   : > { %4242 = vmatprep.subr.bf16.mxu1 %v6730_v38 }
 0x483   : > { %4243 = vmatpush3.bf16.msra.mxu1 %v5999_v15 }
 0x484   : > { %4244 = vmatprep.subr.bf16.mxu1 %v6730_v38 }
 0x487   : > { %4245 = vmatpush3.bf16.msra.mxu1 %v6006_v3 }
 0x488   : > { %4246 = vmatprep.subr.bf16.mxu1 %v6730_v38 }
 0x489   : > { %v6040_v33 = vpop.f32.mrf.mxu0 }
 0x48b   : > { %4247 = vmatpush3.bf16.msra.mxu1 %v6013_v9  ;;  %v4230_v35 = vpop.f32.mrf.mxu0 }
 0x48c   : > { %4272 = vmatprep.subr.bf16.mxu1 %v6730_v38  ;;  %v6139_v35 = vld [vmem:[%s6614_s1 + $0x1c0] sm:$0xff]  }
 0x48d   : > { %v2112_v40 = vpop.f32.mrf.mxu0  ;;  %6786 = vst [vmem:[#allocation17_spill] sm:$0xff] %v6139_v35 }
 0x48e   : > { %4249 = vmatmul.mubr.bf16.vlgmr.msra.gmra.mxu1 %v5528_v5  ;;  %v6037_v5 = vld [vmem:[%s6614_s1 + $0x168] sm:$0xff]   ;;  %v6147_v40 = vld [vmem:[%s6617_s4 + $0x38] sm:$0xff]  }
 0x48f   : > { %4273 = vmatpush3.bf16.msra.mxu1 %v6021_v13  ;;  %4288 = vmatprep.mubr.msk.bf16.mxu1 %vm4781_vm0, %v6730_v38  ;;  %6773 = vst [vmem:[#allocation4_spill] sm:$0xff] %v6037_v5  ;;  %v4231_v43 = vpop.f32.mrf.mxu0  ;;  %6787 = vst [vmem:[#allocation18_spill] sm:$0xff] %v6147_v40 }
 0x490   : > { %4274 = vmatprep.subr.bf16.mxu1 %v6730_v38  ;;  %v6156_v43 = vld [vmem:[%s6617_s4 + $0x30] sm:$0xff]  }
 0x491   : > { %6788 = vst [vmem:[#allocation19_spill] sm:$0xff] %v6156_v43 }
 0x493   : > { %4275 = vmatpush3.bf16.msra.mxu1 %v6030_v27 }
 0x494   : > { %4276 = vmatprep.subr.bf16.mxu1 %v6730_v38 }
 0x497   : > { %4277 = vmatpush3.bf16.msra.mxu1 %v6037_v5 }
 0x498   : > { %4278 = vmatprep.subr.bf16.mxu1 %v6730_v38 }
 0x49b   : > { %4279 = vmatpush3.bf16.msra.mxu1 %v6046_v37 }
 0x49c   : > { %4280 = vmatprep.subr.bf16.mxu1 %v6730_v38 }
 0x49f   : > { %4281 = vmatpush3.bf16.msra.mxu1 %v6053_v45 }
 0x4a0   : > { %4282 = vmatprep.subr.bf16.mxu1 %v6730_v38 }
 0x4a3   : > { %4283 = vmatpush3.bf16.msra.mxu1 %v6060_v47 }
 0x4a4   : > { %4284 = vmatprep.subr.bf16.mxu1 %v6730_v38 }
 0x4a7   : > { %4285 = vmatpush3.bf16.msra.mxu1 %v6067_v41 }
 0x4a8   : > { %4286 = vmatprep.subr.bf16.mxu1 %v6730_v38 }
 0x4a9   : > { %v6095_v0 = vpop.f32.mrf.mxu0 }
 0x4ab   : > { %4287 = vmatpush3.bf16.msra.mxu1 %v6074_v30  ;;  %v4270_v20 = vpop.f32.mrf.mxu0 }
 0x4ac   : > { %4312 = vmatprep.subr.bf16.mxu1 %v6730_v38  ;;  %v6163_v20 = vld [vmem:[%s6617_s4 + $0x28] sm:$0xff]  }
 0x4ad   : > { %v2194_v50 = vpop.f32.mrf.mxu0  ;;  %6789 = vst [vmem:[#allocation30_spill] sm:$0xff] %v6163_v20 }
 0x4ae   : > { %4289 = vmatmul.mubr.bf16.vlgmr.msra.gmra.mxu1 %v5558_v16  ;;  %v6170_v50 = vld [vmem:[%s6617_s4 + $0x20] sm:$0xff]  }
 0x4af   : > { %4313 = vmatpush3.bf16.msra.mxu1 %v6082_v1  ;;  %4328 = vmatprep.mubr.msk.bf16.mxu1 %vm4781_vm0, %v6730_v38  ;;  %v4271_v44 = vpop.f32.mrf.mxu0  ;;  %6790 = vst [vmem:[#allocation20_spill] sm:$0xff] %v6170_v50 }
 0x4b0   : > { %4314 = vmatprep.subr.bf16.mxu1 %v6730_v38  ;;  %v6177_v44 = vld [vmem:[%s6617_s4 + $0x18] sm:$0xff]  }
 0x4b1   : > { %6791 = vst [vmem:[#allocation21_spill] sm:$0xff] %v6177_v44 }
 0x4b3   : > { %4315 = vmatpush3.bf16.msra.mxu1 %v6091_v7 }
 0x4b4   : > { %4316 = vmatprep.subr.bf16.mxu1 %v6730_v38 }
 0x4b7   : > { %4317 = vmatpush3.bf16.msra.mxu1 %v6100_v25 }
 0x4b8   : > { %4318 = vmatprep.subr.bf16.mxu1 %v6730_v38 }
 0x4bb   : > { %4319 = vmatpush3.bf16.msra.mxu1 %v6107_v59 }
 0x4bc   : > { %4320 = vmatprep.subr.bf16.mxu1 %v6730_v38 }
 0x4bf   : > { %4321 = vmatpush3.bf16.msra.mxu1 %v6114_v62 }
 0x4c0   : > { %4322 = vmatprep.subr.bf16.mxu1 %v6730_v38 }
 0x4c3   : > { %4323 = vmatpush3.bf16.msra.mxu1 %v6122_v8 }
 0x4c4   : > { %4324 = vmatprep.subr.bf16.mxu1 %v6730_v38 }
 0x4c7   : > { %4325 = vmatpush3.bf16.msra.mxu1 %v6130_v18 }
 0x4c8   : > { %4326 = vmatprep.subr.bf16.mxu1 %v6730_v38 }
 0x4c9   : > { %v6190_v6 = vpop.f32.mrf.mxu0 }
 0x4cb   : > { %4327 = vmatpush3.bf16.msra.mxu1 %v6139_v35  ;;  %v4310_v55 = vpop.f32.mrf.mxu0 }
 0x4cc   : > { %4352 = vmatprep.subr.bf16.mxu1 %v6730_v38 }
 0x4ce   : > { %4329 = vmatmul.mubr.bf16.vlgmr.msra.gmra.mxu1 %v6134_v39 }
 0x4cf   : > { %4353 = vmatpush3.bf16.msra.mxu1 %v6147_v40  ;;  %4368 = vmatprep.mubr.msk.bf16.mxu1 %vm4781_vm0, %v6730_v38 }
 0x4d0   : > { %4354 = vmatprep.subr.bf16.mxu1 %v6730_v38 }
 0x4d3   : > { %4355 = vmatpush3.bf16.msra.mxu1 %v6156_v43 }
 0x4d4   : > { %4356 = vmatprep.subr.bf16.mxu1 %v6730_v38 }
 0x4d7   : > { %4357 = vmatpush3.bf16.msra.mxu1 %v6163_v20 }
 0x4d8   : > { %4358 = vmatprep.subr.bf16.mxu1 %v6730_v38 }
 0x4db   : > { %4359 = vmatpush3.bf16.msra.mxu1 %v6170_v50 }
 0x4dc   : > { %4360 = vmatprep.subr.bf16.mxu1 %v6730_v38 }
 0x4df   : > { %4361 = vmatpush3.bf16.msra.mxu1 %v6177_v44  ;;  %v2276_v44 = vpop.f32.mrf.mxu0 }
 0x4e0   : > { %4362 = vmatprep.subr.bf16.mxu1 %v6730_v38 }
 0x4e1   : > { %v4311_v50 = vpop.f32.mrf.mxu0 }
 0x4e2   : > { %v6795_v50 = vld [vmem:[#allocation2_spill] sm:$0xff] }
 0x4e3   : > { %4363 = vmatpush3.bf16.msra.mxu1 %v6184_v4  ;;  %v6794_v4 = vld [vmem:[#allocation29_spill] sm:$0xff]  ;;  %v3003_v44 = vmul.f32 0.875, %v6795_v50  ;;  %v3009_v25 = vmul.f32 0.625, %v6795_v50  ;;  %v3015_v27 = vmul.f32 0.375, %v6795_v50 }
 0x4e4   : > { %4364 = vmatprep.subr.bf16.mxu1 %v6730_v38  ;;  %v3004_v40 = vmul.f32 0.875, %v6794_v4  ;;  %v3010_v35 = vmul.f32 0.625, %v6794_v4 }
 0x4e7   : > { %4365 = vmatpush3.bf16.msra.mxu1 %v6767_v29  ;;  %v3016_v29 = vmul.f32 0.375, %v6794_v4 }
 0x4e8   : > { %4366 = vmatprep.subr.bf16.mxu1 %v6730_v38 }
 0x4e9   : > { %v6194_v20 = vpop.f32.mrf.mxu0 }
 0x4eb   : > { %4367 = vmatpush3.bf16.msra.mxu1 %v6793_v14  ;;  %v4350_v43 = vpop.f32.mrf.mxu0 }
 0x4ec   : > { %4377 = vmatprep.subr.bf16.mxu1 %v6730_v38  ;;  %v3022_v43 = vmul.f32 0.125, %v6794_v4 }
 0x4ed   : > { %v2371_v55 = vpop.f32.mrf.mxu0 }
 0x4ef   : > { %v4351_v47 = vpop.f32.mrf.mxu0 }
 0x50e   : > { %v4171_v18 = vpop.f32.mrf.mxu1 }
 0x50f   : > { %v3000_v8 = vmul.f32 0.0, %v4171_v18  ;;  %v6200_v62 = vmul.f32 0.125, %v4171_v18  ;;  %v6202_v14 = vmul.f32 0.375, %v4171_v18  ;;  %v6204_v59 = vmul.f32 0.625, %v4171_v18 }
 0x510   : > { %v6214_v7 = vmul.f32 0.875, %v4171_v18  ;;  %v1986_v1 = vpop.f32.mrf.mxu1 }
 0x511   : > { %v3002_v55 = vadd.f32 %v6794_v4, %v3000_v8  ;;  %v3008_v52 = vadd.f32 %v6200_v62, %v3004_v40  ;;  %v3014_v30 = vadd.f32 %v6202_v14, %v3010_v35  ;;  %v3020_v41 = vadd.f32 %v6204_v59, %v3016_v29 }
 0x512   : > { %v3026_v45 = vadd.f32 %v6214_v7, %v3022_v43  ;;  %v2999_v37 = vmul.f32 0.0, %v1986_v1  ;;  %v6221_v5 = vmul.f32 0.125, %v1986_v1  ;;  %v6223_v18 = vmul.f32 0.375, %v1986_v1 }
 0x513   : > { %v3021_v8 = vmul.f32 0.125, %v6795_v50  ;;  %3064 = vst [vmem:[%s6209_s25 + $0x8] sm:$0xff] %v3002_v55  ;;  %3066 = vst [vmem:[%s6209_s25 + $0x18] sm:$0xff] %v3002_v55  ;;  %v6232_v47 = vmul.f32 0.625, %v1986_v1  ;;  %v6234_v35 = vmul.f32 0.875, %v1986_v1 }
 0x514   : > { %6796 = vst [vmem:[#allocation23_spill] sm:$0xff] %v6221_v5  ;;  %6797 = vst [vmem:[#allocation24_spill] sm:$0xff] %v6223_v18  ;;  %v3001_v40 = vadd.f32 %v2999_v37, %v6795_v50  ;;  %v3007_v4 = vadd.f32 %v6221_v5, %v3003_v44  ;;  %v3013_v29 = vadd.f32 %v6223_v18, %v3009_v25 }
 0x515   : > { %3068 = vst [vmem:[%s6209_s25 + $0x28] sm:$0xff] %v3008_v52  ;;  %3070 = vst [vmem:[%s6209_s25 + $0x38] sm:$0xff] %v3014_v30  ;;  %v3019_v43 = vadd.f32 %v6232_v47, %v3015_v27  ;;  %v3025_v55 = vadd.f32 %v6234_v35, %v3021_v8 }
 0x516   : > { %3072 = vst [vmem:[%s6209_s25 + $0x48] sm:$0xff] %v3020_v41  ;;  %3074 = vst [vmem:[%s6209_s25 + $0x58] sm:$0xff] %v3026_v45 }
 0x517   : > { %3063 = vst [vmem:[%s6209_s25] sm:$0xff] %v3001_v40  ;;  %3065 = vst [vmem:[%s6209_s25 + $0x10] sm:$0xff] %v3001_v40 }
 0x518   : > { %3067 = vst [vmem:[%s6209_s25 + $0x20] sm:$0xff] %v3007_v4  ;;  %3069 = vst [vmem:[%s6209_s25 + $0x30] sm:$0xff] %v3013_v29 }
 0x519   : > { %3071 = vst [vmem:[%s6209_s25 + $0x40] sm:$0xff] %v3019_v43  ;;  %3073 = vst [vmem:[%s6209_s25 + $0x50] sm:$0xff] %v3025_v55 }
 0x52e   : > { %v2069_v52 = vpop.f32.mrf.mxu1 }
 0x52f   : > { %v2070_v8 = vadd.f32 %v2069_v52, %v5949_v11 }
 0x530   : > { %v4210_v41 = vpop.f32.mrf.mxu1 }
 0x531   : > { %v2115_v40 = vadd.f32 %v6040_v33, %v2070_v8  ;;  %v4760_v8 = vld [vmem:[%s6619_s6] sm:$0xff] }
 0x532   : > { %v2072_v30 = vpop.f32.mrf.mxu1 }
 0x534   : > { %v4211_v45 = vpop.f32.mrf.mxu1 }
 0x54e   : > { %v2150_v1 = vpop.f32.mrf.mxu1 }
 0x54f   : > { %v2156_v4 = vadd.f32 %v2150_v1, %v2115_v40  ;;  %v6404_v1 = vld [vmem:[%s6618_s5] ss:$0 sm:$0xff]  ;;  %v6416_v40 = vld [vmem:[%s6619_s6 + $0x8] sm:$0xff] }
 0x550   : > { %v4250_v37 = vpop.f32.mrf.mxu1 }
 0x551   : > { %v2197_v29 = vadd.f32 %v6095_v0, %v2156_v4 }
 0x552   : > { %v2153_v50 = vpop.f32.mrf.mxu1 }
 0x554   : > { %v4251_v44 = vpop.f32.mrf.mxu1 }
 0x56e   : > { %v2232_v5 = vpop.f32.mrf.mxu1 }
 0x56f   : > { %v2238_v43 = vadd.f32 %v2232_v5, %v2197_v29  ;;  %v6262_v5 = vld [vmem:[%s6616_s3] ss:$0 sm:$0xff]  ;;  %v4762_v29 = vld [vmem:[%s6614_s1 + $0x38] sm:$0xff]  }
 0x570   : > { %v4290_v25 = vpop.f32.mrf.mxu1 }
 0x571   : > { %v2279_v55 = vadd.f32 %v6190_v6, %v2238_v43  ;;  %v4763_v43 = vld [vmem:[%s6614_s1 + $0x30] sm:$0xff]  }
 0x572   : > { %v2235_v18 = vpop.f32.mrf.mxu1 }
 0x573   : > { %v6256_v18 = vld [vmem:[%s6615_s2] ss:$0 sm:$0xff] }
 0x574   : > { %v4291_v27 = vpop.f32.mrf.mxu1 }
 0x58e   : > { %v2325_v41 = vpop.f32.mrf.mxu1 }
 0x58f   : > { %v2331_v30 = vadd.f32 %v2325_v41, %v2279_v55  ;;  %v4764_v55 = vld [vmem:[%s6614_s1 + $0x28] sm:$0xff]   ;;  %v4765_v41 = vld [vmem:[%s6614_s1 + $0x20] sm:$0xff]  }
 0x590   : > { %v4330_v45 = vpop.f32.mrf.mxu1 }
 0x591   : > { %v2374_v37 = vadd.f32 %v6194_v20, %v2331_v30  ;;  %v4758_v20 = vld [vmem:[%s6614_s1 + $0x200] sm:$0xff]   ;;  %v4766_v30 = vld [vmem:[%s6614_s1 + $0x18] sm:$0xff]   ;;  %v4767_v45 = vld [vmem:[%s6614_s1 + $0x10] sm:$0xff]  }
 0x592   : > { %v2328_v50 = vpop.f32.mrf.mxu1 }
 0x593   : > { %v2375_v11 = vmul.f32 %v6256_v18, %v2374_v37  ;;  %v4768_v37 = vld [vmem:[%s6614_s1 + $0x8] sm:$0xff]  }
 0x594   : > { %v4331_v33 = vpop.f32.mrf.mxu1 }
 0x595   : > { %v2376_v0 = vadd.f32 %v6262_v5, %v2375_v11 }
 0x597   : > { %v2377_v6 = vmax.f32 %v2376_v0, 0.0  ;;  %v4769_v0 = vld [vmem:[%s4883_s22 + $0xc] sm:$0xf] }
 0x599   : > { %v2378_v52 = vpack.c.bf16 %v2377_v6, %v2377_v6 }
 0x59b   : > { %4369 = vmatmul.mubr.bf16.vlgmr.msra.gmra.mxu1 %v2378_v52  ;;  %v6805_v52 = vld [vmem:[#allocation11_spill] sm:$0xff] }
 0x59c   : > { %4378 = vmatpush3.bf16.msra.mxu1 %v5725_v51  ;;  %4393 = vmatprep.mubr.msk.bf16.mxu1 %vm4781_vm0, %v6730_v38  ;;  %v4741_v51 = vld [vmem:[%s6614_s1 + $0x108] sm:$0xff]  }
 0x59d   : > { %4379 = vmatprep.subr.bf16.mxu1 %v6730_v38 }
 0x5a0   : > { %4380 = vmatpush3.bf16.msra.mxu1 %v5734_v24  ;;  %v4742_v24 = vld [vmem:[%s6614_s1 + $0x100] sm:$0xff]  }
 0x5a1   : > { %4381 = vmatprep.subr.bf16.mxu1 %v6730_v38 }
 0x5a4   : > { %4382 = vmatpush3.bf16.msra.mxu1 %v5741_v28  ;;  %v4743_v28 = vld [vmem:[%s6614_s1 + $0x1b8] sm:$0xff]  }
 0x5a5   : > { %4383 = vmatprep.subr.bf16.mxu1 %v6730_v38 }
 0x5a8   : > { %4384 = vmatpush3.bf16.msra.mxu1 %v5748_v19  ;;  %v4744_v19 = vld [vmem:[%s6614_s1 + $0x1b0] sm:$0xff]  }
 0x5a9   : > { %4385 = vmatprep.subr.bf16.mxu1 %v6730_v38 }
 0x5ac   : > { %4386 = vmatpush3.bf16.msra.mxu1 %v5755_v48  ;;  %v4745_v48 = vld [vmem:[%s6614_s1 + $0x1a8] sm:$0xff]  }
 0x5ad   : > { %4387 = vmatprep.subr.bf16.mxu1 %v6730_v38 }
 0x5b0   : > { %4388 = vmatpush3.bf16.msra.mxu1 %v5762_v31  ;;  %v4746_v31 = vld [vmem:[%s6614_s1 + $0x1a0] sm:$0xff]  }
 0x5b1   : > { %4389 = vmatprep.subr.bf16.mxu1 %v6730_v38 }
 0x5b4   : > { %4390 = vmatpush3.bf16.msra.mxu1 %v5769_v56  ;;  %v4747_v56 = vld [vmem:[%s6614_s1 + $0x198] sm:$0xff]  }
 0x5b5   : > { %4391 = vmatprep.subr.bf16.mxu1 %v6730_v38 }
 0x5b8   : > { %4392 = vmatpush3.bf16.msra.mxu1 %v5776_v46  ;;  %v4748_v46 = vld [vmem:[%s6614_s1 + $0x190] sm:$0xff]  }
 0x5b9   : > { %4417 = vmatprep.subr.bf16.mxu1 %v6730_v38 }
 0x5bb   : > { %4394 = vmatmul.mubr.bf16.vlgmr.msra.gmra.mxu1 %v5690_v21  ;;  %v4740_v21 = vld [vmem:[%s6614_s1 + $0x110] sm:$0xff]  }
 0x5bc   : > { %4418 = vmatpush3.bf16.msra.mxu1 %v5784_v42  ;;  %4433 = vmatprep.mubr.msk.bf16.mxu1 %vm4781_vm0, %v6730_v38  ;;  %v4749_v42 = vld [vmem:[%s6614_s1 + $0x188] sm:$0xff]  }
 0x5bd   : > { %4419 = vmatprep.subr.bf16.mxu1 %v6730_v38 }
 0x5c0   : > { %4420 = vmatpush3.bf16.msra.mxu1 %v5793_v17  ;;  %v4750_v17 = vld [vmem:[%s6614_s1 + $0x180] sm:$0xff]  }
 0x5c1   : > { %4421 = vmatprep.subr.bf16.mxu1 %v6730_v38 }
 0x5c4   : > { %4422 = vmatpush3.bf16.msra.mxu1 %v5800_v10  ;;  %v285_v10 = vld [vmem:[%s4883_s22 + $0x14] sm:$0xf] }
 0x5c5   : > { %4423 = vmatprep.subr.bf16.mxu1 %v6730_v38 }
 0x5c8   : > { %4424 = vmatpush3.bf16.msra.mxu1 %v5807_v26  ;;  %v4751_v26 = vld [vmem:[%s6614_s1 + $0x238] sm:$0xff]  }
 0x5c9   : > { %4425 = vmatprep.subr.bf16.mxu1 %v6730_v38 }
 0x5cc   : > { %4426 = vmatpush3.bf16.msra.mxu1 %v5814_v32  ;;  %v4752_v32 = vld [vmem:[%s6614_s1 + $0x230] sm:$0xff]  }
 0x5cd   : > { %4427 = vmatprep.subr.bf16.mxu1 %v6730_v38 }
 0x5d0   : > { %4428 = vmatpush3.bf16.msra.mxu1 %v5821_v23  ;;  %v4753_v23 = vld [vmem:[%s6614_s1 + $0x228] sm:$0xff]  }
 0x5d1   : > { %4429 = vmatprep.subr.bf16.mxu1 %v6730_v38 }
 0x5d4   : > { %4430 = vmatpush3.bf16.msra.mxu1 %v5828_v60  ;;  %v4754_v60 = vld [vmem:[%s6614_s1 + $0x220] sm:$0xff]  }
 0x5d5   : > { %4431 = vmatprep.subr.bf16.mxu1 %v6730_v38 }
 0x5d8   : > { %4432 = vmatpush3.bf16.msra.mxu1 %v5835_v53  ;;  %v4755_v53 = vld [vmem:[%s6614_s1 + $0x218] sm:$0xff]  }
 0x5d9   : > { %4457 = vmatprep.subr.bf16.mxu1 %v6730_v38 }
 0x5db   : > { %4434 = vmatmul.mubr.bf16.vlgmr.msra.gmra.mxu1 %v5558_v16  ;;  %v4739_v16 = vld [vmem:[%s6614_s1 + $0x118] sm:$0xff]  }
 0x5dc   : > { %4458 = vmatpush3.bf16.msra.mxu1 %v5843_v36  ;;  %4473 = vmatprep.mubr.msk.bf16.mxu1 %vm4781_vm0, %v6730_v38  ;;  %v4756_v36 = vld [vmem:[%s6614_s1 + $0x210] sm:$0xff]  }
 0x5dd   : > { %4459 = vmatprep.subr.bf16.mxu1 %v6730_v38 }
 0x5e0   : > { %4460 = vmatpush3.bf16.msra.mxu1 %v5852_v34  ;;  %v6391_v34 = vcombine.low %v285_v10, %v285_v10 }
 0x5e1   : > { %4461 = vmatprep.subr.bf16.mxu1 %v6730_v38 }
 0x5e4   : > { %4462 = vmatpush3.bf16.msra.mxu1 %v5859_v61  ;;  %v4757_v61 = vld [vmem:[%s6614_s1 + $0x208] sm:$0xff]  }
 0x5e5   : > { %4463 = vmatprep.subr.bf16.mxu1 %v6730_v38 }
 0x5e8   : > { %4464 = vmatpush3.bf16.msra.mxu1 %v5866_v2  ;;  %v2834_v2 = vrot.slane %v6391_v34, 1 }
 0x5e9   : > { %4465 = vmatprep.subr.bf16.mxu1 %v6730_v38 }
 0x5ec   : > { %4466 = vmatpush3.bf16.msra.mxu1 %v4739_v16  ;;  %v6806_v16 = vrot.slane %v6805_v52, 1 }
 0x5ed   : > { %4467 = vmatprep.subr.bf16.mxu1 %v6730_v38 }
 0x5f0   : > { %4468 = vmatpush3.bf16.msra.mxu1 %v4740_v21  ;;  %v6807_v21 = vld [vmem:[#allocation10_spill] sm:$0xff] }
 0x5f1   : > { %4469 = vmatprep.subr.bf16.mxu1 %v6730_v38 }
 0x5f4   : > { %4470 = vmatpush3.bf16.msra.mxu1 %v4741_v51  ;;  %v6808_v51 = vld [vmem:[#allocation25_spill] sm:$0xff] }
 0x5f5   : > { %4471 = vmatprep.subr.bf16.mxu1 %v6730_v38 }
 0x5f8   : > { %4472 = vmatpush3.bf16.msra.mxu1 %v4742_v24 }
 0x5f9   : > { %4497 = vmatprep.subr.bf16.mxu1 %v6730_v38 }
 0x5fb   : > { %4474 = vmatmul.mubr.bf16.vlgmr.msra.gmra.mxu1 %v6134_v39 }
 0x5fc   : > { %4498 = vmatpush3.bf16.msra.mxu1 %v4743_v28  ;;  %4513 = vmatprep.mubr.msk.bf16.mxu1 %vm4781_vm0, %v6730_v38 }
 0x5fd   : > { %4499 = vmatprep.subr.bf16.mxu1 %v6730_v38 }
 0x600   : > { %4500 = vmatpush3.bf16.msra.mxu1 %v4744_v19  ;;  %v6809_v19 = vld [vmem:[#allocation12_spill] sm:$0xff] }
 0x601   : > { %4501 = vmatprep.subr.bf16.mxu1 %v6730_v38 }
 0x604   : > { %4502 = vmatpush3.bf16.msra.mxu1 %v4745_v48 }
 0x605   : > { %4503 = vmatprep.subr.bf16.mxu1 %v6730_v38 }
 0x608   : > { %4504 = vmatpush3.bf16.msra.mxu1 %v4746_v31 }
 0x609   : > { %4505 = vmatprep.subr.bf16.mxu1 %v6730_v38 }
 0x60c   : > { %4506 = vmatpush3.bf16.msra.mxu1 %v4747_v56  ;;  %v6810_v56 = vld [vmem:[#allocation13_spill] sm:$0xff] }
 0x60d   : > { %4507 = vmatprep.subr.bf16.mxu1 %v6730_v38 }
 0x610   : > { %4508 = vmatpush3.bf16.msra.mxu1 %v4748_v46  ;;  %v6811_v46 = vld [vmem:[#allocation14_spill] sm:$0xff] }
 0x611   : > { %4509 = vmatprep.subr.bf16.mxu1 %v6730_v38 }
 0x614   : > { %4510 = vmatpush3.bf16.msra.mxu1 %v4749_v42  ;;  %v2788_v42 = vshll.u32 %v6391_v34, 16 }
 0x615   : > { %4511 = vmatprep.subr.bf16.mxu1 %v6730_v38 }
 0x618   : > { %4512 = vmatpush3.bf16.msra.mxu1 %v4750_v17  ;;  %v6812_v17 = vld [vmem:[#allocation15_spill] sm:$0xff] }
 0x619   : > { %4537 = vmatprep.subr.bf16.mxu1 %v6730_v38 }
 0x61b   : > { %4514 = vmatmul.mubr.bf16.vlgmr.msra.gmra.mxu1 %v285_v10  ;;  %v2786_v10 = vshrl.u32 %v6391_v34, 16  ;;  %v6817_v34 = vld [vmem:[#allocation30_spill] sm:$0xff] }
 0x61c   : > { %4538 = vmatpush3.bf16.msra.mxu1 %v4751_v26  ;;  %4553 = vmatprep.mubr.msk.bf16.mxu1 %vm4781_vm0, %v6730_v38  ;;  %v2790_v26 = vrot.slane %v2788_v42, 1 }
 0x61d   : > { %4539 = vmatprep.subr.bf16.mxu1 %v6730_v38 }
 0x620   : > { %4540 = vmatpush3.bf16.msra.mxu1 %v4752_v32  ;;  %v6813_v32 = vld [vmem:[#allocation16_spill] sm:$0xff] }
 0x621   : > { %4541 = vmatprep.subr.bf16.mxu1 %v6730_v38 }
 0x624   : > { %4542 = vmatpush3.bf16.msra.mxu1 %v4753_v23  ;;  %v2791_v23 = vor.u32 %v2790_v26, %v2786_v10 }
 0x625   : > { %4543 = vmatprep.subr.bf16.mxu1 %v6730_v38 }
 0x628   : > { %4544 = vmatpush3.bf16.msra.mxu1 %v4754_v60  ;;  %v6814_v60 = vld [vmem:[#allocation17_spill] sm:$0xff] }
 0x629   : > { %4545 = vmatprep.subr.bf16.mxu1 %v6730_v38 }
 0x62c   : > { %4546 = vmatpush3.bf16.msra.mxu1 %v4755_v53  ;;  %v6815_v53 = vld [vmem:[#allocation18_spill] sm:$0xff] }
 0x62d   : > { %4547 = vmatprep.subr.bf16.mxu1 %v6730_v38 }
 0x630   : > { %4548 = vmatpush3.bf16.msra.mxu1 %v4756_v36  ;;  %v6816_v36 = vld [vmem:[#allocation19_spill] sm:$0xff] }
 0x631   : > { %4549 = vmatprep.subr.bf16.mxu1 %v6730_v38 }
 0x634   : > { %4550 = vmatpush3.bf16.msra.mxu1 %v4757_v61  ;;  %v6818_v61 = vld [vmem:[#allocation20_spill] sm:$0xff] }
 0x635   : > { %4551 = vmatprep.subr.bf16.mxu1 %v6730_v38 }
 0x638   : > { %4552 = vmatpush3.bf16.msra.mxu1 %v4758_v20  ;;  %v4770_v20 = vld [vmem:[%s6617_s4 + $0x8] sm:$0xff]  }
 0x63b   : > { %4554 = vmatmul.mubr.bf16.vlgmr.msra.gmra.mxu1 %v2834_v2  ;;  %v6819_v2 = vld [vmem:[#allocation21_spill] sm:$0xff] }
 0x63c   : > { %4579 = vmatprep.mubr.msk.f32.mxu1 %vm1407_vm1, %v4760_v8 }
 0x65b   : > { %v2413_v39 = vpop.f32.mrf.mxu1 }
 0x65c   : > { %v2414_v44 = vadd.f32 %v6404_v1, %v2413_v39  ;;  %v6820_v39 = vld [vmem:[#allocation22_spill] sm:$0xff] }
 0x65d   : > { %v4370_v25 = vpop.f32.mrf.mxu1 }
 0x65e   : > { %4372 = vmatprep.subr.msk.mxu0 %vm1414_vm2, %v2414_v44 }
 0x65f   : > { %v2416_v27 = vpop.f32.mrf.mxu1  ;;  %4373 = vmatpush3.msk.msra.mxu0 %vm1414_vm2, %v2414_v44  ;;  %v4771_v44 = vld [vmem:[%s6617_s4] sm:$0xff]  }
 0x660   : > { %4375 = vmatmul.mubr.msk.f32.vlgmr.msra.gmra.mxu0 %vm1407_vm1, %v6416_v40  ;;  %4397 = vmatprep.subr.bf16.mxu0 %v6730_v38 }
 0x661   : > { %v4371_v4 = vpop.f32.mrf.mxu1  ;;  %4398 = vmatpush3.bf16.msra.mxu0 %v4762_v29  ;;  %4413 = vmatprep.mubr.msk.bf16.mxu0 %vm4781_vm0, %v6730_v38 }
 0x662   : > { %4399 = vmatprep.subr.bf16.mxu0 %v6730_v38 }
 0x665   : > { %4400 = vmatpush3.bf16.msra.mxu0 %v4763_v43 }
 0x666   : > { %4401 = vmatprep.subr.bf16.mxu0 %v6730_v38 }
 0x669   : > { %4402 = vmatpush3.bf16.msra.mxu0 %v4764_v55 }
 0x66a   : > { %4403 = vmatprep.subr.bf16.mxu0 %v6730_v38 }
 0x66d   : > { %4404 = vmatpush3.bf16.msra.mxu0 %v4765_v41 }
 0x66e   : > { %4405 = vmatprep.subr.bf16.mxu0 %v6730_v38 }
 0x671   : > { %4406 = vmatpush3.bf16.msra.mxu0 %v4766_v30 }
 0x672   : > { %4407 = vmatprep.subr.bf16.mxu0 %v6730_v38 }
 0x675   : > { %4408 = vmatpush3.bf16.msra.mxu0 %v4767_v45 }
 0x676   : > { %4409 = vmatprep.subr.bf16.mxu0 %v6730_v38 }
 0x679   : > { %4410 = vmatpush3.bf16.msra.mxu0 %v4768_v37 }
 0x67a   : > { %4411 = vmatprep.subr.bf16.mxu0 %v6730_v38 }
 0x67b   : > { %v6451_v50 = vpop.f32.mrf.mxu1 }
 0x67d   : > { %4412 = vmatpush3.bf16.msra.mxu0 %v5954_v12  ;;  %v4395_v11 = vpop.f32.mrf.mxu1  ;;  %v6798_v12 = vld [vmem:[#allocation3_spill] sm:$0xff] }
 0x67e   : > { %4437 = vmatprep.subr.bf16.mxu0 %v6730_v38 }
 0x67f   : > { %v2534_v33 = vpop.f32.mrf.mxu1 }
 0x680   : > { %4414 = vmatmul.mubr.bf16.vlgmr.msra.gmra.mxu0 %v4769_v0 }
 0x681   : > { %4438 = vmatpush3.bf16.msra.mxu0 %v5962_v22  ;;  %4453 = vmatprep.mubr.msk.bf16.mxu0 %vm4781_vm0, %v6730_v38  ;;  %v4396_v6 = vpop.f32.mrf.mxu1 }
 0x682   : > { %4439 = vmatprep.subr.bf16.mxu0 %v6730_v38 }
 0x685   : > { %4440 = vmatpush3.bf16.msra.mxu0 %v5971_v57  ;;  %v6799_v57 = vld [vmem:[#allocation4_spill] sm:$0xff] }
 0x686   : > { %4441 = vmatprep.subr.bf16.mxu0 %v6730_v38 }
 0x689   : > { %4442 = vmatpush3.bf16.msra.mxu0 %v5978_v58 }
 0x68a   : > { %4443 = vmatprep.subr.bf16.mxu0 %v6730_v38 }
 0x68d   : > { %4444 = vmatpush3.bf16.msra.mxu0 %v5985_v54 }
 0x68e   : > { %4445 = vmatprep.subr.bf16.mxu0 %v6730_v38 }
 0x691   : > { %4446 = vmatpush3.bf16.msra.mxu0 %v5992_v63 }
 0x692   : > { %4447 = vmatprep.subr.bf16.mxu0 %v6730_v38 }
 0x695   : > { %4448 = vmatpush3.bf16.msra.mxu0 %v5999_v15  ;;  %v6801_v15 = vld [vmem:[#allocation6_spill] sm:$0xff] }
 0x696   : > { %4449 = vmatprep.subr.bf16.mxu0 %v6730_v38 }
 0x699   : > { %4450 = vmatpush3.bf16.msra.mxu0 %v6006_v3  ;;  %v6802_v3 = vld [vmem:[#allocation7_spill] sm:$0xff] }
 0x69a   : > { %4451 = vmatprep.subr.bf16.mxu0 %v6730_v38 }
 0x69b   : > { %v6481_v22 = vpop.f32.mrf.mxu1 }
 0x69d   : > { %4452 = vmatpush3.bf16.msra.mxu0 %v6013_v9  ;;  %v4435_v58 = vpop.f32.mrf.mxu1  ;;  %v6803_v9 = vld [vmem:[#allocation8_spill] sm:$0xff] }
 0x69e   : > { %4477 = vmatprep.subr.bf16.mxu0 %v6730_v38 }
 0x69f   : > { %v2614_v54 = vpop.f32.mrf.mxu1 }
 0x6a0   : > { %4454 = vmatmul.mubr.bf16.vlgmr.msra.gmra.mxu0 %v5898_v49  ;;  %v6800_v49 = vld [vmem:[#allocation5_spill] sm:$0xff] }
 0x6a1   : > { %4478 = vmatpush3.bf16.msra.mxu0 %v6021_v13  ;;  %4493 = vmatprep.mubr.msk.bf16.mxu0 %vm4781_vm0, %v6730_v38  ;;  %v4436_v63 = vpop.f32.mrf.mxu1  ;;  %v6804_v13 = vld [vmem:[#allocation9_spill] sm:$0xff] }
 0x6a2   : > { %4479 = vmatprep.subr.bf16.mxu0 %v6730_v38 }
 0x6a5   : > { %4480 = vmatpush3.bf16.msra.mxu0 %v6798_v12 }
 0x6a6   : > { %4481 = vmatprep.subr.bf16.mxu0 %v6730_v38 }
 0x6a9   : > { %4482 = vmatpush3.bf16.msra.mxu0 %v6799_v57 }
 0x6aa   : > { %4483 = vmatprep.subr.bf16.mxu0 %v6730_v38 }
 0x6ad   : > { %4484 = vmatpush3.bf16.msra.mxu0 %v6800_v49 }
 0x6ae   : > { %4485 = vmatprep.subr.bf16.mxu0 %v6730_v38 }
 0x6b1   : > { %4486 = vmatpush3.bf16.msra.mxu0 %v6801_v15  ;;  %v6822_v15 = vld [vmem:[#allocation23_spill] sm:$0xff] }
 0x6b2   : > { %4487 = vmatprep.subr.bf16.mxu0 %v6730_v38 }
 0x6b5   : > { %4488 = vmatpush3.bf16.msra.mxu0 %v6802_v3 }
 0x6b6   : > { %4489 = vmatprep.subr.bf16.mxu0 %v6730_v38 }
 0x6b9   : > { %4490 = vmatpush3.bf16.msra.mxu0 %v6803_v9 }
 0x6ba   : > { %4491 = vmatprep.subr.bf16.mxu0 %v6730_v38 }
 0x6bb   : > { %v6503_v24 = vpop.f32.mrf.mxu1 }
 0x6bd   : > { %4492 = vmatpush3.bf16.msra.mxu0 %v6804_v13  ;;  %v4475_v28 = vpop.f32.mrf.mxu1 }
 0x6be   : > { %4517 = vmatprep.subr.bf16.mxu0 %v6730_v38 }
 0x6bf   : > { %v2696_v48 = vpop.f32.mrf.mxu1 }
 0x6c0   : > { %4494 = vmatmul.mubr.bf16.vlgmr.msra.gmra.mxu0 %v6806_v16 }
 0x6c1   : > { %4518 = vmatpush3.bf16.msra.mxu0 %v6807_v21  ;;  %4533 = vmatprep.mubr.msk.bf16.mxu0 %vm4781_vm0, %v6730_v38  ;;  %v4476_v31 = vpop.f32.mrf.mxu1 }
 0x6c2   : > { %4519 = vmatprep.subr.bf16.mxu0 %v6730_v38 }
 0x6c5   : > { %4520 = vmatpush3.bf16.msra.mxu0 %v6808_v51 }
 0x6c6   : > { %4521 = vmatprep.subr.bf16.mxu0 %v6730_v38 }
 0x6c9   : > { %4522 = vmatpush3.bf16.msra.mxu0 %v6809_v19 }
 0x6ca   : > { %4523 = vmatprep.subr.bf16.mxu0 %v6730_v38 }
 0x6cd   : > { %4524 = vmatpush3.bf16.msra.mxu0 %v6810_v56 }
 0x6ce   : > { %4525 = vmatprep.subr.bf16.mxu0 %v6730_v38 }
 0x6d1   : > { %4526 = vmatpush3.bf16.msra.mxu0 %v6811_v46 }
 0x6d2   : > { %4527 = vmatprep.subr.bf16.mxu0 %v6730_v38 }
 0x6d5   : > { %4528 = vmatpush3.bf16.msra.mxu0 %v6812_v17 }
 0x6d6   : > { %4529 = vmatprep.subr.bf16.mxu0 %v6730_v38 }
 0x6d9   : > { %4530 = vmatpush3.bf16.msra.mxu0 %v6813_v32 }
 0x6da   : > { %4531 = vmatprep.subr.bf16.mxu0 %v6730_v38 }
 0x6db   : > { %v2775_v25 = vpop.f32.mrf.mxu1 }
 0x6dd   : > { %4532 = vmatpush3.bf16.msra.mxu0 %v6814_v60  ;;  %v4515_v27 = vpop.f32.mrf.mxu1 }
 0x6de   : > { %4557 = vmatprep.subr.bf16.mxu0 %v6730_v38 }
 0x6df   : > { %v2778_v8 = vpop.f32.mrf.mxu1 }
 0x6e0   : > { %4534 = vmatmul.mubr.bf16.vlgmr.msra.gmra.mxu0 %v2791_v23 }
 0x6e1   : > { %4558 = vmatpush3.bf16.msra.mxu0 %v6815_v53  ;;  %4573 = vmatprep.mubr.msk.bf16.mxu0 %vm4781_vm0, %v6730_v38  ;;  %v4516_v4 = vpop.f32.mrf.mxu1 }
 0x6e2   : > { %4559 = vmatprep.subr.bf16.mxu0 %v6730_v38 }
 0x6e5   : > { %4560 = vmatpush3.bf16.msra.mxu0 %v6816_v36 }
 0x6e6   : > { %4561 = vmatprep.subr.bf16.mxu0 %v6730_v38 }
 0x6e9   : > { %4562 = vmatpush3.bf16.msra.mxu0 %v6817_v34 }
 0x6ea   : > { %4563 = vmatprep.subr.bf16.mxu0 %v6730_v38 }
 0x6ed   : > { %4564 = vmatpush3.bf16.msra.mxu0 %v6818_v61 }
 0x6ee   : > { %4565 = vmatprep.subr.bf16.mxu0 %v6730_v38 }
 0x6f1   : > { %4566 = vmatpush3.bf16.msra.mxu0 %v6819_v2 }
 0x6f2   : > { %4567 = vmatprep.subr.bf16.mxu0 %v6730_v38 }
 0x6f5   : > { %4568 = vmatpush3.bf16.msra.mxu0 %v6820_v39 }
 0x6f6   : > { %4569 = vmatprep.subr.bf16.mxu0 %v6730_v38 }
 0x6f9   : > { %4570 = vmatpush3.bf16.msra.mxu0 %v4770_v20 }
 0x6fa   : > { %4571 = vmatprep.subr.bf16.mxu0 %v6730_v38 }
 0x6fb   : > { %v2870_v29 = vpop.f32.mrf.mxu1 }
 0x6fd   : > { %4572 = vmatpush3.bf16.msra.mxu0 %v4771_v44  ;;  %v4555_v55 = vpop.f32.mrf.mxu1 }
 0x6ff   : > { %v2873_v11 = vpop.f32.mrf.mxu1 }
 0x701   : > { %v4556_v49 = vpop.f32.mrf.mxu1 }
 0x720   : > { %v4376_v43 = vpop.f32.mrf.mxu0 }
 0x721   : > { %v6540_v41 = vmul.f32 0.125, %v4376_v43  ;;  %v6542_v30 = vmul.f32 0.375, %v4376_v43  ;;  %v6544_v38 = vmul.f32 0.625, %v4376_v43  ;;  %v6546_v45 = vmul.f32 0.875, %v4376_v43 }
 0x722   : > { %v2488_v37 = vpop.f32.mrf.mxu0 }
 0x723   : > { %v3030_v33 = vadd.f32 %v6540_v41, %v6214_v7  ;;  %v3034_v0 = vadd.f32 %v6542_v30, %v6204_v59  ;;  %v3038_v6 = vadd.f32 %v6544_v38, %v6202_v14  ;;  %v3042_v12 = vadd.f32 %v6546_v45, %v6200_v62  ;;  %v6821_v14 = vld [vmem:[#allocation24_spill] sm:$0xff] }
 0x724   : > { %v6556_v57 = vmul.f32 0.125, %v2488_v37  ;;  %v6558_v58 = vmul.f32 0.375, %v2488_v37  ;;  %v6560_v54 = vmul.f32 0.625, %v2488_v37  ;;  %v6562_v7 = vmul.f32 0.875, %v2488_v37 }
 0x725   : > { %3076 = vst [vmem:[%s6209_s25 + $0x68] sm:$0xff] %v3030_v33  ;;  %3078 = vst [vmem:[%s6209_s25 + $0x78] sm:$0xff] %v3034_v0 }
 0x726   : > { %3080 = vst [vmem:[%s6209_s25 + $0x88] sm:$0xff] %v3038_v6  ;;  %3082 = vst [vmem:[%s6209_s25 + $0x98] sm:$0xff] %v3042_v12  ;;  %v3029_v59 = vadd.f32 %v6556_v57, %v6234_v35  ;;  %v3033_v62 = vadd.f32 %v6558_v58, %v6232_v47  ;;  %v3037_v63 = vadd.f32 %v6560_v54, %v6821_v14 }
 0x727   : > { %v3041_v3 = vadd.f32 %v6562_v7, %v6822_v15 }
 0x728   : > { %3075 = vst [vmem:[%s6209_s25 + $0x60] sm:$0xff] %v3029_v59  ;;  %3077 = vst [vmem:[%s6209_s25 + $0x70] sm:$0xff] %v3033_v62 }
 0x729   : > { %3079 = vst [vmem:[%s6209_s25 + $0x80] sm:$0xff] %v3037_v63  ;;  %3081 = vst [vmem:[%s6209_s25 + $0x90] sm:$0xff] %v3041_v3 }
 0x740   : > { %v2571_v9 = vpop.f32.mrf.mxu0 }
 0x741   : > { %v2572_v56 = vadd.f32 %v2571_v9, %v6451_v50 }
 0x742   : > { %v4415_v13 = vpop.f32.mrf.mxu0 }
 0x743   : > { %v2617_v46 = vadd.f32 %v6481_v22, %v2572_v56 }
 0x744   : > { %v2574_v52 = vpop.f32.mrf.mxu0 }
 0x746   : > { %v4416_v16 = vpop.f32.mrf.mxu0 }
 0x760   : > { %v2652_v21 = vpop.f32.mrf.mxu0 }
 0x761   : > { %v2658_v42 = vadd.f32 %v2652_v21, %v2617_v46 }
 0x762   : > { %v4455_v51 = vpop.f32.mrf.mxu0 }
 0x763   : > { %v2699_v17 = vadd.f32 %v6503_v24, %v2658_v42 }
 0x764   : > { %v2655_v35 = vpop.f32.mrf.mxu0 }
 0x766   : > { %v4456_v28 = vpop.f32.mrf.mxu0 }
 0x780   : > { %v2734_v19 = vpop.f32.mrf.mxu0 }
 0x781   : > { %v2740_v10 = vadd.f32 %v2734_v19, %v2699_v17 }
 0x782   : > { %v4495_v47 = vpop.f32.mrf.mxu0 }
 0x783   : > { %v2781_v26 = vadd.f32 %v2775_v25, %v2740_v10 }
 0x784   : > { %v2737_v48 = vpop.f32.mrf.mxu0 }
 0x786   : > { %v4496_v31 = vpop.f32.mrf.mxu0 }
 0x7a0   : > { %v2827_v32 = vpop.f32.mrf.mxu0 }
 0x7a1   : > { %v2833_v23 = vadd.f32 %v2827_v32, %v2781_v26 }
 0x7a2   : > { %v4535_v60 = vpop.f32.mrf.mxu0 }
 0x7a3   : > { %v2876_v53 = vadd.f32 %v2870_v29, %v2833_v23 }
 0x7a4   : > { %v2830_v36 = vpop.f32.mrf.mxu0 }
 0x7a5   : > { %v2877_v34 = vmul.f32 %v6256_v18, %v2876_v53 }
 0x7a6   : > { %v4536_v61 = vpop.f32.mrf.mxu0 }
 0x7a7   : > { %v2878_v2 = vadd.f32 %v6262_v5, %v2877_v34 }
 0x7a9   : > { %v2879_v39 = vmax.f32 %v2878_v2, 0.0 }
 0x7ab   : > { %v2880_v20 = vpack.c.bf16 %v2879_v39, %v2879_v39 }
 0x7ad   : > { %4574 = vmatmul.mubr.bf16.vlgmr.msra.gmra.mxu0 %v2880_v20 }
 0x86d   : > { %v2915_v50 = vpop.f32.mrf.mxu0 }
 0x86e   : > { %v2916_v22 = vadd.f32 %v6404_v1, %v2915_v50 }
 0x86f   : > { %v4575_v44 = vpop.f32.mrf.mxu0 }
 0x870   : > { %4577 = vmatprep.subr.msk.mxu1 %vm1414_vm2, %v2916_v22 }
 0x871   : > { %v2918_v24 = vpop.f32.mrf.mxu0  ;;  %4578 = vmatpush3.msk.msra.mxu1 %vm1414_vm2, %v2916_v22 }
 0x872   : > { %4580 = vmatmul.mubr.msk.f32.vlgmr.msra.gmra.mxu1 %vm1407_vm1, %v6416_v40 }
 0x873   : > { %v4576_v18 = vpop.f32.mrf.mxu0 }
 0x932   : > { %v4581_v25 = vpop.f32.mrf.mxu1 }
 0x933   : > { %v3044_v5 = vmul.f32 0.125, %v4581_v25  ;;  %v3048_v27 = vmul.f32 0.375, %v4581_v25  ;;  %v3052_v8 = vmul.f32 0.625, %v4581_v25  ;;  %v3056_v4 = vmul.f32 0.875, %v4581_v25 }
 0x934   : > { %v2990_v1 = vpop.f32.mrf.mxu1 }
 0x935   : > { %v3046_v29 = vadd.f32 %v3044_v5, %v6546_v45  ;;  %v3050_v43 = vadd.f32 %v3048_v27, %v6544_v38  ;;  %v3054_v55 = vadd.f32 %v3052_v8, %v6542_v30  ;;  %v3058_v40 = vadd.f32 %v3056_v4, %v6540_v41 }
 0x936   : > { %v3060_v37 = vadd.f32 %v3056_v4, %v3044_v5  ;;  %v3062_v11 = vadd.f32 %v3052_v8, %v3048_v27  ;;  %v3043_v33 = vmul.f32 0.125, %v2990_v1  ;;  %v3047_v0 = vmul.f32 0.375, %v2990_v1 }
 0x937   : > { %3084 = vst [vmem:[%s6209_s25 + $0xa8] sm:$0xff] %v3046_v29  ;;  %3086 = vst [vmem:[%s6209_s25 + $0xb8] sm:$0xff] %v3050_v43  ;;  %v3051_v45 = vmul.f32 0.625, %v2990_v1  ;;  %v3055_v38 = vmul.f32 0.875, %v2990_v1 }
 0x938   : > { %3088 = vst [vmem:[%s6209_s25 + $0xc8] sm:$0xff] %v3054_v55  ;;  %3090 = vst [vmem:[%s6209_s25 + $0xd8] sm:$0xff] %v3058_v40  ;;  %v3045_v41 = vadd.f32 %v3043_v33, %v6562_v7  ;;  %v3049_v30 = vadd.f32 %v3047_v0, %v6560_v54 }
 0x939   : > { %3092 = vst [vmem:[%s6209_s25 + $0xe8] sm:$0xff] %v3060_v37  ;;  %3094 = vst [vmem:[%s6209_s25 + $0xf8] sm:$0xff] %v3062_v11  ;;  %v3053_v6 = vadd.f32 %v3051_v45, %v6558_v58  ;;  %v3057_v12 = vadd.f32 %v3055_v38, %v6556_v57  ;;  %v3059_v49 = vadd.f32 %v3055_v38, %v3043_v33 }
 0x93a   : > { %v3061_v59 = vadd.f32 %v3051_v45, %v3047_v0  ;;  %3083 = vst [vmem:[%s6209_s25 + $0xa0] sm:$0xff] %v3045_v41  ;;  %3085 = vst [vmem:[%s6209_s25 + $0xb0] sm:$0xff] %v3049_v30 }
 0x93b   : > { %3087 = vst [vmem:[%s6209_s25 + $0xc0] sm:$0xff] %v3053_v6  ;;  %3089 = vst [vmem:[%s6209_s25 + $0xd0] sm:$0xff] %v3057_v12 }
 0x93c   : > { %3091 = vst [vmem:[%s6209_s25 + $0xe0] sm:$0xff] %v3059_v49  ;;  %3093 = vst [vmem:[%s6209_s25 + $0xf0] sm:$0xff] %v3061_v59 }
 0x93d PF: > { %s17_s24 = sadd.s32 1, %s4778_s24  }
 0x93e   : > { %p14_p4 = scmp.ge.s32.totalorder %s17_s24, 4  }
 0x940   :  { %16 = sbr.rel (!%p14_p4) target bundleno = 1 (0x1), region = 86 }

</bundles_post_ra>
